<compile_context>
chip_gen: v6e
topology: v6e:2x2x1
jax: 0.10.0
libtpu: 0.0.40
codegen_flags: <defaults>
</compile_context>

<pallas_src>
import math

import jax
import jax.numpy as jnp
from jax.experimental import pallas as pl
from jax.experimental.pallas import tpu as pltpu

N_OUT = 64           # points produced by the generator surrogate
SPHERE_SAMPLES = 64  # fixed by the module (sphere_samples = 64)


# ----------------------------- fused Pallas kernel ---------------------------

def _scarp_kernel(gt_ref, s2_ref, y1t_ref, *refs):
    (pn1_w, pn1_b, pn2_w, pn2_b,
     t1_w, t1_b, t2_w, t2_b, t3_w, t3_b,
     t4_w, t4_b, t5_w, t5_b, t6_w, t6_b,
     inv_w, inv_b,
     bm_w, bm_b, bl_w, bl_b,
     tm_w, tm_b, tl_w, tl_b,
     rm_w, rm_b, rl_w, rl_b,
     g_w, g_b,
     basis_ref, trans_ref, pcd_ref) = refs

    x = gt_ref[0]                     # (N, 3)  this batch element's points
    s2 = s2_ref[...]                  # (S, 3)  fibonacci sphere samples
    y1t = y1t_ref[...]                # (3, S)  degree-1 real SH basis (transposed)
    inv_n = 1.0 / x.shape[0]
    inv_s = 1.0 / s2.shape[0]

    def dense(v, w_ref, b_ref, relu):
        y = jnp.dot(v, w_ref[...], preferred_element_type=jnp.float32) + b_ref[...]
        return jnp.maximum(y, 0.0) if relu else y

    def dense_k3(v, w_ref, b_ref):
        # K == 3 contraction done on the VPU instead of wasting an MXU pass.
        w = w_ref[...]
        y = (v[:, 0:1] * w[0:1, :]
             + v[:, 1:2] * w[1:2, :]
             + v[:, 2:3] * w[2:3, :]) + b_ref[...]
        return jnp.maximum(y, 0.0)

    # ---- self.pointnet2(gt.permute(0, 2, 1)) --------------------------------
    # TODO(synk): PointNet++ set abstraction is undefined in the source; use a
    # point-wise MLP + max-pool PointNet surrogate giving a 128-d global feature.
    h = dense_k3(x, pn1_w, pn1_b)                       # (N, 64)
    h = dense(h, pn2_w, pn2_b, True)                    # (N, 128)
    pn_feat = jnp.max(h, axis=0, keepdims=True)         # (1, 128)

    # ---- self.tfn(gt) --------------------------------------------------------
    # TODO(synk): the Tensor Field Network (Clebsch-Gordan convolutions) is
    # undefined in the source; surrogate = point-wise MLP (mlp_units) + a
    # directional projection onto the S2 samples ("raw" equivariant features)
    # and a linear invariant head.
    f = dense_k3(x, t1_w, t1_b)                         # (N, 32)
    f = dense(f, t2_w, t2_b, True)                      # (N, 32)
    f = dense(f, t3_w, t3_b, True)                      # (N, 64)
    f = dense(f, t4_w, t4_b, True)                      # (N, 64)
    f = dense(f, t5_w, t5_b, True)                      # (N, 128)
    f = dense(f, t6_w, t6_b, True)                      # (N, 256)

    inv = dense(f, inv_w, inv_b, True)                  # (N, 128)
    inv_feat = jnp.max(inv, axis=0, keepdims=True)      # (1, 128)

    # directional aggregation: raw[s, c] = mean_n relu(<x_n, s2_s>) * f[n, c]
    dw = jax.lax.dot_general(s2, x, (((1,), (1,)), ((), ())),
                             preferred_element_type=jnp.float32)      # (S, N)
    dw = jnp.maximum(dw, 0.0)
    raw = jnp.dot(dw, f, preferred_element_type=jnp.float32) * inv_n  # (S, 256)

    # ---- basis / frame head (num_frames == 1) --------------------------------
    # TODO(synk): BatchNorm inside MLP_layer is treated in eval mode with default
    # running stats (identity) since parameters are synthetic.
    bh = dense(raw, bm_w, bm_b, True)                   # (S, 64)
    bz = dense(bh, bl_w, bl_b, False)                   # (S, 3)
    basis = jnp.dot(y1t, bz, preferred_element_type=jnp.float32) * inv_s   # (3, 3)
    nrm = jnp.sqrt(jnp.sum(basis * basis, axis=-1, keepdims=True))
    basis_ref[0] = basis / jnp.maximum(nrm, 1e-6)       # F.normalize(dim=-1)

    # ---- translation head ----------------------------------------------------
    th = dense(raw, tm_w, tm_b, True)                   # (S, 64)
    tp = jnp.dot(y1t, th, preferred_element_type=jnp.float32) * inv_s      # (3, 64)
    trans_ref[0] = dense(tp, tl_w, tl_b, False)         # (3, 1)

    # ---- invariant reduction + TreeGAN generator surrogate -------------------
    # TODO(synk): the tree-GCN Generator depends on external args (G_FEAT, DEGREE,
    # support) and is undefined; surrogate = single dense decoder 128 -> N_OUT*3.
    feats = jnp.concatenate([pn_feat, inv_feat], axis=1)   # (1, 256)
    r = dense(feats, rm_w, rm_b, True)                     # (1, 128)
    red = dense(r, rl_w, rl_b, False)                      # (1, 128)
    pcd_ref[0] = jnp.tanh(dense(red, g_w, g_b, False))     # (1, N_OUT*3)


# ----------------------------- glue / parameters -----------------------------

def fibonacci_sphere(n):
    """torch_fibonnacci_sphere_sampling equivalent: (n, 3) unit directions."""
    i = jnp.arange(n, dtype=jnp.float32)
    golden = math.pi * (3.0 - math.sqrt(5.0))
    y = 1.0 - 2.0 * (i + 0.5) / n
    r = jnp.sqrt(jnp.maximum(0.0, 1.0 - y * y))
    theta = golden * i
    return jnp.stack([jnp.cos(theta) * r, y, jnp.sin(theta) * r], axis=-1)


def init_linear(key, fan_in, fan_out):
    kw, kb = jax.random.split(key)
    s = 1.0 / math.sqrt(fan_in)
    w = jax.random.uniform(kw, (fan_in, fan_out), jnp.float32, -s, s)
    b = jax.random.uniform(kb, (fan_out,), jnp.float32, -s, s)
    return w, b


def init_scarp_params(key):
    keys = iter(jax.random.split(key, 32))
    p = {}
    # Pointnet surrogate: point-wise MLP 3 -> 64 -> 128, max-pooled to 128-d.
    p["pn1"] = init_linear(next(keys), 3, 64)
    p["pn2"] = init_linear(next(keys), 64, 128)
    # TFN surrogate point-wise MLP following mlp_units [[32,32],[64,64],[128,256]]
    dims = [3, 32, 32, 64, 64, 128, 256]
    p["tfn_mlp"] = [init_linear(next(keys), dims[i], dims[i + 1])
                    for i in range(len(dims) - 1)]
    # invariant head (128-d so concat dim = 128 + 128 = 256 = reduction in_channels)
    p["tfn_inv"] = init_linear(next(keys), 256, 128)
    # basis branch (num_frames == 1): MLP_layer(256 -> [64]) + MLP(64 -> 3)
    p["basis_mlp"] = init_linear(next(keys), 256, 64)
    p["basis_layer"] = init_linear(next(keys), 64, 3)
    # translation branch: MLP_layer(256 -> [64]) + MLP(64 -> 1)
    p["trans_mlp"] = init_linear(next(keys), 256, 64)
    p["trans_layer"] = init_linear(next(keys), 64, 1)
    # reduction: MLP_layer(256 -> [128]) + MLP(128 -> 128)
    p["red_mlp"] = init_linear(next(keys), 256, 128)
    p["red_layer"] = init_linear(next(keys), 128, 128)
    # TreeGAN generator surrogate: 128 -> N_OUT*3
    p["gen"] = init_linear(next(keys), 128, N_OUT * 3)
    return p


def _flat_params(params):
    ordered = [
        params["pn1"], params["pn2"],
        *params["tfn_mlp"],
        params["tfn_inv"],
        params["basis_mlp"], params["basis_layer"],
        params["trans_mlp"], params["trans_layer"],
        params["red_mlp"], params["red_layer"],
        params["gen"],
    ]
    arrays, specs = [], []
    for w, b in ordered:
        arrays.append(w)
        specs.append(pl.BlockSpec(w.shape, lambda i: (0, 0)))
        b2 = b.reshape(1, -1)
        arrays.append(b2)
        specs.append(pl.BlockSpec(b2.shape, lambda i: (0, 0)))
    return arrays, specs


def scarp_forward(params, gt, s2, y1t):
    B, N, _ = gt.shape
    S = s2.shape[0]
    w_arrays, w_specs = _flat_params(params)

    basis, t, pcd = pl.pallas_call(
        _scarp_kernel,
        out_shape=(
            jax.ShapeDtypeStruct((B, 3, 3), jnp.float32),
            jax.ShapeDtypeStruct((B, 3, 1), jnp.float32),
            jax.ShapeDtypeStruct((B, 1, N_OUT * 3), jnp.float32),
        ),
        grid=(B,),
        in_specs=[
            pl.BlockSpec((1, N, 3), lambda i: (i, 0, 0)),   # gt (per-batch block)
            pl.BlockSpec((S, 3), lambda i: (0, 0)),          # S2 samples (resident)
            pl.BlockSpec((3, S), lambda i: (0, 0)),          # SH-1 basis, pre-transposed
            *w_specs,                                        # all weights (resident)
        ],
        out_specs=(
            pl.BlockSpec((1, 3, 3), lambda i: (i, 0, 0)),
            pl.BlockSpec((1, 3, 1), lambda i: (i, 0, 0)),
            pl.BlockSpec((1, 1, N_OUT * 3), lambda i: (i, 0, 0)),
        ),
        compiler_params=pltpu.CompilerParams(
            dimension_semantics=("parallel",)),              # v7x: 2 TCs split the batch
    )(gt, s2, y1t, *w_arrays)

    # torch.stack([t[:, 2], t[:, 0], t[:, 1]], dim=-1): 6-element permute, wrapper-side
    translation = jnp.stack([t[:, 2], t[:, 0], t[:, 1]], axis=-1)      # (B, 1, 3)
    return {"pcd": pcd.reshape(B, N_OUT, 3), "E": [basis], "T": [translation]}


if __name__ == "__main__":
    B, N = 2, 64
    key = jax.random.PRNGKey(0)
    kx, kp = jax.random.split(key)
    gt = jax.random.normal(kx, (B, N, 3), jnp.float32)
    params = init_scarp_params(kp)

    s2 = fibonacci_sphere(SPHERE_SAMPLES)                              # (S, 3)
    # real degree-1 spherical harmonics Y_1,{-1,0,+1} ~ (y, z, x), pre-transposed (3, S)
    c1 = math.sqrt(3.0 / (4.0 * math.pi))
    y1t = c1 * jnp.stack([s2[:, 1], s2[:, 2], s2[:, 0]], axis=0)       # (3, S)

    fwd = jax.jit(scarp_forward)
    out = fwd(params, gt, s2, y1t)
    jax.tree_util.tree_map(lambda a: a.block_until_ready(), out)

    assert out["pcd"].shape == (B, N_OUT, 3)
    assert out["E"][0].shape == (B, 3, 3)
    assert out["T"][0].shape == (B, 1, 3)
    print("KERNEL_OK")
</pallas_src>

<mosaic_0001>
module attributes {stable_mosaic.version = 11 : i64} {
  func.func @_scarp_kernel(%arg0: i32, %arg1: memref<1x64x3xf32, #tpu.memory_space<vmem>>, %arg2: memref<64x3xf32, #tpu.memory_space<vmem>>, %arg3: memref<3x64xf32, #tpu.memory_space<vmem>>, %arg4: memref<3x64xf32, #tpu.memory_space<vmem>>, %arg5: memref<1x64xf32, #tpu.memory_space<vmem>>, %arg6: memref<64x128xf32, #tpu.memory_space<vmem>>, %arg7: memref<1x128xf32, #tpu.memory_space<vmem>>, %arg8: memref<3x32xf32, #tpu.memory_space<vmem>>, %arg9: memref<1x32xf32, #tpu.memory_space<vmem>>, %arg10: memref<32x32xf32, #tpu.memory_space<vmem>>, %arg11: memref<1x32xf32, #tpu.memory_space<vmem>>, %arg12: memref<32x64xf32, #tpu.memory_space<vmem>>, %arg13: memref<1x64xf32, #tpu.memory_space<vmem>>, %arg14: memref<64x64xf32, #tpu.memory_space<vmem>>, %arg15: memref<1x64xf32, #tpu.memory_space<vmem>>, %arg16: memref<64x128xf32, #tpu.memory_space<vmem>>, %arg17: memref<1x128xf32, #tpu.memory_space<vmem>>, %arg18: memref<128x256xf32, #tpu.memory_space<vmem>>, %arg19: memref<1x256xf32, #tpu.memory_space<vmem>>, %arg20: memref<256x128xf32, #tpu.memory_space<vmem>>, %arg21: memref<1x128xf32, #tpu.memory_space<vmem>>, %arg22: memref<256x64xf32, #tpu.memory_space<vmem>>, %arg23: memref<1x64xf32, #tpu.memory_space<vmem>>, %arg24: memref<64x3xf32, #tpu.memory_space<vmem>>, %arg25: memref<1x3xf32, #tpu.memory_space<vmem>>, %arg26: memref<256x64xf32, #tpu.memory_space<vmem>>, %arg27: memref<1x64xf32, #tpu.memory_space<vmem>>, %arg28: memref<64x1xf32, #tpu.memory_space<vmem>>, %arg29: memref<1x1xf32, #tpu.memory_space<vmem>>, %arg30: memref<256x128xf32, #tpu.memory_space<vmem>>, %arg31: memref<1x128xf32, #tpu.memory_space<vmem>>, %arg32: memref<128x128xf32, #tpu.memory_space<vmem>>, %arg33: memref<1x128xf32, #tpu.memory_space<vmem>>, %arg34: memref<128x192xf32, #tpu.memory_space<vmem>>, %arg35: memref<1x192xf32, #tpu.memory_space<vmem>>, %arg36: memref<1x3x3xf32, #tpu.memory_space<vmem>>, %arg37: memref<1x3x1xf32, #tpu.memory_space<vmem>>, %arg38: memref<1x1x192xf32, #tpu.memory_space<vmem>>) attributes {dimension_semantics = [#tpu.dimension_semantics<parallel>], iteration_bounds = array<i64: 2>, scalar_prefetch = 0 : i64, scratch_operands = 0 : i64, tpu.core_type = #tpu.core_type<tc>, window_params = [{transform_indices = @transform_0, window_bounds = array<i64: 1, 64, 3>}, {pipeline_mode = #tpu.pipeline_mode<synchronous>, transform_indices = @transform_1, window_bounds = array<i64: 64, 3>}, {pipeline_mode = #tpu.pipeline_mode<synchronous>, transform_indices = @transform_2, window_bounds = array<i64: 3, 64>}, {pipeline_mode = #tpu.pipeline_mode<synchronous>, transform_indices = @transform_3, window_bounds = array<i64: 3, 64>}, {pipeline_mode = #tpu.pipeline_mode<synchronous>, transform_indices = @transform_4, window_bounds = array<i64: 1, 64>}, {pipeline_mode = #tpu.pipeline_mode<synchronous>, transform_indices = @transform_5, window_bounds = array<i64: 64, 128>}, {pipeline_mode = #tpu.pipeline_mode<synchronous>, transform_indices = @transform_6, window_bounds = array<i64: 1, 128>}, {pipeline_mode = #tpu.pipeline_mode<synchronous>, transform_indices = @transform_7, window_bounds = array<i64: 3, 32>}, {pipeline_mode = #tpu.pipeline_mode<synchronous>, transform_indices = @transform_8, window_bounds = array<i64: 1, 32>}, {pipeline_mode = #tpu.pipeline_mode<synchronous>, transform_indices = @transform_9, window_bounds = array<i64: 32, 32>}, {pipeline_mode = #tpu.pipeline_mode<synchronous>, transform_indices = @transform_10, window_bounds = array<i64: 1, 32>}, {pipeline_mode = #tpu.pipeline_mode<synchronous>, transform_indices = @transform_11, window_bounds = array<i64: 32, 64>}, {pipeline_mode = #tpu.pipeline_mode<synchronous>, transform_indices = @transform_12, window_bounds = array<i64: 1, 64>}, {pipeline_mode = #tpu.pipeline_mode<synchronous>, transform_indices = @transform_13, window_bounds = array<i64: 64, 64>}, {pipeline_mode = #tpu.pipeline_mode<synchronous>, transform_indices = @transform_14, window_bounds = array<i64: 1, 64>}, {pipeline_mode = #tpu.pipeline_mode<synchronous>, transform_indices = @transform_15, window_bounds = array<i64: 64, 128>}, {pipeline_mode = #tpu.pipeline_mode<synchronous>, transform_indices = @transform_16, window_bounds = array<i64: 1, 128>}, {pipeline_mode = #tpu.pipeline_mode<synchronous>, transform_indices = @transform_17, window_bounds = array<i64: 128, 256>}, {pipeline_mode = #tpu.pipeline_mode<synchronous>, transform_indices = @transform_18, window_bounds = array<i64: 1, 256>}, {pipeline_mode = #tpu.pipeline_mode<synchronous>, transform_indices = @transform_19, window_bounds = array<i64: 256, 128>}, {pipeline_mode = #tpu.pipeline_mode<synchronous>, transform_indices = @transform_20, window_bounds = array<i64: 1, 128>}, {pipeline_mode = #tpu.pipeline_mode<synchronous>, transform_indices = @transform_21, window_bounds = array<i64: 256, 64>}, {pipeline_mode = #tpu.pipeline_mode<synchronous>, transform_indices = @transform_22, window_bounds = array<i64: 1, 64>}, {pipeline_mode = #tpu.pipeline_mode<synchronous>, transform_indices = @transform_23, window_bounds = array<i64: 64, 3>}, {pipeline_mode = #tpu.pipeline_mode<synchronous>, transform_indices = @transform_24, window_bounds = array<i64: 1, 3>}, {pipeline_mode = #tpu.pipeline_mode<synchronous>, transform_indices = @transform_25, window_bounds = array<i64: 256, 64>}, {pipeline_mode = #tpu.pipeline_mode<synchronous>, transform_indices = @transform_26, window_bounds = array<i64: 1, 64>}, {pipeline_mode = #tpu.pipeline_mode<synchronous>, transform_indices = @transform_27, window_bounds = array<i64: 64, 1>}, {pipeline_mode = #tpu.pipeline_mode<synchronous>, transform_indices = @transform_28, window_bounds = array<i64: 1, 1>}, {pipeline_mode = #tpu.pipeline_mode<synchronous>, transform_indices = @transform_29, window_bounds = array<i64: 256, 128>}, {pipeline_mode = #tpu.pipeline_mode<synchronous>, transform_indices = @transform_30, window_bounds = array<i64: 1, 128>}, {pipeline_mode = #tpu.pipeline_mode<synchronous>, transform_indices = @transform_31, window_bounds = array<i64: 128, 128>}, {pipeline_mode = #tpu.pipeline_mode<synchronous>, transform_indices = @transform_32, window_bounds = array<i64: 1, 128>}, {pipeline_mode = #tpu.pipeline_mode<synchronous>, transform_indices = @transform_33, window_bounds = array<i64: 128, 192>}, {pipeline_mode = #tpu.pipeline_mode<synchronous>, transform_indices = @transform_34, window_bounds = array<i64: 1, 192>}, {transform_indices = @transform_35, window_bounds = array<i64: 1, 3, 3>}, {transform_indices = @transform_36, window_bounds = array<i64: 1, 3, 1>}, {transform_indices = @transform_37, window_bounds = array<i64: 1, 1, 192>}]} {
    %c0 = arith.constant 0 : index
    %c0_0 = arith.constant 0 : index
    %c0_1 = arith.constant 0 : index
    %0 = vector.load %arg1[%c0, %c0_0, %c0_1] : memref<1x64x3xf32, #tpu.memory_space<vmem>>, vector<1x64x3xf32>
    %1 = vector.shape_cast %0 : vector<1x64x3xf32> to vector<64x3xf32>
    %c0_2 = arith.constant 0 : index
    %c0_3 = arith.constant 0 : index
    %2 = vector.load %arg2[%c0_2, %c0_3] : memref<64x3xf32, #tpu.memory_space<vmem>>, vector<64x3xf32>
    %c0_4 = arith.constant 0 : index
    %c0_5 = arith.constant 0 : index
    %3 = vector.load %arg3[%c0_4, %c0_5] : memref<3x64xf32, #tpu.memory_space<vmem>>, vector<3x64xf32>
    %c0_6 = arith.constant 0 : index
    %c0_7 = arith.constant 0 : index
    %4 = vector.load %arg4[%c0_6, %c0_7] : memref<3x64xf32, #tpu.memory_space<vmem>>, vector<3x64xf32>
    %5 = vector.extract_strided_slice %1 {offsets = [0, 0], sizes = [64, 1], strides = [1, 1]} : vector<64x3xf32> to vector<64x1xf32>
    %6 = vector.extract_strided_slice %4 {offsets = [0, 0], sizes = [1, 64], strides = [1, 1]} : vector<3x64xf32> to vector<1x64xf32>
    %7 = vector.broadcast %5 : vector<64x1xf32> to vector<64x64xf32>
    %8 = vector.broadcast %6 : vector<1x64xf32> to vector<64x64xf32>
    %9 = arith.mulf %7, %8 : vector<64x64xf32>
    %10 = vector.extract_strided_slice %1 {offsets = [0, 1], sizes = [64, 1], strides = [1, 1]} : vector<64x3xf32> to vector<64x1xf32>
    %11 = vector.extract_strided_slice %4 {offsets = [1, 0], sizes = [1, 64], strides = [1, 1]} : vector<3x64xf32> to vector<1x64xf32>
    %12 = vector.broadcast %10 : vector<64x1xf32> to vector<64x64xf32>
    %13 = vector.broadcast %11 : vector<1x64xf32> to vector<64x64xf32>
    %14 = arith.mulf %12, %13 : vector<64x64xf32>
    %15 = arith.addf %9, %14 : vector<64x64xf32>
    %16 = vector.extract_strided_slice %1 {offsets = [0, 2], sizes = [64, 1], strides = [1, 1]} : vector<64x3xf32> to vector<64x1xf32>
    %17 = vector.extract_strided_slice %4 {offsets = [2, 0], sizes = [1, 64], strides = [1, 1]} : vector<3x64xf32> to vector<1x64xf32>
    %18 = vector.broadcast %16 : vector<64x1xf32> to vector<64x64xf32>
    %19 = vector.broadcast %17 : vector<1x64xf32> to vector<64x64xf32>
    %20 = arith.mulf %18, %19 : vector<64x64xf32>
    %21 = arith.addf %15, %20 : vector<64x64xf32>
    %c0_8 = arith.constant 0 : index
    %c0_9 = arith.constant 0 : index
    %22 = vector.load %arg5[%c0_8, %c0_9] : memref<1x64xf32, #tpu.memory_space<vmem>>, vector<1x64xf32>
    %23 = vector.broadcast %22 : vector<1x64xf32> to vector<64x64xf32>
    %24 = arith.addf %21, %23 : vector<64x64xf32>
    %cst = arith.constant 0.000000e+00 : f32
    %25 = vector.broadcast %cst : f32 to vector<64x64xf32>
    %26 = arith.maximumf %24, %25 : vector<64x64xf32>
    %c0_10 = arith.constant 0 : index
    %c0_11 = arith.constant 0 : index
    %27 = vector.load %arg6[%c0_10, %c0_11] : memref<64x128xf32, #tpu.memory_space<vmem>>, vector<64x128xf32>
    %cst_12 = arith.constant dense<0.000000e+00> : vector<64x128xf32>
    %28 = tpu.matmul %26, %27, %cst_12 {dimension_numbers = #tpu.dot_dimension_numbers<[1], [0], [0], [1], [0, 0, 1, 1], [], []>} : vector<64x64xf32>, vector<64x128xf32>, vector<64x128xf32> -> vector<64x128xf32>
    %c0_13 = arith.constant 0 : index
    %c0_14 = arith.constant 0 : index
    %29 = vector.load %arg7[%c0_13, %c0_14] : memref<1x128xf32, #tpu.memory_space<vmem>>, vector<1x128xf32>
    %30 = vector.broadcast %29 : vector<1x128xf32> to vector<64x128xf32>
    %31 = arith.addf %28, %30 : vector<64x128xf32>
    %cst_15 = arith.constant 0.000000e+00 : f32
    %32 = vector.broadcast %cst_15 : f32 to vector<64x128xf32>
    %33 = arith.maximumf %31, %32 : vector<64x128xf32>
    %cst_16 = arith.constant dense<0xFF800000> : vector<128xf32>
    %34 = vector.multi_reduction <maximumf>, %33, %cst_16 [0] : vector<64x128xf32> to vector<128xf32>
    %35 = vector.shape_cast %34 : vector<128xf32> to vector<1x128xf32>
    %c0_17 = arith.constant 0 : index
    %c0_18 = arith.constant 0 : index
    %36 = vector.load %arg8[%c0_17, %c0_18] : memref<3x32xf32, #tpu.memory_space<vmem>>, vector<3x32xf32>
    %37 = vector.extract_strided_slice %1 {offsets = [0, 0], sizes = [64, 1], strides = [1, 1]} : vector<64x3xf32> to vector<64x1xf32>
    %38 = vector.extract_strided_slice %36 {offsets = [0, 0], sizes = [1, 32], strides = [1, 1]} : vector<3x32xf32> to vector<1x32xf32>
    %39 = vector.broadcast %37 : vector<64x1xf32> to vector<64x32xf32>
    %40 = vector.broadcast %38 : vector<1x32xf32> to vector<64x32xf32>
    %41 = arith.mulf %39, %40 : vector<64x32xf32>
    %42 = vector.extract_strided_slice %1 {offsets = [0, 1], sizes = [64, 1], strides = [1, 1]} : vector<64x3xf32> to vector<64x1xf32>
    %43 = vector.extract_strided_slice %36 {offsets = [1, 0], sizes = [1, 32], strides = [1, 1]} : vector<3x32xf32> to vector<1x32xf32>
    %44 = vector.broadcast %42 : vector<64x1xf32> to vector<64x32xf32>
    %45 = vector.broadcast %43 : vector<1x32xf32> to vector<64x32xf32>
    %46 = arith.mulf %44, %45 : vector<64x32xf32>
    %47 = arith.addf %41, %46 : vector<64x32xf32>
    %48 = vector.extract_strided_slice %1 {offsets = [0, 2], sizes = [64, 1], strides = [1, 1]} : vector<64x3xf32> to vector<64x1xf32>
    %49 = vector.extract_strided_slice %36 {offsets = [2, 0], sizes = [1, 32], strides = [1, 1]} : vector<3x32xf32> to vector<1x32xf32>
    %50 = vector.broadcast %48 : vector<64x1xf32> to vector<64x32xf32>
    %51 = vector.broadcast %49 : vector<1x32xf32> to vector<64x32xf32>
    %52 = arith.mulf %50, %51 : vector<64x32xf32>
    %53 = arith.addf %47, %52 : vector<64x32xf32>
    %c0_19 = arith.constant 0 : index
    %c0_20 = arith.constant 0 : index
    %54 = vector.load %arg9[%c0_19, %c0_20] : memref<1x32xf32, #tpu.memory_space<vmem>>, vector<1x32xf32>
    %55 = vector.broadcast %54 : vector<1x32xf32> to vector<64x32xf32>
    %56 = arith.addf %53, %55 : vector<64x32xf32>
    %cst_21 = arith.constant 0.000000e+00 : f32
    %57 = vector.broadcast %cst_21 : f32 to vector<64x32xf32>
    %58 = arith.maximumf %56, %57 : vector<64x32xf32>
    %c0_22 = arith.constant 0 : index
    %c0_23 = arith.constant 0 : index
    %59 = vector.load %arg10[%c0_22, %c0_23] : memref<32x32xf32, #tpu.memory_space<vmem>>, vector<32x32xf32>
    %cst_24 = arith.constant dense<0.000000e+00> : vector<64x32xf32>
    %60 = tpu.matmul %58, %59, %cst_24 {dimension_numbers = #tpu.dot_dimension_numbers<[1], [0], [0], [1], [0, 0, 1, 1], [], []>} : vector<64x32xf32>, vector<32x32xf32>, vector<64x32xf32> -> vector<64x32xf32>
    %c0_25 = arith.constant 0 : index
    %c0_26 = arith.constant 0 : index
    %61 = vector.load %arg11[%c0_25, %c0_26] : memref<1x32xf32, #tpu.memory_space<vmem>>, vector<1x32xf32>
    %62 = vector.broadcast %61 : vector<1x32xf32> to vector<64x32xf32>
    %63 = arith.addf %60, %62 : vector<64x32xf32>
    %cst_27 = arith.constant 0.000000e+00 : f32
    %64 = vector.broadcast %cst_27 : f32 to vector<64x32xf32>
    %65 = arith.maximumf %63, %64 : vector<64x32xf32>
    %c0_28 = arith.constant 0 : index
    %c0_29 = arith.constant 0 : index
    %66 = vector.load %arg12[%c0_28, %c0_29] : memref<32x64xf32, #tpu.memory_space<vmem>>, vector<32x64xf32>
    %cst_30 = arith.constant dense<0.000000e+00> : vector<64x64xf32>
    %67 = tpu.matmul %65, %66, %cst_30 {dimension_numbers = #tpu.dot_dimension_numbers<[1], [0], [0], [1], [0, 0, 1, 1], [], []>} : vector<64x32xf32>, vector<32x64xf32>, vector<64x64xf32> -> vector<64x64xf32>
    %c0_31 = arith.constant 0 : index
    %c0_32 = arith.constant 0 : index
    %68 = vector.load %arg13[%c0_31, %c0_32] : memref<1x64xf32, #tpu.memory_space<vmem>>, vector<1x64xf32>
    %69 = vector.broadcast %68 : vector<1x64xf32> to vector<64x64xf32>
    %70 = arith.addf %67, %69 : vector<64x64xf32>
    %cst_33 = arith.constant 0.000000e+00 : f32
    %71 = vector.broadcast %cst_33 : f32 to vector<64x64xf32>
    %72 = arith.maximumf %70, %71 : vector<64x64xf32>
    %c0_34 = arith.constant 0 : index
    %c0_35 = arith.constant 0 : index
    %73 = vector.load %arg14[%c0_34, %c0_35] : memref<64x64xf32, #tpu.memory_space<vmem>>, vector<64x64xf32>
    %cst_36 = arith.constant dense<0.000000e+00> : vector<64x64xf32>
    %74 = tpu.matmul %72, %73, %cst_36 {dimension_numbers = #tpu.dot_dimension_numbers<[1], [0], [0], [1], [0, 0, 1, 1], [], []>} : vector<64x64xf32>, vector<64x64xf32>, vector<64x64xf32> -> vector<64x64xf32>
    %c0_37 = arith.constant 0 : index
    %c0_38 = arith.constant 0 : index
    %75 = vector.load %arg15[%c0_37, %c0_38] : memref<1x64xf32, #tpu.memory_space<vmem>>, vector<1x64xf32>
    %76 = vector.broadcast %75 : vector<1x64xf32> to vector<64x64xf32>
    %77 = arith.addf %74, %76 : vector<64x64xf32>
    %cst_39 = arith.constant 0.000000e+00 : f32
    %78 = vector.broadcast %cst_39 : f32 to vector<64x64xf32>
    %79 = arith.maximumf %77, %78 : vector<64x64xf32>
    %c0_40 = arith.constant 0 : index
    %c0_41 = arith.constant 0 : index
    %80 = vector.load %arg16[%c0_40, %c0_41] : memref<64x128xf32, #tpu.memory_space<vmem>>, vector<64x128xf32>
    %cst_42 = arith.constant dense<0.000000e+00> : vector<64x128xf32>
    %81 = tpu.matmul %79, %80, %cst_42 {dimension_numbers = #tpu.dot_dimension_numbers<[1], [0], [0], [1], [0, 0, 1, 1], [], []>} : vector<64x64xf32>, vector<64x128xf32>, vector<64x128xf32> -> vector<64x128xf32>
    %c0_43 = arith.constant 0 : index
    %c0_44 = arith.constant 0 : index
    %82 = vector.load %arg17[%c0_43, %c0_44] : memref<1x128xf32, #tpu.memory_space<vmem>>, vector<1x128xf32>
    %83 = vector.broadcast %82 : vector<1x128xf32> to vector<64x128xf32>
    %84 = arith.addf %81, %83 : vector<64x128xf32>
    %cst_45 = arith.constant 0.000000e+00 : f32
    %85 = vector.broadcast %cst_45 : f32 to vector<64x128xf32>
    %86 = arith.maximumf %84, %85 : vector<64x128xf32>
    %c0_46 = arith.constant 0 : index
    %c0_47 = arith.constant 0 : index
    %87 = vector.load %arg18[%c0_46, %c0_47] : memref<128x256xf32, #tpu.memory_space<vmem>>, vector<128x256xf32>
    %cst_48 = arith.constant dense<0.000000e+00> : vector<64x256xf32>
    %88 = tpu.matmul %86, %87, %cst_48 {dimension_numbers = #tpu.dot_dimension_numbers<[1], [0], [0], [1], [0, 0, 1, 1], [], []>} : vector<64x128xf32>, vector<128x256xf32>, vector<64x256xf32> -> vector<64x256xf32>
    %c0_49 = arith.constant 0 : index
    %c0_50 = arith.constant 0 : index
    %89 = vector.load %arg19[%c0_49, %c0_50] : memref<1x256xf32, #tpu.memory_space<vmem>>, vector<1x256xf32>
    %90 = vector.broadcast %89 : vector<1x256xf32> to vector<64x256xf32>
    %91 = arith.addf %88, %90 : vector<64x256xf32>
    %cst_51 = arith.constant 0.000000e+00 : f32
    %92 = vector.broadcast %cst_51 : f32 to vector<64x256xf32>
    %93 = arith.maximumf %91, %92 : vector<64x256xf32>
    %c0_52 = arith.constant 0 : index
    %c0_53 = arith.constant 0 : index
    %94 = vector.load %arg20[%c0_52, %c0_53] : memref<256x128xf32, #tpu.memory_space<vmem>>, vector<256x128xf32>
    %cst_54 = arith.constant dense<0.000000e+00> : vector<64x128xf32>
    %95 = tpu.matmul %93, %94, %cst_54 {dimension_numbers = #tpu.dot_dimension_numbers<[1], [0], [0], [1], [0, 0, 1, 1], [], []>} : vector<64x256xf32>, vector<256x128xf32>, vector<64x128xf32> -> vector<64x128xf32>
    %c0_55 = arith.constant 0 : index
    %c0_56 = arith.constant 0 : index
    %96 = vector.load %arg21[%c0_55, %c0_56] : memref<1x128xf32, #tpu.memory_space<vmem>>, vector<1x128xf32>
    %97 = vector.broadcast %96 : vector<1x128xf32> to vector<64x128xf32>
    %98 = arith.addf %95, %97 : vector<64x128xf32>
    %cst_57 = arith.constant 0.000000e+00 : f32
    %99 = vector.broadcast %cst_57 : f32 to vector<64x128xf32>
    %100 = arith.maximumf %98, %99 : vector<64x128xf32>
    %cst_58 = arith.constant dense<0xFF800000> : vector<128xf32>
    %101 = vector.multi_reduction <maximumf>, %100, %cst_58 [0] : vector<64x128xf32> to vector<128xf32>
    %102 = vector.shape_cast %101 : vector<128xf32> to vector<1x128xf32>
    %cst_59 = arith.constant dense<0.000000e+00> : vector<64x64xf32>
    %103 = tpu.matmul %2, %1, %cst_59 {dimension_numbers = #tpu.dot_dimension_numbers<[1], [1], [0], [0], [0, 0, 1, 0], [], []>} : vector<64x3xf32>, vector<64x3xf32>, vector<64x64xf32> -> vector<64x64xf32>
    %cst_60 = arith.constant 0.000000e+00 : f32
    %104 = vector.broadcast %cst_60 : f32 to vector<64x64xf32>
    %105 = arith.maximumf %103, %104 : vector<64x64xf32>
    %cst_61 = arith.constant dense<0.000000e+00> : vector<64x256xf32>
    %106 = tpu.matmul %105, %93, %cst_61 {dimension_numbers = #tpu.dot_dimension_numbers<[1], [0], [0], [1], [0, 0, 1, 1], [], []>} : vector<64x64xf32>, vector<64x256xf32>, vector<64x256xf32> -> vector<64x256xf32>
    %cst_62 = arith.constant 1.562500e-02 : f32
    %107 = vector.broadcast %cst_62 : f32 to vector<64x256xf32>
    %108 = arith.mulf %106, %107 : vector<64x256xf32>
    %c0_63 = arith.constant 0 : index
    %c0_64 = arith.constant 0 : index
    %109 = vector.load %arg22[%c0_63, %c0_64] : memref<256x64xf32, #tpu.memory_space<vmem>>, vector<256x64xf32>
    %cst_65 = arith.constant dense<0.000000e+00> : vector<64x64xf32>
    %110 = tpu.matmul %108, %109, %cst_65 {dimension_numbers = #tpu.dot_dimension_numbers<[1], [0], [0], [1], [0, 0, 1, 1], [], []>} : vector<64x256xf32>, vector<256x64xf32>, vector<64x64xf32> -> vector<64x64xf32>
    %c0_66 = arith.constant 0 : index
    %c0_67 = arith.constant 0 : index
    %111 = vector.load %arg23[%c0_66, %c0_67] : memref<1x64xf32, #tpu.memory_space<vmem>>, vector<1x64xf32>
    %112 = vector.broadcast %111 : vector<1x64xf32> to vector<64x64xf32>
    %113 = arith.addf %110, %112 : vector<64x64xf32>
    %cst_68 = arith.constant 0.000000e+00 : f32
    %114 = vector.broadcast %cst_68 : f32 to vector<64x64xf32>
    %115 = arith.maximumf %113, %114 : vector<64x64xf32>
    %c0_69 = arith.constant 0 : index
    %c0_70 = arith.constant 0 : index
    %116 = vector.load %arg24[%c0_69, %c0_70] : memref<64x3xf32, #tpu.memory_space<vmem>>, vector<64x3xf32>
    %cst_71 = arith.constant dense<0.000000e+00> : vector<64x3xf32>
    %117 = tpu.matmul %115, %116, %cst_71 {dimension_numbers = #tpu.dot_dimension_numbers<[1], [0], [0], [1], [0, 0, 1, 1], [], []>} : vector<64x64xf32>, vector<64x3xf32>, vector<64x3xf32> -> vector<64x3xf32>
    %c0_72 = arith.constant 0 : index
    %c0_73 = arith.constant 0 : index
    %118 = vector.load %arg25[%c0_72, %c0_73] : memref<1x3xf32, #tpu.memory_space<vmem>>, vector<1x3xf32>
    %119 = vector.broadcast %118 : vector<1x3xf32> to vector<64x3xf32>
    %120 = arith.addf %117, %119 : vector<64x3xf32>
    %cst_74 = arith.constant dense<0.000000e+00> : vector<3x3xf32>
    %121 = tpu.matmul %3, %120, %cst_74 {dimension_numbers = #tpu.dot_dimension_numbers<[1], [0], [0], [1], [0, 0, 1, 1], [], []>} : vector<3x64xf32>, vector<64x3xf32>, vector<3x3xf32> -> vector<3x3xf32>
    %cst_75 = arith.constant 1.562500e-02 : f32
    %122 = vector.broadcast %cst_75 : f32 to vector<3x3xf32>
    %123 = arith.mulf %121, %122 : vector<3x3xf32>
    %124 = arith.mulf %123, %123 : vector<3x3xf32>
    %cst_76 = arith.constant dense<0.000000e+00> : vector<3xf32>
    %125 = vector.multi_reduction <add>, %124, %cst_76 [1] : vector<3x3xf32> to vector<3xf32>
    %126 = vector.shape_cast %125 : vector<3xf32> to vector<3x1xf32>
    %127 = math.sqrt %126 : vector<3x1xf32>
    %cst_77 = arith.constant 9.99999997E-7 : f32
    %128 = vector.broadcast %cst_77 : f32 to vector<3x1xf32>
    %129 = arith.maximumf %127, %128 : vector<3x1xf32>
    %130 = vector.broadcast %129 : vector<3x1xf32> to vector<3x3xf32>
    %131 = arith.divf %123, %130 : vector<3x3xf32>
    %c0_78 = arith.constant 0 : index
    %c0_79 = arith.constant 0 : index
    %c0_80 = arith.constant 0 : index
    %132 = vector.load %arg36[%c0_78, %c0_79, %c0_80] : memref<1x3x3xf32, #tpu.memory_space<vmem>>, vector<1x3x3xf32>
    %133 = vector.shape_cast %132 : vector<1x3x3xf32> to vector<3x3xf32>
    %134 = vector.shape_cast %131 : vector<3x3xf32> to vector<1x3x3xf32>
    tpu.vector_store %arg36[%c0_78, %c0_79, %c0_80], %134 {strides = array<i32>} : memref<1x3x3xf32, #tpu.memory_space<vmem>>, vector<1x3x3xf32>,
    %c0_81 = arith.constant 0 : index
    %c0_82 = arith.constant 0 : index
    %135 = vector.load %arg26[%c0_81, %c0_82] : memref<256x64xf32, #tpu.memory_space<vmem>>, vector<256x64xf32>
    %cst_83 = arith.constant dense<0.000000e+00> : vector<64x64xf32>
    %136 = tpu.matmul %108, %135, %cst_83 {dimension_numbers = #tpu.dot_dimension_numbers<[1], [0], [0], [1], [0, 0, 1, 1], [], []>} : vector<64x256xf32>, vector<256x64xf32>, vector<64x64xf32> -> vector<64x64xf32>
    %c0_84 = arith.constant 0 : index
    %c0_85 = arith.constant 0 : index
    %137 = vector.load %arg27[%c0_84, %c0_85] : memref<1x64xf32, #tpu.memory_space<vmem>>, vector<1x64xf32>
    %138 = vector.broadcast %137 : vector<1x64xf32> to vector<64x64xf32>
    %139 = arith.addf %136, %138 : vector<64x64xf32>
    %cst_86 = arith.constant 0.000000e+00 : f32
    %140 = vector.broadcast %cst_86 : f32 to vector<64x64xf32>
    %141 = arith.maximumf %139, %140 : vector<64x64xf32>
    %cst_87 = arith.constant dense<0.000000e+00> : vector<3x64xf32>
    %142 = tpu.matmul %3, %141, %cst_87 {dimension_numbers = #tpu.dot_dimension_numbers<[1], [0], [0], [1], [0, 0, 1, 1], [], []>} : vector<3x64xf32>, vector<64x64xf32>, vector<3x64xf32> -> vector<3x64xf32>
    %cst_88 = arith.constant 1.562500e-02 : f32
    %143 = vector.broadcast %cst_88 : f32 to vector<3x64xf32>
    %144 = arith.mulf %142, %143 : vector<3x64xf32>
    %c0_89 = arith.constant 0 : index
    %c0_90 = arith.constant 0 : index
    %145 = vector.load %arg28[%c0_89, %c0_90] : memref<64x1xf32, #tpu.memory_space<vmem>>, vector<64x1xf32>
    %cst_91 = arith.constant dense<0.000000e+00> : vector<3x1xf32>
    %146 = tpu.matmul %144, %145, %cst_91 {dimension_numbers = #tpu.dot_dimension_numbers<[1], [0], [0], [1], [0, 0, 1, 1], [], []>} : vector<3x64xf32>, vector<64x1xf32>, vector<3x1xf32> -> vector<3x1xf32>
    %c0_92 = arith.constant 0 : index
    %c0_93 = arith.constant 0 : index
    %147 = vector.load %arg29[%c0_92, %c0_93] : memref<1x1xf32, #tpu.memory_space<vmem>>, vector<1x1xf32>
    %148 = vector.broadcast %147 : vector<1x1xf32> to vector<3x1xf32>
    %149 = arith.addf %146, %148 : vector<3x1xf32>
    %c0_94 = arith.constant 0 : index
    %c0_95 = arith.constant 0 : index
    %c0_96 = arith.constant 0 : index
    %150 = vector.load %arg37[%c0_94, %c0_95, %c0_96] : memref<1x3x1xf32, #tpu.memory_space<vmem>>, vector<1x3x1xf32>
    %151 = vector.shape_cast %150 : vector<1x3x1xf32> to vector<3x1xf32>
    %152 = vector.shape_cast %149 : vector<3x1xf32> to vector<1x3x1xf32>
    tpu.vector_store %arg37[%c0_94, %c0_95, %c0_96], %152 {strides = array<i32>} : memref<1x3x1xf32, #tpu.memory_space<vmem>>, vector<1x3x1xf32>,
    %153 = tpu.concatenate %35, %102 in 1 : vector<1x128xf32>, vector<1x128xf32> -> vector<1x256xf32>
    %c0_97 = arith.constant 0 : index
    %c0_98 = arith.constant 0 : index
    %154 = vector.load %arg30[%c0_97, %c0_98] : memref<256x128xf32, #tpu.memory_space<vmem>>, vector<256x128xf32>
    %cst_99 = arith.constant dense<0.000000e+00> : vector<1x128xf32>
    %155 = tpu.matmul %153, %154, %cst_99 {dimension_numbers = #tpu.dot_dimension_numbers<[1], [0], [0], [1], [0, 0, 1, 1], [], []>} : vector<1x256xf32>, vector<256x128xf32>, vector<1x128xf32> -> vector<1x128xf32>
    %c0_100 = arith.constant 0 : index
    %c0_101 = arith.constant 0 : index
    %156 = vector.load %arg31[%c0_100, %c0_101] : memref<1x128xf32, #tpu.memory_space<vmem>>, vector<1x128xf32>
    %157 = arith.addf %155, %156 : vector<1x128xf32>
    %cst_102 = arith.constant 0.000000e+00 : f32
    %158 = vector.broadcast %cst_102 : f32 to vector<1x128xf32>
    %159 = arith.maximumf %157, %158 : vector<1x128xf32>
    %c0_103 = arith.constant 0 : index
    %c0_104 = arith.constant 0 : index
    %160 = vector.load %arg32[%c0_103, %c0_104] : memref<128x128xf32, #tpu.memory_space<vmem>>, vector<128x128xf32>
    %cst_105 = arith.constant dense<0.000000e+00> : vector<1x128xf32>
    %161 = tpu.matmul %159, %160, %cst_105 {dimension_numbers = #tpu.dot_dimension_numbers<[1], [0], [0], [1], [0, 0, 1, 1], [], []>} : vector<1x128xf32>, vector<128x128xf32>, vector<1x128xf32> -> vector<1x128xf32>
    %c0_106 = arith.constant 0 : index
    %c0_107 = arith.constant 0 : index
    %162 = vector.load %arg33[%c0_106, %c0_107] : memref<1x128xf32, #tpu.memory_space<vmem>>, vector<1x128xf32>
    %163 = arith.addf %161, %162 : vector<1x128xf32>
    %c0_108 = arith.constant 0 : index
    %c0_109 = arith.constant 0 : index
    %164 = vector.load %arg34[%c0_108, %c0_109] : memref<128x192xf32, #tpu.memory_space<vmem>>, vector<128x192xf32>
    %cst_110 = arith.constant dense<0.000000e+00> : vector<1x192xf32>
    %165 = tpu.matmul %163, %164, %cst_110 {dimension_numbers = #tpu.dot_dimension_numbers<[1], [0], [0], [1], [0, 0, 1, 1], [], []>} : vector<1x128xf32>, vector<128x192xf32>, vector<1x192xf32> -> vector<1x192xf32>
    %c0_111 = arith.constant 0 : index
    %c0_112 = arith.constant 0 : index
    %166 = vector.load %arg35[%c0_111, %c0_112] : memref<1x192xf32, #tpu.memory_space<vmem>>, vector<1x192xf32>
    %167 = arith.addf %165, %166 : vector<1x192xf32>
    %168 = math.tanh %167 : vector<1x192xf32>
    %c0_113 = arith.constant 0 : index
    %c0_114 = arith.constant 0 : index
    %c0_115 = arith.constant 0 : index
    %169 = vector.load %arg38[%c0_113, %c0_114, %c0_115] : memref<1x1x192xf32, #tpu.memory_space<vmem>>, vector<1x1x192xf32>
    %170 = vector.shape_cast %169 : vector<1x1x192xf32> to vector<1x192xf32>
    %171 = vector.shape_cast %168 : vector<1x192xf32> to vector<1x1x192xf32>
    tpu.vector_store %arg38[%c0_113, %c0_114, %c0_115], %171 {strides = array<i32>} : memref<1x1x192xf32, #tpu.memory_space<vmem>>, vector<1x1x192xf32>,
    return
  }
  func.func @transform_0(%arg0: i32) -> (i32, i32, i32) {
    %c0_i32 = arith.constant 0 : i32
    %c0_i32_0 = arith.constant 0 : i32
    %c0_i32_1 = arith.constant 0 : i32
    return %arg0, %c0_i32, %c0_i32_0 : i32, i32, i32
  }
  func.func @transform_1(%arg0: i32) -> (i32, i32) {
    %c0_i32 = arith.constant 0 : i32
    %c0_i32_0 = arith.constant 0 : i32
    %c0_i32_1 = arith.constant 0 : i32
    return %c0_i32, %c0_i32_0 : i32, i32
  }
  func.func @transform_2(%arg0: i32) -> (i32, i32) {
    %c0_i32 = arith.constant 0 : i32
    %c0_i32_0 = arith.constant 0 : i32
    %c0_i32_1 = arith.constant 0 : i32
    return %c0_i32, %c0_i32_0 : i32, i32
  }
  func.func @transform_3(%arg0: i32) -> (i32, i32) {
    %c0_i32 = arith.constant 0 : i32
    %c0_i32_0 = arith.constant 0 : i32
    %c0_i32_1 = arith.constant 0 : i32
    return %c0_i32, %c0_i32_0 : i32, i32
  }
  func.func @transform_4(%arg0: i32) -> (i32, i32) {
    %c0_i32 = arith.constant 0 : i32
    %c0_i32_0 = arith.constant 0 : i32
    %c0_i32_1 = arith.constant 0 : i32
    return %c0_i32, %c0_i32_0 : i32, i32
  }
  func.func @transform_5(%arg0: i32) -> (i32, i32) {
    %c0_i32 = arith.constant 0 : i32
    %c0_i32_0 = arith.constant 0 : i32
    %c0_i32_1 = arith.constant 0 : i32
    return %c0_i32, %c0_i32_0 : i32, i32
  }
  func.func @transform_6(%arg0: i32) -> (i32, i32) {
    %c0_i32 = arith.constant 0 : i32
    %c0_i32_0 = arith.constant 0 : i32
    %c0_i32_1 = arith.constant 0 : i32
    return %c0_i32, %c0_i32_0 : i32, i32
  }
  func.func @transform_7(%arg0: i32) -> (i32, i32) {
    %c0_i32 = arith.constant 0 : i32
    %c0_i32_0 = arith.constant 0 : i32
    %c0_i32_1 = arith.constant 0 : i32
    return %c0_i32, %c0_i32_0 : i32, i32
  }
  func.func @transform_8(%arg0: i32) -> (i32, i32) {
    %c0_i32 = arith.constant 0 : i32
    %c0_i32_0 = arith.constant 0 : i32
    %c0_i32_1 = arith.constant 0 : i32
    return %c0_i32, %c0_i32_0 : i32, i32
  }
  func.func @transform_9(%arg0: i32) -> (i32, i32) {
    %c0_i32 = arith.constant 0 : i32
    %c0_i32_0 = arith.constant 0 : i32
    %c0_i32_1 = arith.constant 0 : i32
    return %c0_i32, %c0_i32_0 : i32, i32
  }
  func.func @transform_10(%arg0: i32) -> (i32, i32) {
    %c0_i32 = arith.constant 0 : i32
    %c0_i32_0 = arith.constant 0 : i32
    %c0_i32_1 = arith.constant 0 : i32
    return %c0_i32, %c0_i32_0 : i32, i32
  }
  func.func @transform_11(%arg0: i32) -> (i32, i32) {
    %c0_i32 = arith.constant 0 : i32
    %c0_i32_0 = arith.constant 0 : i32
    %c0_i32_1 = arith.constant 0 : i32
    return %c0_i32, %c0_i32_0 : i32, i32
  }
  func.func @transform_12(%arg0: i32) -> (i32, i32) {
    %c0_i32 = arith.constant 0 : i32
    %c0_i32_0 = arith.constant 0 : i32
    %c0_i32_1 = arith.constant 0 : i32
    return %c0_i32, %c0_i32_0 : i32, i32
  }
  func.func @transform_13(%arg0: i32) -> (i32, i32) {
    %c0_i32 = arith.constant 0 : i32
    %c0_i32_0 = arith.constant 0 : i32
    %c0_i32_1 = arith.constant 0 : i32
    return %c0_i32, %c0_i32_0 : i32, i32
  }
  func.func @transform_14(%arg0: i32) -> (i32, i32) {
    %c0_i32 = arith.constant 0 : i32
    %c0_i32_0 = arith.constant 0 : i32
    %c0_i32_1 = arith.constant 0 : i32
    return %c0_i32, %c0_i32_0 : i32, i32
  }
  func.func @transform_15(%arg0: i32) -> (i32, i32) {
    %c0_i32 = arith.constant 0 : i32
    %c0_i32_0 = arith.constant 0 : i32
    %c0_i32_1 = arith.constant 0 : i32
    return %c0_i32, %c0_i32_0 : i32, i32
  }
  func.func @transform_16(%arg0: i32) -> (i32, i32) {
    %c0_i32 = arith.constant 0 : i32
    %c0_i32_0 = arith.constant 0 : i32
    %c0_i32_1 = arith.constant 0 : i32
    return %c0_i32, %c0_i32_0 : i32, i32
  }
  func.func @transform_17(%arg0: i32) -> (i32, i32) {
    %c0_i32 = arith.constant 0 : i32
    %c0_i32_0 = arith.constant 0 : i32
    %c0_i32_1 = arith.constant 0 : i32
    return %c0_i32, %c0_i32_0 : i32, i32
  }
  func.func @transform_18(%arg0: i32) -> (i32, i32) {
    %c0_i32 = arith.constant 0 : i32
    %c0_i32_0 = arith.constant 0 : i32
    %c0_i32_1 = arith.constant 0 : i32
    return %c0_i32, %c0_i32_0 : i32, i32
  }
  func.func @transform_19(%arg0: i32) -> (i32, i32) {
    %c0_i32 = arith.constant 0 : i32
    %c0_i32_0 = arith.constant 0 : i32
    %c0_i32_1 = arith.constant 0 : i32
    return %c0_i32, %c0_i32_0 : i32, i32
  }
  func.func @transform_20(%arg0: i32) -> (i32, i32) {
    %c0_i32 = arith.constant 0 : i32
    %c0_i32_0 = arith.constant 0 : i32
    %c0_i32_1 = arith.constant 0 : i32
    return %c0_i32, %c0_i32_0 : i32, i32
  }
  func.func @transform_21(%arg0: i32) -> (i32, i32) {
    %c0_i32 = arith.constant 0 : i32
    %c0_i32_0 = arith.constant 0 : i32
    %c0_i32_1 = arith.constant 0 : i32
    return %c0_i32, %c0_i32_0 : i32, i32
  }
  func.func @transform_22(%arg0: i32) -> (i32, i32) {
    %c0_i32 = arith.constant 0 : i32
    %c0_i32_0 = arith.constant 0 : i32
    %c0_i32_1 = arith.constant 0 : i32
    return %c0_i32, %c0_i32_0 : i32, i32
  }
  func.func @transform_23(%arg0: i32) -> (i32, i32) {
    %c0_i32 = arith.constant 0 : i32
    %c0_i32_0 = arith.constant 0 : i32
    %c0_i32_1 = arith.constant 0 : i32
    return %c0_i32, %c0_i32_0 : i32, i32
  }
  func.func @transform_24(%arg0: i32) -> (i32, i32) {
    %c0_i32 = arith.constant 0 : i32
    %c0_i32_0 = arith.constant 0 : i32
    %c0_i32_1 = arith.constant 0 : i32
    return %c0_i32, %c0_i32_0 : i32, i32
  }
  func.func @transform_25(%arg0: i32) -> (i32, i32) {
    %c0_i32 = arith.constant 0 : i32
    %c0_i32_0 = arith.constant 0 : i32
    %c0_i32_1 = arith.constant 0 : i32
    return %c0_i32, %c0_i32_0 : i32, i32
  }
  func.func @transform_26(%arg0: i32) -> (i32, i32) {
    %c0_i32 = arith.constant 0 : i32
    %c0_i32_0 = arith.constant 0 : i32
    %c0_i32_1 = arith.constant 0 : i32
    return %c0_i32, %c0_i32_0 : i32, i32
  }
  func.func @transform_27(%arg0: i32) -> (i32, i32) {
    %c0_i32 = arith.constant 0 : i32
    %c0_i32_0 = arith.constant 0 : i32
    %c0_i32_1 = arith.constant 0 : i32
    return %c0_i32, %c0_i32_0 : i32, i32
  }
  func.func @transform_28(%arg0: i32) -> (i32, i32) {
    %c0_i32 = arith.constant 0 : i32
    %c0_i32_0 = arith.constant 0 : i32
    %c0_i32_1 = arith.constant 0 : i32
    return %c0_i32, %c0_i32_0 : i32, i32
  }
  func.func @transform_29(%arg0: i32) -> (i32, i32) {
    %c0_i32 = arith.constant 0 : i32
    %c0_i32_0 = arith.constant 0 : i32
    %c0_i32_1 = arith.constant 0 : i32
    return %c0_i32, %c0_i32_0 : i32, i32
  }
  func.func @transform_30(%arg0: i32) -> (i32, i32) {
    %c0_i32 = arith.constant 0 : i32
    %c0_i32_0 = arith.constant 0 : i32
    %c0_i32_1 = arith.constant 0 : i32
    return %c0_i32, %c0_i32_0 : i32, i32
  }
  func.func @transform_31(%arg0: i32) -> (i32, i32) {
    %c0_i32 = arith.constant 0 : i32
    %c0_i32_0 = arith.constant 0 : i32
    %c0_i32_1 = arith.constant 0 : i32
    return %c0_i32, %c0_i32_0 : i32, i32
  }
  func.func @transform_32(%arg0: i32) -> (i32, i32) {
    %c0_i32 = arith.constant 0 : i32
    %c0_i32_0 = arith.constant 0 : i32
    %c0_i32_1 = arith.constant 0 : i32
    return %c0_i32, %c0_i32_0 : i32, i32
  }
  func.func @transform_33(%arg0: i32) -> (i32, i32) {
    %c0_i32 = arith.constant 0 : i32
    %c0_i32_0 = arith.constant 0 : i32
    %c0_i32_1 = arith.constant 0 : i32
    return %c0_i32, %c0_i32_0 : i32, i32
  }
  func.func @transform_34(%arg0: i32) -> (i32, i32) {
    %c0_i32 = arith.constant 0 : i32
    %c0_i32_0 = arith.constant 0 : i32
    %c0_i32_1 = arith.constant 0 : i32
    return %c0_i32, %c0_i32_0 : i32, i32
  }
  func.func @transform_35(%arg0: i32) -> (i32, i32, i32) {
    %c0_i32 = arith.constant 0 : i32
    %c0_i32_0 = arith.constant 0 : i32
    %c0_i32_1 = arith.constant 0 : i32
    return %arg0, %c0_i32, %c0_i32_0 : i32, i32, i32
  }
  func.func @transform_36(%arg0: i32) -> (i32, i32, i32) {
    %c0_i32 = arith.constant 0 : i32
    %c0_i32_0 = arith.constant 0 : i32
    %c0_i32_1 = arith.constant 0 : i32
    return %arg0, %c0_i32, %c0_i32_0 : i32, i32, i32
  }
  func.func @transform_37(%arg0: i32) -> (i32, i32, i32) {
    %c0_i32 = arith.constant 0 : i32
    %c0_i32_0 = arith.constant 0 : i32
    %c0_i32_1 = arith.constant 0 : i32
    return %arg0, %c0_i32, %c0_i32_0 : i32, i32, i32
  }
}

</mosaic_0001>

<bundles_post_ra>
// kernel: scarp_forward.1
= control target key start
LH: loop header
LB: loop body
LE: loop exit
PB: predicated region body
PF: predicated region fallthrough
CT: control target
= control target key end

     0   :  { %s5765_s6 = smov 1   ;;  %s5766_s10 = smov 2   ;;  %s6873_s0 = inlined_call_operand.smem [shape: u32[38], index: -1, kind: input, shape index: {}] }
   0x1   :  { %s5831_s5 = sld [smem:[%s6873_s0]]   ;;  %s5767_s14 = smov 3  }
   0x2   :  { %s5836_s9 = sld [smem:[%s6873_s0 + %s5765_s6]]   ;;  %s5768_s18 = smov 4  }
   0x3   :  { %s5841_s13 = sld [smem:[%s6873_s0 + %s5766_s10]]   ;;  %s5769_s22 = smov 5  }
   0x4   :  { %s5846_s17 = sld [smem:[%s6873_s0 + %s5767_s14]]   ;;  %s5770_s26 = smov 6  }
   0x5   :  { %s5851_s21 = sld [smem:[%s6873_s0 + %s5768_s18]]   ;;  %s5771_s30 = smov 7  }
   0x6   :  { %s5856_s25 = sld [smem:[%s6873_s0 + %s5769_s22]]   ;;  %s5772_s4 = smov 8  }
   0x7   :  { %6897 = sst [smem:[#allocation34_spill]] %s5831_s5  ;;  %s5773_s10 = smov 9  }
   0x8   :  { %6898 = sst [smem:[#allocation35_spill]] %s5836_s9  ;;  %s5774_s15 = smov 10  }
   0x9   :  { %6899 = sst [smem:[#allocation36_spill]] %s5841_s13  ;;  %s5775_s20 = smov 11  }
   0xa   :  { %s5861_s29 = sld [smem:[%s6873_s0 + %s5770_s26]]   ;;  %s5776_s26 = smov 12  }
   0xb   :  { %s5866_s3 = sld [smem:[%s6873_s0 + %s5771_s30]]   ;;  %s5777_s1 = smov 13  }
   0xc   :  { %6900 = sst [smem:[#allocation37_spill]] %s5856_s25  ;;  %s5778_s7 = smov 14  }
   0xd   :  { %s5871_s8 = sld [smem:[%s6873_s0 + %s5772_s4]]   ;;  %s5780_s22 = smov 16  }
   0xe   :  { %s5876_s14 = sld [smem:[%s6873_s0 + %s5773_s10]]   ;;  %s5781_s28 = smov 17  }
   0xf   :  { %s5881_s19 = sld [smem:[%s6873_s0 + %s5774_s15]]   ;;  %s5779_s15 = smov 15  }
  0x10   :  { %s5886_s24 = sld [smem:[%s6873_s0 + %s5775_s20]]   ;;  %s5794_s10 = smov 30  }
  0x11   :  { %6901 = sst [smem:[#allocation38_spill]] %s5866_s3  ;;  %s5795_s16 = smov 31  }
  0x12   :  { %s5891_s30 = sld [smem:[%s6873_s0 + %s5776_s26]]   ;;  %s5796_s23 = smov 32  }
  0x13   :  { %s5896_s6 = sld [smem:[%s6873_s0 + %s5777_s1]]   ;;  %s5793_s1 = smov 29  }
  0x14   :  { %6902 = sst [smem:[#allocation39_spill]] %s5876_s14 }
  0x15   :  { %s5901_s12 = sld [smem:[%s6873_s0 + %s5778_s7]]   ;;  %s5782_s7 = smov 18  }
  0x16   :  { %6903 = sst [smem:[#allocation40_spill]] %s5886_s24 }
  0x17   :  { %s5906_s20 = sld [smem:[%s6873_s0 + %s5779_s15]]   ;;  %s5783_s15 = smov 19  }
  0x18   :  { %s5911_s27 = sld [smem:[%s6873_s0 + %s5780_s22]]   ;;  %s5784_s22 = smov 20  }
  0x19   :  { %6904 = sst [smem:[#allocation41_spill]] %s5896_s6 }
  0x1a   :  { %s5916_s4 = sld [smem:[%s6873_s0 + %s5781_s28]]   ;;  %s5785_s28 = smov 21  }
  0x1b   :  { %s5921_s13 = sld [smem:[%s6873_s0 + %s5782_s7]]   ;;  %s5786_s7 = smov 22  }
  0x1c   :  { %s5926_s9 = sld [smem:[%s6873_s0 + %s5783_s15]]   ;;  %s5787_s15 = smov 23  }
  0x1d   :  { %6905 = sst [smem:[#allocation42_spill]] %s5906_s20 }
  0x1e   :  { %s5931_s20 = sld [smem:[%s6873_s0 + %s5784_s22]]   ;;  %s5788_s22 = smov 24  }
  0x1f   :  { %s5951_s6 = sld [smem:[%s6873_s0 + %s5788_s22]]   ;;  %s5792_s22 = smov 28  }
  0x20   :  { %6906 = sst [smem:[#allocation43_spill]] %s5916_s4 }
  0x21   :  { %6907 = sst [smem:[#allocation44_spill]] %s5921_s13 }
  0x22   :  { %6908 = sst [smem:[#allocation45_spill]] %s5926_s9 }
  0x23   :  { %s5936_s4 = sld [smem:[%s6873_s0 + %s5785_s28]]   ;;  %s5789_s28 = smov 25  }
  0x24   :  { %s5941_s13 = sld [smem:[%s6873_s0 + %s5786_s7]]   ;;  %s5790_s7 = smov 26  }
  0x25   :  { %s5946_s9 = sld [smem:[%s6873_s0 + %s5787_s15]]   ;;  %s5791_s15 = smov 27  }
  0x26   :  { %s5961_s24 = sld [smem:[%s6873_s0 + %s5790_s7]]  }
  0x27   :  { %s4338_s14 = sld [smem:[%s6873_s0 + %s5792_s22]]  }
  0x28   :  { %s5989_s25 = sld [smem:[%s6873_s0 + %s5796_s23]]   ;;  %s5800_s23 = smov 36  }
  0x29   :  { %6909 = sst [smem:[#allocation46_spill]] %s5936_s4 }
  0x2a   :  { %s5956_s4 = sld [smem:[%s6873_s0 + %s5789_s28]]   ;;  %s5801_s28 = smov 37  }
  0x2b   :  { %6910 = sst [smem:[#allocation47_spill]] %s5946_s9 }
  0x2c   :  { %6912 = sst [smem:[#allocation49_spill]] %s5961_s24 }
  0x2d   :  { %s5966_s9 = sld [smem:[%s6873_s0 + %s5791_s15]]   ;;  %v81_v0 = vstv %s4338_s14 }
  0x2e   :  { %s5979_s24 = sld [smem:[%s6873_s0 + %s5794_s10]]   ;;  %s5798_s10 = smov 34   ;;  %82 = vst [vmem:[#allocation2] sm:$0x1] %v81_v0 }
  0x2f   :  { %s5999_s5 = sld [smem:[%s6873_s0 + %s5798_s10]]  }
  0x30   :  { %6911 = sst [smem:[#allocation48_spill]] %s5956_s4 }
  0x31   :  { %s5974_s4 = sld [smem:[%s6873_s0 + %s5793_s1]]   ;;  %s5797_s1 = smov 33  }
  0x32   :  { %s6014_s10 = sld [smem:[%s6873_s0 + %s5801_s28]]  }
  0x33   :  { %6913 = sst [smem:[#allocation50_spill]] %s5966_s9 }
  0x34   :  { %s5984_s9 = sld [smem:[%s6873_s0 + %s5795_s16]]   ;;  %s5799_s16 = smov 35  }
  0x35   :  { %s6004_s22 = sld [smem:[%s6873_s0 + %s5799_s16]]  }
  0x37   :  { %6914 = sst [smem:[#allocation51_spill]] %s5974_s4 }
  0x38   :  { %s5994_s4 = sld [smem:[%s6873_s0 + %s5797_s1]]  }
  0x39   :  { %s6009_s1 = sld [smem:[%s6873_s0 + %s5800_s23]]  }
  0x3a   :  { %6915 = sst [smem:[#allocation52_spill]] %s5984_s9 }
  0x3e   :  { %6916 = sst [smem:[#allocation53_spill]] %s5994_s4 }
  0x3f   :  { %83 = vsyncpa [#allocation4], 0 }
  0x40   :  { %84 = vsyncpa [#allocation6], 0 }
  0x41   :  { %85 = vsyncpa [#allocation9], 0 }
  0x42   :  { %86 = vsyncpa [#allocation12], 0 }
  0x43   :  { %87 = vsyncpa [#allocation15], 0 }
  0x44   :  { %88 = vsyncpa [#allocation18], 0 }
  0x45   :  { %89 = vsyncpa [#allocation21], 0 }
  0x46   :  { %90 = vsyncpa [#allocation24], 0  ;;  %s6016_s14 = smov 0  }
  0x47 LB: > { %s5802_s0 = smov [#allocation5]   ;;  %s6022_s4 = sadd.s32 4294967295, %s5763_s14   ;;  %s5763_s14 = sphi %s6016_s14, %s96_s14  }
  0x48   : > { %s949_s9 = sshll.u32 %s5802_s0, 4  ;;  %p4350_p0 = scmp.ge.s32.totalorder %s5763_s14, 1  ;;  %s950_s9 = int_to_ptr.vmem [resolvable:$true] %s949_s9 }
  0x49   : > { %p919_p1 = scmp.lt.s32.totalorder %s5763_s14, 3  ;;  %p6889_p2 = scmp.eq.s32.totalorder %s6022_s4, 0 }
  0x4a   : > { %s5803_s11 = smov [#allocation8]   ;;  %s5804_s15 = smov [#allocation11]  }
  0x4b   : > { %p6027_p3 = pnand %p4350_p0, %p919_p1  ;;  %s974_s16 = sshll.u32 %s5803_s11, 4  ;;  %s6033_s16 = int_to_ptr.vmem [resolvable:$true] %s974_s16 }
  0x4c   : > { %s999_s18 = sshll.u32 %s5804_s15, 4  ;;  %s5805_s26 = smov [#allocation14]   ;;  %s6041_s18 = int_to_ptr.vmem [resolvable:$true] %s999_s18 }
  0x4d   : > { %s6917_s7 = scalar_select %p6027_p3, 1, 0 }
  0x4e   : > { %p5161_p4 = pneg %p6027_p3  ;;  %s1027_s28 = sshll.u32 %s5805_s26, 4  ;;  %s6043_s28 = int_to_ptr.vmem [resolvable:$true] %s1027_s28 }
  0x4f   : > { %s5346_s0 = scalar_lea.vmem %s950_s9, 16  ;;  %s5353_s11 = scalar_lea.vmem %s950_s9, 32 }
  0x50   : > { %p6037_p5 = pnand %p6889_p2, %p5161_p4  ;;  %p5347_p7 = scmp.ne.s32.totalorder %s950_s9, %s5346_s0 }
  0x51   : > { %p5354_p10 = scmp.lt.s32.totalorder %s950_s9, %s950_s9  ;;  %p5355_p11 = scmp.lt.s32.totalorder %s5353_s11, %s5346_s0 }
  0x52   : > { %p6047_p6 = pneg %p6037_p5 }
  0x53   : > { %p5356_p12 = por %p5355_p11, %p5354_p10 }
  0x54   : > { %p5349_p8 = pnand %p5347_p7, %p6047_p6 }
  0x56   : > { %p5350_p9 = pneg %p5349_p8 }
  0x58   : > { %p5357_p13 = pnand %p5356_p12, %p5350_p9 }
  0x5a   : > { %5360 = shalt.err (!%p5357_p13)
}
  0x5b   : > { %5167 = dma.hbm_to_vmem [thread:$0]  (!%p6037_p5), %s5851_s21, 16, %s950_s9, [#allocation6]  }
  0x5c   : > { %s5372_s15 = scalar_lea.vmem %s6033_s16, 64  ;;  %p5380_p7 = scmp.lt.s32.totalorder %s6033_s16, %s6033_s16 }
  0x5d   : > { %p5373_p0 = scmp.ne.s32.totalorder %s6033_s16, %s5372_s15  ;;  %p5381_p8 = scmp.lt.s32.totalorder %s5372_s15, %s5372_s15 }
  0x5f   : > { %p5375_p1 = pnand %p5373_p0, %p6047_p6  ;;  %p5382_p2 = por %p5381_p8, %p5380_p7 }
  0x61   : > { %p5376_p4 = pneg %p5375_p1 }
  0x63   : > { %p5383_p10 = pnand %p5382_p2, %p5376_p4 }
  0x65   : > { %5386 = shalt.err (!%p5383_p10)
}
  0x66   : > { %s6920_s3 = sld [smem:[#allocation38_spill]]  ;;  %s5398_s9 = scalar_lea.vmem %s6041_s18, 16 }
  0x67   : > { %p5399_p9 = scmp.ne.s32.totalorder %s6041_s18, %s5398_s9  ;;  %s5405_s26 = scalar_lea.vmem %s6041_s18, 32 }
  0x68   : > { %p5406_p13 = scmp.lt.s32.totalorder %s6041_s18, %s6041_s18  ;;  %p5407_p2 = scmp.lt.s32.totalorder %s5405_s26, %s5398_s9 }
  0x69   : > { %p5401_p11 = pnand %p5399_p9, %p6047_p6 }
  0x6a   : > { %p5408_p0 = por %p5407_p2, %p5406_p13 }
  0x6b   : > { %p5402_p12 = pneg %p5401_p11 }
  0x6c   : > { %5173 = dma.hbm_to_vmem [thread:$0]  (!%p6037_p5), %s6920_s3, 64, %s6033_s16, [#allocation9]  }
  0x6d   : > { %p5409_p1 = pnand %p5408_p0, %p5402_p12 }
  0x6f   : > { %5412 = shalt.err (!%p5409_p1)
}
  0x70   : > { %5179 = dma.hbm_to_vmem [thread:$0]  (!%p6037_p5), %s5881_s19, 16, %s6041_s18, [#allocation12]  }
  0x71   : > { %s5424_s16 = scalar_lea.vmem %s6043_s28, 16  ;;  %s5431_s0 = scalar_lea.vmem %s6043_s28, 32 }
  0x72   : > { %p5425_p4 = scmp.ne.s32.totalorder %s6043_s28, %s5424_s16  ;;  %p5432_p10 = scmp.lt.s32.totalorder %s6043_s28, %s6043_s28 }
  0x73   : > { %p5433_p9 = scmp.lt.s32.totalorder %s5431_s0, %s5424_s16 }
  0x74   : > { %p5427_p7 = pnand %p5425_p4, %p6047_p6 }
  0x75   : > { %p5434_p11 = por %p5433_p9, %p5432_p10 }
  0x76   : > { %p5428_p8 = pneg %p5427_p7 }
  0x78   : > { %p5435_p12 = pnand %p5434_p11, %p5428_p8 }
  0x7a   : > { %5438 = shalt.err (!%p5435_p12)
}
  0x7b   : > { %5185 = dma.hbm_to_vmem [thread:$0]  (!%p6037_p5), %s5901_s12, 16, %s6043_s28, [#allocation15]  }
  0x7c   : > { %s5806_s11 = smov [#allocation17]   ;;  %s5807_s15 = smov [#allocation20]  }
  0x7d   : > { %s1061_s18 = sshll.u32 %s5806_s11, 4  ;;  %s1089_s9 = sshll.u32 %s5807_s15, 4  ;;  %s1062_s18 = int_to_ptr.vmem [resolvable:$true] %s1061_s18  ;;  %s1090_s9 = int_to_ptr.vmem [resolvable:$true] %s1089_s9 }
  0x7e   : > { %s5450_s26 = scalar_lea.vmem %s1062_s18, 16  ;;  %s5457_s16 = scalar_lea.vmem %s1062_s18, 32 }
  0x7f   : > { %p5451_p13 = scmp.ne.s32.totalorder %s1062_s18, %s5450_s26  ;;  %p5458_p1 = scmp.lt.s32.totalorder %s1062_s18, %s1062_s18 }
  0x80   : > { %p5459_p4 = scmp.lt.s32.totalorder %s5457_s16, %s5450_s26 }
  0x81   : > { %p5453_p2 = pnand %p5451_p13, %p6047_p6 }
  0x82   : > { %p5460_p7 = por %p5459_p4, %p5458_p1 }
  0x83   : > { %p5454_p0 = pneg %p5453_p2 }
  0x85   : > { %p5461_p8 = pnand %p5460_p7, %p5454_p0 }
  0x87   : > { %5464 = shalt.err (!%p5461_p8)
}
  0x88   : > { %5191 = dma.hbm_to_vmem [thread:$0]  (!%p6037_p5), %s5931_s20, 16, %s1062_s18, [#allocation18]  }
  0x89   : > { %s5476_s28 = scalar_lea.vmem %s1090_s9, 16  ;;  %s5483_s0 = scalar_lea.vmem %s1090_s9, 32 }
  0x8a   : > { %p5477_p10 = scmp.ne.s32.totalorder %s1090_s9, %s5476_s28  ;;  %p5484_p12 = scmp.lt.s32.totalorder %s1090_s9, %s1090_s9 }
  0x8b   : > { %p5485_p13 = scmp.lt.s32.totalorder %s5483_s0, %s5476_s28 }
  0x8c   : > { %p5479_p9 = pnand %p5477_p10, %p6047_p6 }
  0x8d   : > { %p5486_p2 = por %p5485_p13, %p5484_p12 }
  0x8e   : > { %p5480_p11 = pneg %p5479_p9 }
  0x90   : > { %p5487_p3 = pnand %p5486_p2, %p5480_p11 }
  0x92   : > { %5490 = shalt.err (!%p5487_p3)
}
  0x93   : > { %5197 = dma.hbm_to_vmem [thread:$0]  (!%p6037_p5), %s5951_s6, 16, %s1090_s9, [#allocation21]  }
  0x94   : > { %s5808_s11 = smov [#allocation23]   ;;  %s5809_s18 = smov [#allocation3]  }
  0x95   : > { %s1129_s15 = sshll.u32 %s5808_s11, 4  ;;  %s938_s26 = sshll.u32 %s5809_s18, 4  ;;  %s1130_s15 = int_to_ptr.vmem [resolvable:$true] %s1129_s15  ;;  %s939_s26 = int_to_ptr.vmem [resolvable:$true] %s938_s26 }
  0x96   : > { %s5502_s16 = scalar_lea.vmem %s1130_s15, 16  ;;  %s5509_s3 = scalar_lea.vmem %s1130_s15, 32 }
  0x97   : > { %p5503_p0 = scmp.ne.s32.totalorder %s1130_s15, %s5502_s16  ;;  %p5510_p7 = scmp.lt.s32.totalorder %s1130_s15, %s1130_s15 }
  0x98   : > { %p5511_p8 = scmp.lt.s32.totalorder %s5509_s3, %s5502_s16 }
  0x99   : > { %p5505_p1 = pnand %p5503_p0, %p6047_p6 }
  0x9a   : > { %p5512_p10 = por %p5511_p8, %p5510_p7 }
  0x9b   : > { %p5506_p4 = pneg %p5505_p1 }
  0x9d   : > { %p5513_p3 = pnand %p5512_p10, %p5506_p4 }
  0x9f   : > { %5516 = shalt.err (!%p5513_p3)
}
  0xa0   : > { %5203 = dma.hbm_to_vmem [thread:$0]  (!%p6037_p5), %s5989_s25, 16, %s1130_s15, [#allocation24]  }
  0xa1   : > { %s5528_s9 = scalar_lea.vmem %s939_s26, 64  ;;  %p5536_p13 = scmp.lt.s32.totalorder %s939_s26, %s939_s26 }
  0xa2   : > { %p5529_p9 = scmp.ne.s32.totalorder %s939_s26, %s5528_s9  ;;  %p5537_p2 = scmp.lt.s32.totalorder %s5528_s9, %s5528_s9 }
  0xa4   : > { %p5531_p11 = pnand %p5529_p9, %p6047_p6  ;;  %p5538_p0 = por %p5537_p2, %p5536_p13 }
  0xa6   : > { %p5532_p12 = pneg %p5531_p11 }
  0xa8   : > { %p5539_p1 = pnand %p5538_p0, %p5532_p12 }
  0xaa   : > { %5542 = shalt.err (!%p5539_p1)
}
  0xab   : > { %5164 = dma.hbm_to_vmem [thread:$0]  (!%p6037_p5), %s5846_s17, 64, %s939_s26, [#allocation4]  }
  0xac   : > { %s5810_s3 = smov [#allocation7]   ;;  %s5811_s0 = smov [#allocation10]  }
  0xad   : > { %s963_s28 = sshll.u32 %s5810_s3, 4  ;;  %s985_s11 = sshll.u32 %s5811_s0, 4  ;;  %s964_s28 = int_to_ptr.vmem [resolvable:$true] %s963_s28  ;;  %s986_s11 = int_to_ptr.vmem [resolvable:$true] %s985_s11 }
  0xae   : > { %s5554_s15 = scalar_lea.vmem %s964_s28, 16  ;;  %s5561_s18 = scalar_lea.vmem %s964_s28, 32 }
  0xaf   : > { %p5555_p4 = scmp.ne.s32.totalorder %s964_s28, %s5554_s15  ;;  %p5562_p10 = scmp.lt.s32.totalorder %s964_s28, %s964_s28 }
  0xb0   : > { %p5563_p3 = scmp.lt.s32.totalorder %s5561_s18, %s5554_s15 }
  0xb1   : > { %p5557_p7 = pnand %p5555_p4, %p6047_p6 }
  0xb2   : > { %p5564_p9 = por %p5563_p3, %p5562_p10 }
  0xb3   : > { %p5558_p8 = pneg %p5557_p7 }
  0xb5   : > { %p5565_p11 = pnand %p5564_p9, %p5558_p8 }
  0xb7   : > { %5568 = shalt.err (!%p5565_p11)
}
  0xb8   : > { %5170 = dma.hbm_to_vmem [thread:$0]  (!%p6037_p5), %s5861_s29, 16, %s964_s28, [#allocation6]  }
  0xb9   : > { %s5580_s26 = scalar_lea.vmem %s986_s11, 16  ;;  %s5587_s16 = scalar_lea.vmem %s986_s11, 32 }
  0xba   : > { %p5581_p12 = scmp.ne.s32.totalorder %s986_s11, %s5580_s26  ;;  %p5588_p0 = scmp.lt.s32.totalorder %s986_s11, %s986_s11 }
  0xbb   : > { %p5589_p1 = scmp.lt.s32.totalorder %s5587_s16, %s5580_s26 }
  0xbc   : > { %p5583_p13 = pnand %p5581_p12, %p6047_p6 }
  0xbd   : > { %p5590_p4 = por %p5589_p1, %p5588_p0 }
  0xbe   : > { %p5584_p2 = pneg %p5583_p13 }
  0xc0   : > { %p5591_p7 = pnand %p5590_p4, %p5584_p2 }
  0xc2   : > { %5594 = shalt.err (!%p5591_p7)
}
  0xc3   : > { %5176 = dma.hbm_to_vmem [thread:$0]  (!%p6037_p5), %s5871_s8, 16, %s986_s11, [#allocation9]  }
  0xc4   : > { %s5812_s9 = smov [#allocation13]   ;;  %s5813_s28 = smov [#allocation16]  }
  0xc5   : > { %s1013_s3 = sshll.u32 %s5812_s9, 4  ;;  %s1041_s0 = sshll.u32 %s5813_s28, 4  ;;  %s1014_s3 = int_to_ptr.vmem [resolvable:$true] %s1013_s3  ;;  %s1042_s0 = int_to_ptr.vmem [resolvable:$true] %s1041_s0 }
  0xc6   : > { %s5606_s15 = scalar_lea.vmem %s1014_s3, 16  ;;  %s5613_s18 = scalar_lea.vmem %s1014_s3, 32 }
  0xc7   : > { %p5607_p8 = scmp.ne.s32.totalorder %s1014_s3, %s5606_s15  ;;  %p5614_p9 = scmp.lt.s32.totalorder %s1014_s3, %s1014_s3 }
  0xc8   : > { %p5615_p11 = scmp.lt.s32.totalorder %s5613_s18, %s5606_s15 }
  0xc9   : > { %p5609_p10 = pnand %p5607_p8, %p6047_p6 }
  0xca   : > { %p5616_p12 = por %p5615_p11, %p5614_p9 }
  0xcb   : > { %p5610_p3 = pneg %p5609_p10 }
  0xcd   : > { %p5617_p13 = pnand %p5616_p12, %p5610_p3 }
  0xcf   : > { %5620 = shalt.err (!%p5617_p13)
}
  0xd0   : > { %5182 = dma.hbm_to_vmem [thread:$0]  (!%p6037_p5), %s5891_s30, 16, %s1014_s3, [#allocation12]  }
  0xd1   : > { %s5632_s11 = scalar_lea.vmem %s1042_s0, 16  ;;  %s5639_s26 = scalar_lea.vmem %s1042_s0, 32 }
  0xd2   : > { %p5633_p2 = scmp.ne.s32.totalorder %s1042_s0, %s5632_s11  ;;  %p5640_p4 = scmp.lt.s32.totalorder %s1042_s0, %s1042_s0 }
  0xd3   : > { %p5641_p7 = scmp.lt.s32.totalorder %s5639_s26, %s5632_s11 }
  0xd4   : > { %p5635_p0 = pnand %p5633_p2, %p6047_p6 }
  0xd5   : > { %p5642_p8 = por %p5641_p7, %p5640_p4 }
  0xd6   : > { %p5636_p1 = pneg %p5635_p0 }
  0xd8   : > { %p5643_p10 = pnand %p5642_p8, %p5636_p1 }
  0xda   : > { %5646 = shalt.err (!%p5643_p10)
}
  0xdb   : > { %5188 = dma.hbm_to_vmem [thread:$0]  (!%p6037_p5), %s5911_s27, 16, %s1042_s0, [#allocation15]  }
  0xdc   : > { %s5814_s16 = smov [#allocation19]   ;;  %s5815_s3 = smov [#allocation22]  }
  0xdd   : > { %s1075_s9 = sshll.u32 %s5814_s16, 4  ;;  %s1115_s28 = sshll.u32 %s5815_s3, 4  ;;  %s1076_s9 = int_to_ptr.vmem [resolvable:$true] %s1075_s9  ;;  %s1116_s28 = int_to_ptr.vmem [resolvable:$true] %s1115_s28 }
  0xde   : > { %s5658_s15 = scalar_lea.vmem %s1076_s9, 16  ;;  %s5665_s18 = scalar_lea.vmem %s1076_s9, 32 }
  0xdf   : > { %p5659_p3 = scmp.ne.s32.totalorder %s1076_s9, %s5658_s15  ;;  %p5666_p12 = scmp.lt.s32.totalorder %s1076_s9, %s1076_s9 }
  0xe0   : > { %p5667_p13 = scmp.lt.s32.totalorder %s5665_s18, %s5658_s15 }
  0xe1   : > { %p5661_p9 = pnand %p5659_p3, %p6047_p6 }
  0xe2   : > { %p5668_p2 = por %p5667_p13, %p5666_p12 }
  0xe3   : > { %p5662_p11 = pneg %p5661_p9 }
  0xe5   : > { %p5669_p0 = pnand %p5668_p2, %p5662_p11 }
  0xe7   : > { %5672 = shalt.err (!%p5669_p0)
}
  0xe8   : > { %5194 = dma.hbm_to_vmem [thread:$0]  (!%p6037_p5), %s5941_s13, 16, %s1076_s9, [#allocation18]  }
  0xe9   : > { %s5684_s0 = scalar_lea.vmem %s1116_s28, 16  ;;  %s5691_s11 = scalar_lea.vmem %s1116_s28, 32 }
  0xea   : > { %p5685_p1 = scmp.ne.s32.totalorder %s1116_s28, %s5684_s0  ;;  %p5692_p8 = scmp.lt.s32.totalorder %s1116_s28, %s1116_s28 }
  0xeb   : > { %p5693_p10 = scmp.lt.s32.totalorder %s5691_s11, %s5684_s0 }
  0xec   : > { %p5687_p4 = pnand %p5685_p1, %p6047_p6 }
  0xed   : > { %p5694_p3 = por %p5693_p10, %p5692_p8 }
  0xee   : > { %p5688_p7 = pneg %p5687_p4 }
  0xf0   : > { %p5695_p9 = pnand %p5694_p3, %p5688_p7 }
  0xf2   : > { %5698 = shalt.err (!%p5695_p9)
}
  0xf3   : > { %5200 = dma.hbm_to_vmem [thread:$0]  (!%p6037_p5), %s5979_s24, 16, %s1116_s28, [#allocation21]  }
  0xf4   : > { %s5816_s26 = smov [#allocation25]  }
  0xf5   : > { %s1143_s16 = sshll.u32 %s5816_s26, 4  ;;  %s1144_s16 = int_to_ptr.vmem [resolvable:$true] %s1143_s16 }
  0xf6   : > { %s5710_s9 = scalar_lea.vmem %s1144_s16, 32  ;;  %p5718_p2 = scmp.lt.s32.totalorder %s1144_s16, %s1144_s16 }
  0xf7   : > { %p5711_p11 = scmp.ne.s32.totalorder %s1144_s16, %s5710_s9  ;;  %p5719_p0 = scmp.lt.s32.totalorder %s5710_s9, %s5710_s9 }
  0xf9   : > { %p5713_p12 = pnand %p5711_p11, %p6047_p6  ;;  %p5720_p1 = por %p5719_p0, %p5718_p2 }
  0xfb   : > { %p5714_p13 = pneg %p5713_p12 }
  0xfd   : > { %p5721_p4 = pnand %p5720_p1, %p5714_p13 }
  0xff   : > { %5724 = shalt.err (!%p5721_p4)
}
 0x100   : > { %5206 = dma.hbm_to_vmem [thread:$0]  (!%p6037_p5), %s5999_s5, 32, %s1144_s16, [#allocation24]  }
 0x101   : > { %p6921_p7 = scmp.ne.s32.totalorder %s6917_s7, 0 }
 0x102   : > { %p6922_p8 = scmp.eq.s32.totalorder (!%p6921_p7), %s6022_s4, 0 }
 0x103   : > { %1164 = sbr.rel (%p6921_p7) target bundleno = 2807 (0xaf7), region = 160 }
 0x108   : > { %5730 = dma.done.wait (%p6922_p8), [#allocation4], 64   ;;  %p6923_p10 = pmov %p6922_p8 }
 0x109   : > { %p6924_p6 = pmov %p6922_p8 }
 0x10a   : > { %5732 = vsyncadd (%p6923_p10), [#allocation4], 4294967232 }
 0x10b   : > { %5734 = dma.done.wait (%p6924_p6), [#allocation6], 32   ;;  %p6925_p3 = pmov %p6924_p6 }
 0x10d   : > { %5736 = vsyncadd (%p6925_p3), [#allocation6], 4294967264  ;;  %p6926_p9 = pmov %p6925_p3 }
 0x10e   : > { %p6927_p5 = pmov %p6925_p3 }
 0x10f   : > { %5738 = dma.done.wait (%p6926_p9), [#allocation9], 80  }
 0x110   : > { %5740 = vsyncadd (%p6927_p5), [#allocation9], 4294967216  ;;  %p6928_p11 = pmov %p6925_p3 }
 0x111   : > { %p6929_p12 = pmov %p6925_p3 }
 0x112   : > { %5742 = dma.done.wait (%p6928_p11), [#allocation12], 32  }
 0x113   : > { %5744 = vsyncadd (%p6929_p12), [#allocation12], 4294967264  ;;  %p6930_p13 = pmov %p6925_p3 }
 0x114   : > { %p6931_p2 = pmov %p6925_p3 }
 0x115   : > { %5746 = dma.done.wait (%p6930_p13), [#allocation15], 32  }
 0x116   : > { %5748 = vsyncadd (%p6931_p2), [#allocation15], 4294967264  ;;  %p6932_p0 = pmov %p6931_p2 }
 0x118   : > { %5750 = dma.done.wait (%p6932_p0), [#allocation18], 32   ;;  %p6933_p1 = pmov %p6932_p0 }
 0x119   : > { %p6934_p4 = pmov %p6932_p0 }
 0x11a   : > { %5752 = vsyncadd (%p6933_p1), [#allocation18], 4294967264 }
 0x11b   : > { %5754 = dma.done.wait (%p6934_p4), [#allocation21], 32   ;;  %p6935_p7 = pmov %p6932_p0 }
 0x11c   : > { %p6936_p8 = pmov %p6932_p0 }
 0x11d   : > { %5756 = vsyncadd (%p6935_p7), [#allocation21], 4294967264 }
 0x11e   : > { %5758 = dma.done.wait (%p6936_p8), [#allocation24], 48   ;;  %p6937_p10 = pmov %p6932_p0 }
 0x11f   : > { %s6938_s7 = sld [smem:[#allocation34_spill]]  ;;  %p1319_p6 = scmp.lt.s32.totalorder %s6022_s4, 1  ;;  %v5817_v1 = vmov 0   ;;  %v5818_v5 = vmov 1   ;;  %v5819_v9 = vmov 2   ;;  %v1394_v24 = vlaneseq }
 0x120   : > { %5760 = vsyncadd (%p6937_p10), [#allocation24], 4294967248  ;;  %s6939_s23 = sld [smem:[#allocation37_spill]]  ;;  %5305 = vset.pattern.permute.xlu1 %v5817_v1  ;;  %5303 = vset.pattern.permute.xlu0 %v5817_v1  ;;  %v1353_v27 = vld [vmem:[#allocation3] sm:$0x7]  ;;  %vm1548_vm0 = vcmask 523264  }
 0x121   : > { %s6958_s4 = smov (!%p1319_p6, %s6022_s4), 1  ;;  %s6940_s28 = sld [smem:[#allocation39_spill]]  ;;  %v6234_v25 = vshrl.u32 %v1394_v24, 7  ;;  %v1699_v28 = vld [vmem:[#allocation8] sm:$0x7]  ;;  %vm1786_vm1 = vcmask 261120  }
 0x122   : > { %s4477_s2 = sshll.u32 %s6958_s4, 6  ;;  %v6267_v53 = vld [vmem:[#allocation5] ss:$0 sm:$0xff]  ;;  %v6269_v54 = vld [vmem:[#allocation10] ss:$0 sm:$0xff]  ;;  %s6941_s15 = sld [smem:[#allocation40_spill]] }
 0x123   : > { %v6237_v26 = vsub.s32 0, %v6234_v25  ;;  %v6240_v31 = vsub.s32 1, %v6234_v25  ;;  %v1492_v34 = vsub.s32 2, %v6234_v25  ;;  %s6942_s18 = sld [smem:[#allocation41_spill]]  ;;  %vm2714_vm2 = vcmask 23552  }
 0x124   : > { %s6943_s0 = sld [smem:[#allocation42_spill]]  ;;  %vm5821_vm3 = vmmov 0   ;;  %vm3392_vm4 = vcmask 18432   ;;  %vm3718_vm7 = vcmask 2048   ;;  %vm4048_vm8 = vcmp.lt.s32.totalorder %v1394_v24, 192 }
 0x125   : > { %s6185_s3 = scalar_lea.vmem %s6938_s7, %s4477_s2  ;;  %v6243_v32 = vrot.slane %v1353_v27, %v6237_v26  ;;  %v6246_v33 = vrot.slane %v1699_v28, %v6237_v26  ;;  %v6250_v35 = vrot.slane %v1353_v27, %v6240_v31  ;;  %v6253_v36 = vrot.slane %v1699_v28, %v6240_v31  ;;  %s6944_s11 = sld [smem:[#allocation43_spill]] }
 0x126   : > { %v1337_v2 = vld [vmem:[%s6185_s3 + $0x8] sm:$0xff]  ;;  %v1336_v3 = vld [vmem:[%s6185_s3] sm:$0xff]  ;;  %v1540_v4 = vld [vmem:[%s6939_s23 + $0x38] sm:$0xff]  ;;  %v6259_v43 = vrot.slane %v1353_v27, %v1492_v34  ;;  %v6261_v44 = vrot.slane %v1699_v28, %v1492_v34  ;;  %s6945_s26 = sld [smem:[#allocation45_spill]] }
 0x127   : > { %1361 = vperm.xlu1 %5305, %v1337_v2   ;;  %1356 = vperm.xlu0 %5303, %v1336_v3   ;;  %v1539_v6 = vld [vmem:[%s6939_s23 + $0x30] sm:$0xff]  ;;  %v1339_v7 = vld [vmem:[%s6185_s3 + $0x18] sm:$0xff]  ;;  %v1538_v8 = vld [vmem:[%s6939_s23 + $0x28] sm:$0xff]  ;;  %s6946_s16 = sld [smem:[#allocation35_spill]] }
 0x128   : > { %4829 = vmatprep.subr.mxu0 %v1540_v4  ;;  %v1537_v10 = vld [vmem:[%s6939_s23 + $0x20] sm:$0xff]  ;;  %v1778_v11 = vld [vmem:[%s6940_s28 + $0x18] sm:$0xff]  ;;  %v1338_v12 = vld [vmem:[%s6185_s3 + $0x10] sm:$0xff]  ;;  %s6947_s9 = sld [smem:[#allocation44_spill]] }
 0x129   : > { %4830 = vmatpush3.msra.mxu0 %v1540_v4  ;;  %4857 = vmatprep.subr.mxu1 %v1778_v11  ;;  %v1777_v13 = vld [vmem:[%s6940_s28 + $0x10] sm:$0xff]  ;;  %v1536_v14 = vld [vmem:[%s6939_s23 + $0x18] sm:$0xff]  ;;  %v1776_v15 = vld [vmem:[%s6940_s28 + $0x8] sm:$0xff]  ;;  %s6948_s7 = sld [smem:[#allocation46_spill]] }
 0x12a   : > { %4831 = vmatprep.subr.mxu0 %v1539_v6  ;;  %4858 = vmatpush3.msra.mxu1 %v1778_v11  ;;  %v1535_v16 = vld [vmem:[%s6939_s23 + $0x10] sm:$0xff]  ;;  %v1775_v17 = vld [vmem:[%s6940_s28] sm:$0xff]  ;;  %v1534_v18 = vld [vmem:[%s6939_s23 + $0x8] sm:$0xff]  ;;  %s6949_s2 = sld [smem:[#allocation48_spill]] }
 0x12b   : > { %5306 = vset.pattern.permute.xlu1 %v5818_v5  ;;  %5304 = vset.pattern.permute.xlu0 %v5818_v5  ;;  %v1341_v19 = vld [vmem:[%s6185_s3 + $0x28] sm:$0xff]  ;;  %v1533_v20 = vld [vmem:[%s6939_s23] sm:$0xff]  ;;  %v6214_v21 = vld [vmem:[%s6185_s3 + $0x38] sm:$0xff] }
 0x12c   : > { %1411 = vperm.xlu1 %5306, %v1337_v2   ;;  %1407 = vperm.xlu0 %5304, %v1336_v3   ;;  %v1340_v22 = vld [vmem:[%s6185_s3 + $0x20] sm:$0xff]  ;;  %v6224_v23 = vld [vmem:[%s6185_s3 + $0x30] sm:$0xff] }
 0x12d   : > { %4832 = vmatpush3.msra.mxu0 %v1539_v6  ;;  %4859 = vmatprep.subr.mxu1 %v1777_v13 }
 0x12e   : > { %4833 = vmatprep.subr.mxu0 %v1538_v8  ;;  %4860 = vmatpush3.msra.mxu1 %v1777_v13 }
 0x12f   : > { %4834 = vmatpush3.msra.mxu0 %v1538_v8  ;;  %4861 = vmatprep.subr.mxu1 %v1776_v15 }
 0x130   : > { %5307 = vset.pattern.permute.xlu1 %v5819_v9  ;;  %5310 = vset.pattern.permute.xlu0 %v5817_v1 }
 0x131   : > { %1459 = vperm.xlu1 %5307, %v1336_v3   ;;  %1371 = vperm.xlu0 %5310, %v1339_v7  }
 0x132   : > { %4835 = vmatprep.subr.mxu0 %v1537_v10  ;;  %4862 = vmatpush3.msra.mxu1 %v1776_v15 }
 0x133   : > { %4836 = vmatpush3.msra.mxu0 %v1537_v10  ;;  %4863 = vmatprep.subr.mxu1 %v1775_v17 }
 0x134   : > { %4837 = vmatprep.subr.mxu0 %v1536_v14  ;;  %4864 = vmatpush3.msra.mxu1 %v1775_v17 }
 0x135   : > { %5308 = vset.pattern.permute.xlu1 %v5817_v1  ;;  %5311 = vset.pattern.permute.xlu0 %v5819_v9 }
 0x136   : > { %1366 = vperm.xlu1 %5308, %v1338_v12   ;;  %1463 = vperm.xlu0 %5311, %v1337_v2  }
 0x137   : > { %4838 = vmatpush3.msra.mxu0 %v1536_v14 }
 0x138   : > { %4839 = vmatprep.subr.mxu0 %v1535_v16 }
 0x139   : > { %4840 = vmatpush3.msra.mxu0 %v1535_v16 }
 0x13a   : > { %5309 = vset.pattern.permute.xlu1 %v5818_v5  ;;  %1471 = vperm.xlu0 %5311, %v1339_v7  }
 0x13b   : > { %1415 = vperm.xlu1 %5309, %v1338_v12   ;;  %4841 = vmatprep.subr.mxu0 %v1534_v18 }
 0x13c   : > { %4842 = vmatpush3.msra.mxu0 %v1534_v18 }
 0x13d   : > { %4843 = vmatprep.subr.mxu0 %v1533_v20 }
 0x13e   : > { %1479 = vperm.xlu0 %5311, %v1341_v19   ;;  %4844 = vmatpush3.msra.mxu0 %v1533_v20 }
 0x13f   : > { %1419 = vperm.xlu1 %5309, %v1339_v7  }
 0x142   : > { %5316 = vset.pattern.permute.xlu0 %v5817_v1 }
 0x143   : > { %5312 = vset.pattern.permute.xlu1 %v5819_v9  ;;  %1381 = vperm.xlu0 %5316, %v1341_v19  }
 0x144   : > { %1467 = vperm.xlu1 %5312, %v1338_v12  }
 0x147   : > { %1391 = vperm.xlu0 %5316, %v6214_v21  }
 0x148   : > { %5313 = vset.pattern.permute.xlu1 %v5817_v1 }
 0x149   : > { %1376 = vperm.xlu1 %5313, %v1340_v22  }
 0x14b   : > { %5320 = vset.pattern.permute.xlu0 %v5819_v9 }
 0x14c   : > { %1487 = vperm.xlu0 %5320, %v6214_v21  }
 0x14d   : > { %5314 = vset.pattern.permute.xlu1 %v5818_v5 }
 0x14e   : > { %1423 = vperm.xlu1 %5314, %v1340_v22  }
 0x152   : > { %1427 = vperm.xlu1 %5314, %v1341_v19  }
 0x156   : > { %5315 = vset.pattern.permute.xlu1 %v5819_v9 }
 0x157   : > { %1475 = vperm.xlu1 %5315, %v1340_v22  }
 0x15b   : > { %5317 = vset.pattern.permute.xlu1 %v5817_v1 }
 0x15c   : > { %1386 = vperm.xlu1 %5317, %v6224_v23  }
 0x160   : > { %5318 = vset.pattern.permute.xlu1 %v5818_v5 }
 0x161   : > { %1431 = vperm.xlu1 %5318, %v6224_v23  }
 0x165   : > { %1435 = vperm.xlu1 %5318, %v6214_v21  }
 0x169   : > { %5319 = vset.pattern.permute.xlu1 %v5819_v9 }
 0x16a   : > { %1483 = vperm.xlu1 %5319, %v6224_v23  }
 0x1a2   : > { %v1362_v29 = vpop.permute.xlu1 %1361  ;;  %v1357_v30 = vpop.permute.xlu0 %1356 }
 0x1a3   : > { %v1398_v37 = vmul.f32 %v6243_v32, %v1357_v30  ;;  %v1704_v38 = vmul.f32 %v6246_v33, %v1357_v30  ;;  %v1399_v57 = vmul.f32 %v6243_v32, %v1362_v29  ;;  %v1705_v58 = vmul.f32 %v6246_v33, %v1362_v29 }
 0x1a7   : > { %v1412_v39 = vpop.permute.xlu1 %1411  ;;  %v1408_v40 = vpop.permute.xlu0 %1407 }
 0x1a8   : > { %v1442_v41 = vmul.f32 %v6250_v35, %v1408_v40  ;;  %v1716_v42 = vmul.f32 %v6253_v36, %v1408_v40  ;;  %v1443_v51 = vmul.f32 %v6250_v35, %v1412_v39  ;;  %v1717_v52 = vmul.f32 %v6253_v36, %v1412_v39 }
 0x1aa   : > { %v1450_v45 = vadd.f32 %v1442_v41, %v1398_v37  ;;  %v1724_v46 = vadd.f32 %v1716_v42, %v1704_v38  ;;  %v1451_v63 = vadd.f32 %v1443_v51, %v1399_v57  ;;  %v1725_v0 = vadd.f32 %v1717_v52, %v1705_v58 }
 0x1ac   : > { %v1460_v47 = vpop.permute.xlu1 %1459  ;;  %v1372_v48 = vpop.permute.xlu0 %1371 }
 0x1ad   : > { %v1494_v49 = vmul.f32 %v6259_v43, %v1460_v47  ;;  %v1736_v50 = vmul.f32 %v6261_v44, %v1460_v47  ;;  %v1401_v13 = vmul.f32 %v6243_v32, %v1372_v48  ;;  %v1707_v14 = vmul.f32 %v6246_v33, %v1372_v48 }
 0x1af   : > { %v1502_v55 = vadd.f32 %v1494_v49, %v1450_v45  ;;  %v1744_v56 = vadd.f32 %v1736_v50, %v1724_v46 }
 0x1b1   : > { %v1367_v59 = vpop.permute.xlu1 %1366  ;;  %v1464_v60 = vpop.permute.xlu0 %1463  ;;  %v1517_v61 = vadd.f32 %v6267_v53, %v1502_v55  ;;  %v1759_v62 = vadd.f32 %v6269_v54, %v1744_v56 }
 0x1b2   : > { %v1495_v1 = vmul.f32 %v6259_v43, %v1464_v60  ;;  %v1737_v2 = vmul.f32 %v6261_v44, %v1464_v60  ;;  %v1400_v29 = vmul.f32 %v6243_v32, %v1367_v59  ;;  %v1706_v30 = vmul.f32 %v6246_v33, %v1367_v59 }
 0x1b3   : > { %v1525_v3 = vmax.f32 %v1517_v61, 0.0  ;;  %v1767_v4 = vmax.f32 %v1759_v62, 0.0 }
 0x1b4   : > { %v1503_v5 = vadd.f32 %v1495_v1, %v1451_v63  ;;  %v1745_v6 = vadd.f32 %v1737_v2, %v1725_v0 }
 0x1b5   : > { %4845 = vmatprep.mubr.msk.f32.mxu0 %vm1548_vm0, %v1525_v3  ;;  %4865 = vmatprep.mubr.msk.f32.mxu1 %vm1786_vm1, %v1767_v4  ;;  %v1472_v12 = vpop.permute.xlu0 %1471 }
 0x1b6   : > { %v1518_v7 = vadd.f32 %v6267_v53, %v1503_v5  ;;  %v1760_v8 = vadd.f32 %v6269_v54, %v1745_v6  ;;  %v1416_v9 = vpop.permute.xlu1 %1415  ;;  %v1497_v18 = vmul.f32 %v6259_v43, %v1472_v12  ;;  %v1739_v19 = vmul.f32 %v6261_v44, %v1472_v12 }
 0x1b7   : > { %v1444_v20 = vmul.f32 %v6250_v35, %v1416_v9  ;;  %v1718_v22 = vmul.f32 %v6253_v36, %v1416_v9 }
 0x1b8   : > { %v1526_v10 = vmax.f32 %v1518_v7, 0.0  ;;  %v1768_v11 = vmax.f32 %v1760_v8, 0.0 }
 0x1b9   : > { %v1452_v39 = vadd.f32 %v1444_v20, %v1400_v29  ;;  %v1726_v40 = vadd.f32 %v1718_v22, %v1706_v30  ;;  %v1480_v49 = vpop.permute.xlu0 %1479 }
 0x1ba   : > { %v1420_v15 = vpop.permute.xlu1 %1419  ;;  %4846 = vmatmul.mubr.msk.f32.vlgmr.msra.gmra.mxu0 %vm1548_vm0, %v1526_v10  ;;  %4866 = vmatmul.mubr.msk.f32.vlgmr.msra.gmra.mxu1 %vm1786_vm1, %v1768_v11  ;;  %v1499_v0 = vmul.f32 %v6259_v43, %v1480_v49  ;;  %v1741_v1 = vmul.f32 %v6261_v44, %v1480_v49 }
 0x1bb   : > { %v1445_v16 = vmul.f32 %v6250_v35, %v1420_v15  ;;  %v1719_v17 = vmul.f32 %v6253_v36, %v1420_v15 }
 0x1bd   : > { %v1453_v27 = vadd.f32 %v1445_v16, %v1401_v13  ;;  %v1727_v28 = vadd.f32 %v1719_v17, %v1707_v14 }
 0x1be   : > { %v1382_v60 = vpop.permute.xlu0 %1381 }
 0x1bf   : > { %v1505_v34 = vadd.f32 %v1497_v18, %v1453_v27  ;;  %v1747_v37 = vadd.f32 %v1739_v19, %v1727_v28  ;;  %v1468_v38 = vpop.permute.xlu1 %1467  ;;  %v1403_v61 = vmul.f32 %v6243_v32, %v1382_v60  ;;  %v1709_v62 = vmul.f32 %v6246_v33, %v1382_v60 }
 0x1c0   : > { %v1496_v41 = vmul.f32 %v6259_v43, %v1468_v38  ;;  %v1738_v42 = vmul.f32 %v6261_v44, %v1468_v38 }
 0x1c1   : > { %v1520_v47 = vadd.f32 %v6267_v53, %v1505_v34  ;;  %v1762_v48 = vadd.f32 %v6269_v54, %v1747_v37 }
 0x1c2   : > { %v1504_v45 = vadd.f32 %v1496_v41, %v1452_v39  ;;  %v1746_v46 = vadd.f32 %v1738_v42, %v1726_v40  ;;  %v1392_v38 = vpop.permute.xlu0 %1391 }
 0x1c3   : > { %v1528_v57 = vmax.f32 %v1520_v47, 0.0  ;;  %v1770_v58 = vmax.f32 %v1762_v48, 0.0  ;;  %v1405_v41 = vmul.f32 %v6243_v32, %v1392_v38  ;;  %v1711_v42 = vmul.f32 %v6246_v33, %v1392_v38 }
 0x1c4   : > { %v1519_v50 = vadd.f32 %v6267_v53, %v1504_v45  ;;  %v1761_v51 = vadd.f32 %v6269_v54, %v1746_v46  ;;  %v1377_v52 = vpop.permute.xlu1 %1376 }
 0x1c5   : > { %v1402_v8 = vmul.f32 %v6243_v32, %v1377_v52  ;;  %v1708_v9 = vmul.f32 %v6246_v33, %v1377_v52 }
 0x1c6   : > { %v1527_v55 = vmax.f32 %v1519_v50, 0.0  ;;  %v1769_v56 = vmax.f32 %v1761_v51, 0.0 }
 0x1c7   : > { %v1488_v40 = vpop.permute.xlu0 %1487 }
 0x1c8   : > { %4848 = vmatprep.mubr.msk.f32.mxu0 %vm1548_vm0, %v1527_v55  ;;  %4868 = vmatprep.mubr.msk.f32.mxu1 %vm1786_vm1, %v1769_v56  ;;  %v1501_v48 = vmul.f32 %v6259_v43, %v1488_v40  ;;  %v1743_v49 = vmul.f32 %v6261_v44, %v1488_v40 }
 0x1c9   : > { %v1424_v59 = vpop.permute.xlu1 %1423  ;;  %4849 = vmatmul.mubr.msk.f32.gmra.mxu0 %vm1548_vm0, %v1528_v57  ;;  %4869 = vmatmul.mubr.msk.f32.gmra.mxu1 %vm1786_vm1, %v1770_v58 }
 0x1ca   : > { %v1446_v4 = vmul.f32 %v6250_v35, %v1424_v59  ;;  %v1720_v5 = vmul.f32 %v6253_v36, %v1424_v59 }
 0x1cc   : > { %v1454_v13 = vadd.f32 %v1446_v4, %v1402_v8  ;;  %v1728_v14 = vadd.f32 %v1720_v5, %v1708_v9  ;;  %v2078_v8 = vld [vmem:[%s6942_s18 + $0x30] sm:$0xff]  ;;  %v2077_v9 = vld [vmem:[%s6942_s18 + $0x28] sm:$0xff] }
 0x1cd   : > { %v1428_v63 = vpop.permute.xlu1 %1427 }
 0x1ce   : > { %v1447_v2 = vmul.f32 %v6250_v35, %v1428_v63  ;;  %v1721_v3 = vmul.f32 %v6253_v36, %v1428_v63 }
 0x1d0   : > { %v1455_v6 = vadd.f32 %v1447_v2, %v1403_v61  ;;  %v1729_v7 = vadd.f32 %v1721_v3, %v1709_v62 }
 0x1d2   : > { %v1507_v10 = vadd.f32 %v1499_v0, %v1455_v6  ;;  %v1749_v11 = vadd.f32 %v1741_v1, %v1729_v7  ;;  %v1476_v12 = vpop.permute.xlu1 %1475  ;;  %v1924_v6 = vld [vmem:[%s6941_s15] sm:$0xff]  ;;  %v2079_v7 = vld [vmem:[%s6942_s18 + $0x38] sm:$0xff] }
 0x1d3   : > { %v1498_v15 = vmul.f32 %v6259_v43, %v1476_v12  ;;  %v1740_v16 = vmul.f32 %v6261_v44, %v1476_v12  ;;  %4897 = vmatprep.subr.mxu0 %v2079_v7 }
 0x1d4   : > { %v1522_v19 = vadd.f32 %v6267_v53, %v1507_v10  ;;  %v1764_v20 = vadd.f32 %v6269_v54, %v1749_v11  ;;  %4898 = vmatpush3.msra.mxu0 %v2079_v7  ;;  %v2076_v10 = vld [vmem:[%s6942_s18 + $0x20] sm:$0xff]  ;;  %v4399_v11 = vld [vmem:[#allocation11] ss:$0 sm:$0xff] }
 0x1d5   : > { %v1506_v17 = vadd.f32 %v1498_v15, %v1454_v13  ;;  %v1748_v18 = vadd.f32 %v1740_v16, %v1728_v14  ;;  %4899 = vmatprep.subr.mxu0 %v2078_v8 }
 0x1d6   : > { %v1530_v34 = vmax.f32 %v1522_v19, 0.0  ;;  %v1772_v37 = vmax.f32 %v1764_v20, 0.0  ;;  %4900 = vmatpush3.msra.mxu0 %v2078_v8 }
 0x1d7   : > { %v1521_v22 = vadd.f32 %v6267_v53, %v1506_v17  ;;  %v1763_v27 = vadd.f32 %v6269_v54, %v1748_v18  ;;  %v1387_v28 = vpop.permute.xlu1 %1386  ;;  %4901 = vmatprep.subr.mxu0 %v2077_v9 }
 0x1d8   : > { %v1404_v56 = vmul.f32 %v6243_v32, %v1387_v28  ;;  %v1710_v57 = vmul.f32 %v6246_v33, %v1387_v28  ;;  %4902 = vmatpush3.msra.mxu0 %v2077_v9 }
 0x1d9   : > { %v1529_v29 = vmax.f32 %v1521_v22, 0.0  ;;  %v1771_v30 = vmax.f32 %v1763_v27, 0.0  ;;  %4903 = vmatprep.subr.mxu0 %v2076_v10 }
 0x1da   : > { %4904 = vmatpush3.msra.mxu0 %v2076_v10  ;;  %v2075_v10 = vld [vmem:[%s6942_s18 + $0x18] sm:$0xff] }
 0x1db   : > { %4851 = vmatprep.mubr.msk.f32.mxu0 %vm1548_vm0, %v1529_v29  ;;  %4871 = vmatprep.mubr.msk.f32.mxu1 %vm1786_vm1, %v1771_v30 }
 0x1dc   : > { %v1432_v39 = vpop.permute.xlu1 %1431  ;;  %4852 = vmatmul.mubr.msk.f32.gmra.mxu0 %vm1548_vm0, %v1530_v34  ;;  %4872 = vmatmul.mubr.msk.f32.gmra.mxu1 %vm1786_vm1, %v1772_v37  ;;  %v4389_v37 = vld [vmem:[#allocation7] ss:$0 sm:$0xff] }
 0x1dd   : > { %v1448_v50 = vmul.f32 %v6250_v35, %v1432_v39  ;;  %v1722_v51 = vmul.f32 %v6253_v36, %v1432_v39  ;;  %4905 = vmatprep.subr.mxu0 %v2075_v10 }
 0x1de   : > { %4906 = vmatpush3.msra.mxu0 %v2075_v10  ;;  %v2387_v10 = vld [vmem:[%s6944_s11 + $0x58] sm:$0xff] }
 0x1df   : > { %v1456_v61 = vadd.f32 %v1448_v50, %v1404_v56  ;;  %v1730_v62 = vadd.f32 %v1722_v51, %v1710_v57 }
 0x1e0   : > { %v1436_v45 = vpop.permute.xlu1 %1435 }
 0x1e1   : > { %v1449_v46 = vmul.f32 %v6250_v35, %v1436_v45  ;;  %v1723_v47 = vmul.f32 %v6253_v36, %v1436_v45 }
 0x1e3   : > { %v1457_v52 = vadd.f32 %v1449_v46, %v1405_v41  ;;  %v1731_v55 = vadd.f32 %v1723_v47, %v1711_v42 }
 0x1e5   : > { %v1509_v58 = vadd.f32 %v1501_v48, %v1457_v52  ;;  %v1751_v59 = vadd.f32 %v1743_v49, %v1731_v55  ;;  %v1484_v60 = vpop.permute.xlu1 %1483 }
 0x1e6   : > { %v1500_v63 = vmul.f32 %v6259_v43, %v1484_v60  ;;  %v1742_v0 = vmul.f32 %v6261_v44, %v1484_v60  ;;  %v1927_v44 = vld [vmem:[%s6941_s15 + $0x18] sm:$0xff] }
 0x1e7   : > { %v1524_v36 = vadd.f32 %v6267_v53, %v1509_v58  ;;  %v1766_v2 = vadd.f32 %v6269_v54, %v1751_v59  ;;  %4877 = vmatprep.subr.mxu1 %v1927_v44 }
 0x1e8   : > { %v1508_v1 = vadd.f32 %v1500_v63, %v1456_v61  ;;  %v1750_v35 = vadd.f32 %v1742_v0, %v1730_v62  ;;  %4878 = vmatpush3.msra.mxu1 %v1927_v44 }
 0x1e9   : > { %v1532_v5 = vmax.f32 %v1524_v36, 0.0  ;;  %v1774_v43 = vmax.f32 %v1766_v2, 0.0 }
 0x1ea   : > { %v1523_v32 = vadd.f32 %v6267_v53, %v1508_v1  ;;  %v1765_v33 = vadd.f32 %v6269_v54, %v1750_v35  ;;  %v1926_v53 = vld [vmem:[%s6941_s15 + $0x10] sm:$0xff]  ;;  %v1925_v54 = vld [vmem:[%s6941_s15 + $0x8] sm:$0xff] }
 0x1eb   : > { %4879 = vmatprep.subr.mxu1 %v1926_v53 }
 0x1ec   : > { %v1531_v3 = vmax.f32 %v1523_v32, 0.0  ;;  %v1773_v4 = vmax.f32 %v1765_v33, 0.0  ;;  %4880 = vmatpush3.msra.mxu1 %v1926_v53 }
 0x1ed   : > { %4881 = vmatprep.subr.mxu1 %v1925_v54 }
 0x1ee   : > { %4854 = vmatprep.mubr.msk.f32.mxu0 %vm1548_vm0, %v1531_v3  ;;  %4874 = vmatprep.mubr.msk.f32.mxu1 %vm1786_vm1, %v1773_v4 }
 0x1ef   : > { %4855 = vmatmul.mubr.msk.f32.gmra.mxu0 %vm1548_vm0, %v1532_v5  ;;  %4875 = vmatmul.mubr.msk.f32.gmra.mxu1 %vm1786_vm1, %v1774_v43 }
 0x1f0   : > { %4882 = vmatpush3.msra.mxu1 %v1925_v54 }
 0x1f1   : > { %4883 = vmatprep.subr.mxu1 %v1924_v6 }
 0x1f2   : > { %4884 = vmatpush3.msra.mxu1 %v1924_v6 }
 0x27a   : > { %v4867_v12 = vpop.f32.mrf.mxu1  ;;  %v4847_v29 = vpop.f32.mrf.mxu0 }
 0x27b   : > { %v1883_v13 = vadd.f32 %v4867_v12, %v4399_v11  ;;  %v1645_v39 = vadd.f32 %v4847_v29, %v4389_v37  ;;  %v2073_v12 = vld [vmem:[%s6942_s18 + $0x8] sm:$0xff] }
 0x27c   : > { %v1877_v14 = vpop.f32.mrf.mxu1  ;;  %v1639_v30 = vpop.f32.mrf.mxu0 }
 0x27d   : > { %v1878_v15 = vadd.f32 %v4399_v11, %v1877_v14  ;;  %v1917_v17 = vmax.f32 %v1883_v13, 0.0  ;;  %v1640_v42 = vadd.f32 %v4389_v37, %v1639_v30  ;;  %v1679_v49 = vmax.f32 %v1645_v39, 0.0  ;;  %v2072_v13 = vld [vmem:[%s6942_s18] sm:$0xff]  ;;  %v2231_v14 = vld [vmem:[%s6943_s0 + $0x38] sm:$0xff] }
 0x27e   : > { %4925 = vmatprep.subr.mxu1 %v2231_v14 }
 0x27f   : > { %v1916_v16 = vmax.f32 %v1878_v15, 0.0  ;;  %v1678_v55 = vmax.f32 %v1640_v42, 0.0  ;;  %v2230_v15 = vld [vmem:[%s6943_s0 + $0x30] sm:$0xff] }
 0x281   : > { %4885 = vmatprep.mubr.msk.f32.mxu1 %vm1786_vm1, %v1916_v16  ;;  %v2229_v16 = vld [vmem:[%s6943_s0 + $0x28] sm:$0xff] }
 0x282   : > { %4886 = vmatmul.mubr.msk.f32.vlgmr.msra.gmra.mxu1 %vm1786_vm1, %v1917_v17  ;;  %v2228_v17 = vld [vmem:[%s6943_s0 + $0x20] sm:$0xff] }
 0x283   : > { %4926 = vmatpush3.msra.mxu1 %v2231_v14  ;;  %v2383_v14 = vld [vmem:[%s6944_s11 + $0x38] sm:$0xff] }
 0x284   : > { %4927 = vmatprep.subr.mxu1 %v2230_v15 }
 0x285   : > { %4928 = vmatpush3.msra.mxu1 %v2230_v15  ;;  %v4417_v15 = vld [vmem:[#allocation14] ss:$0 sm:$0xff] }
 0x286   : > { %4929 = vmatprep.subr.mxu1 %v2229_v16 }
 0x287   : > { %4930 = vmatpush3.msra.mxu1 %v2229_v16 }
 0x288   : > { %4931 = vmatprep.subr.mxu1 %v2228_v17 }
 0x289   : > { %v4870_v18 = vpop.f32.mrf.mxu1  ;;  %v4850_v34 = vpop.f32.mrf.mxu0  ;;  %4932 = vmatpush3.msra.mxu1 %v2228_v17 }
 0x28a   : > { %v1893_v19 = vadd.f32 %v4870_v18, %v4399_v11  ;;  %v1655_v62 = vadd.f32 %v4850_v34, %v4389_v37  ;;  %v4408_v18 = vld [vmem:[#allocation13] ss:$0 sm:$0xff] }
 0x28b   : > { %v1887_v20 = vpop.f32.mrf.mxu1  ;;  %v1649_v38 = vpop.f32.mrf.mxu0 }
 0x28c   : > { %v1888_v22 = vadd.f32 %v4399_v11, %v1887_v20  ;;  %v1919_v28 = vmax.f32 %v1893_v19, 0.0  ;;  %v1650_v1 = vadd.f32 %v4389_v37, %v1649_v38  ;;  %v1681_v33 = vmax.f32 %v1655_v62, 0.0  ;;  %v2406_v62 = vld [vmem:[%s6944_s11 + $0xf0] sm:$0xff] }
 0x28e   : > { %v1918_v27 = vmax.f32 %v1888_v22, 0.0  ;;  %v1680_v43 = vmax.f32 %v1650_v1, 0.0  ;;  %v2403_v1 = vld [vmem:[%s6944_s11 + $0xd8] sm:$0xff] }
 0x290   : > { %4888 = vmatprep.mubr.msk.f32.mxu1 %vm1786_vm1, %v1918_v27 }
 0x291   : > { %4889 = vmatmul.mubr.msk.f32.gmra.mxu1 %vm1786_vm1, %v1919_v28 }
 0x29c   : > { %v4853_v40 = vpop.f32.mrf.mxu0  ;;  %v4873_v41 = vpop.f32.mrf.mxu1 }
 0x29d   : > { %v1665_v45 = vadd.f32 %v4853_v40, %v4389_v37  ;;  %v1903_v46 = vadd.f32 %v4873_v41, %v4399_v11 }
 0x29e   : > { %v1659_v47 = vpop.f32.mrf.mxu0  ;;  %v1897_v48 = vpop.f32.mrf.mxu1 }
 0x29f   : > { %v1683_v50 = vmax.f32 %v1665_v45, 0.0  ;;  %v1660_v51 = vadd.f32 %v4389_v37, %v1659_v47  ;;  %v1898_v52 = vadd.f32 %v4399_v11, %v1897_v48  ;;  %v1921_v59 = vmax.f32 %v1903_v46, 0.0 }
 0x2a1   : > { %v1687_v56 = vmax.f32 %v1679_v49, %v1683_v50  ;;  %v1682_v57 = vmax.f32 %v1660_v51, 0.0  ;;  %v1920_v58 = vmax.f32 %v1898_v52, 0.0 }
 0x2a3   : > { %v1686_v60 = vmax.f32 %v1678_v55, %v1682_v57  ;;  %4891 = vmatprep.mubr.msk.f32.mxu1 %vm1786_vm1, %v1920_v58  ;;  %v2227_v57 = vld [vmem:[%s6943_s0 + $0x18] sm:$0xff]  ;;  %v2226_v58 = vld [vmem:[%s6943_s0 + $0x10] sm:$0xff] }
 0x2a4   : > { %4892 = vmatmul.mubr.msk.f32.gmra.mxu1 %vm1786_vm1, %v1921_v59  ;;  %4933 = vmatprep.subr.mxu1 %v2227_v57  ;;  %v2225_v59 = vld [vmem:[%s6943_s0 + $0x8] sm:$0xff] }
 0x2a5   : > { %v1690_v61 = vmax.f32 %v1686_v60, %v1687_v56  ;;  %4934 = vmatpush3.msra.mxu1 %v2227_v57  ;;  %v2224_v60 = vld [vmem:[%s6943_s0] sm:$0xff]  ;;  %v2379_v57 = vld [vmem:[%s6944_s11 + $0x18] sm:$0xff]  ;;  %s6952_s0 = sld [smem:[#allocation49_spill]] }
 0x2a6   : > { %4935 = vmatprep.subr.mxu1 %v2226_v58 }
 0x2a7   : > { %4936 = vmatpush3.msra.mxu1 %v2226_v58  ;;  %v2378_v58 = vld [vmem:[%s6944_s11 + $0x10] sm:$0xff] }
 0x2a8   : > { %4937 = vmatprep.subr.mxu1 %v2225_v59 }
 0x2a9   : > { %4938 = vmatpush3.msra.mxu1 %v2225_v59  ;;  %v2377_v59 = vld [vmem:[%s6944_s11 + $0x8] sm:$0xff] }
 0x2aa   : > { %4939 = vmatprep.subr.mxu1 %v2224_v60 }
 0x2ab   : > { %4940 = vmatpush3.msra.mxu1 %v2224_v60  ;;  %v2376_v60 = vld [vmem:[%s6944_s11] sm:$0xff] }
 0x2af   : > { %v4856_v63 = vpop.f32.mrf.mxu0  ;;  %v4876_v0 = vpop.f32.mrf.mxu1 }
 0x2b0   : > { %v1675_v35 = vadd.f32 %v4856_v63, %v4389_v37  ;;  %v1913_v36 = vadd.f32 %v4876_v0, %v4399_v11  ;;  %v2405_v63 = vld [vmem:[%s6944_s11 + $0xe8] sm:$0xff]  ;;  %v2404_v0 = vld [vmem:[%s6944_s11 + $0xe0] sm:$0xff] }
 0x2b1   : > { %v1669_v2 = vpop.f32.mrf.mxu0  ;;  %v1907_v32 = vpop.f32.mrf.mxu1 }
 0x2b2   : > { %v1685_v3 = vmax.f32 %v1675_v35, 0.0  ;;  %v1670_v4 = vadd.f32 %v4389_v37, %v1669_v2  ;;  %v1908_v5 = vadd.f32 %v4399_v11, %v1907_v32  ;;  %v1923_v6 = vmax.f32 %v1913_v36, 0.0  ;;  %v2074_v11 = vld [vmem:[%s6942_s18 + $0x10] sm:$0xff]  ;;  %v2401_v36 = vld [vmem:[%s6944_s11 + $0xc8] sm:$0xff]  ;;  %v2400_v2 = vld [vmem:[%s6944_s11 + $0xc0] sm:$0xff] }
 0x2b3   : > { %4907 = vmatprep.subr.mxu0 %v2074_v11  ;;  %v2402_v35 = vld [vmem:[%s6944_s11 + $0xd0] sm:$0xff]  ;;  %v2399_v32 = vld [vmem:[%s6944_s11 + $0xb8] sm:$0xff] }
 0x2b4   : > { %v1689_v44 = vmax.f32 %v1681_v33, %v1685_v3  ;;  %v1684_v53 = vmax.f32 %v1670_v4, 0.0  ;;  %v1922_v54 = vmax.f32 %v1908_v5, 0.0  ;;  %4908 = vmatpush3.msra.mxu0 %v2074_v11  ;;  %v2398_v33 = vld [vmem:[%s6944_s11 + $0xb0] sm:$0xff]  ;;  %v2397_v3 = vld [vmem:[%s6944_s11 + $0xa8] sm:$0xff]  ;;  %v2396_v4 = vld [vmem:[%s6944_s11 + $0xa0] sm:$0xff] }
 0x2b5   : > { %4909 = vmatprep.subr.mxu0 %v2073_v12  ;;  %v2395_v5 = vld [vmem:[%s6944_s11 + $0x98] sm:$0xff]  ;;  %v2386_v11 = vld [vmem:[%s6944_s11 + $0x50] sm:$0xff] }
 0x2b6   : > { %v1688_v7 = vmax.f32 %v1680_v43, %v1684_v53  ;;  %4894 = vmatprep.mubr.msk.f32.mxu1 %vm1786_vm1, %v1922_v54  ;;  %4910 = vmatpush3.msra.mxu0 %v2073_v12  ;;  %v2394_v43 = vld [vmem:[%s6944_s11 + $0x90] sm:$0xff]  ;;  %v2392_v53 = vld [vmem:[%s6944_s11 + $0x80] sm:$0xff]  ;;  %v2391_v54 = vld [vmem:[%s6944_s11 + $0x78] sm:$0xff] }
 0x2b7   : > { %4895 = vmatmul.mubr.msk.f32.gmra.mxu1 %vm1786_vm1, %v1923_v6  ;;  %4911 = vmatprep.subr.mxu0 %v2072_v13  ;;  %v2390_v6 = vld [vmem:[%s6944_s11 + $0x70] sm:$0xff]  ;;  %v2385_v12 = vld [vmem:[%s6944_s11 + $0x48] sm:$0xff] }
 0x2b8   : > { %v1691_v8 = vmax.f32 %v1688_v7, %v1689_v44  ;;  %4912 = vmatpush3.msra.mxu0 %v2072_v13  ;;  %v2393_v44 = vld [vmem:[%s6944_s11 + $0x88] sm:$0xff]  ;;  %v2384_v13 = vld [vmem:[%s6944_s11 + $0x40] sm:$0xff] }
 0x2b9   : > { %v2389_v7 = vld [vmem:[%s6944_s11 + $0x68] sm:$0xff] }
 0x2ba   : > { %v6359_v9 = vmax.f32 %v1690_v61, %v1691_v8  ;;  %v2407_v61 = vld [vmem:[%s6944_s11 + $0xf8] sm:$0xff]  ;;  %v2388_v8 = vld [vmem:[%s6944_s11 + $0x60] sm:$0xff] }
 0x2bb   : > { %2420 = vmatprep.subr.mxu0 %v2407_v61  ;;  %v5820_v61 = vmov 0.0  }
 0x342   : > { %v4887_v19 = vpop.f32.mrf.mxu1 }
 0x343   : > { %v2031_v20 = vadd.f32 %v4887_v19, %v4408_v18 }
 0x344   : > { %v2025_v22 = vpop.f32.mrf.mxu1 }
 0x345   : > { %v2026_v27 = vadd.f32 %v4408_v18, %v2025_v22  ;;  %v2065_v29 = vmax.f32 %v2031_v20, 0.0 }
 0x347   : > { %v2064_v28 = vmax.f32 %v2026_v27, 0.0 }
 0x349   : > { %4913 = vmatprep.mubr.msk.f32.mxu0 %vm1548_vm0, %v2064_v28 }
 0x34a   : > { %4914 = vmatmul.mubr.msk.f32.vlgmr.msra.gmra.mxu0 %vm1548_vm0, %v2065_v29 }
 0x34b   : > { %2421 = vmatpush1.msra.mxu0 %v2406_v62  ;;  %v2580_v62 = vld [vmem:[%s6945_s26 + $0xf8] sm:$0xff] }
 0x34c   : > { %2422 = vmatprep.subr.mxu0 %v2405_v63  ;;  %v2564_v63 = vld [vmem:[%s6945_s26 + $0x78] sm:$0xff]  ;;  %4550 = vmatprep.subr.mxu1 %v2580_v62 }
 0x34d   : > { %2423 = vmatpush1.msra.mxu0 %v2404_v0  ;;  %v2579_v0 = vld [vmem:[%s6945_s26 + $0xf0] sm:$0xff]  ;;  %v1347_v62 = vld [vmem:[%s6946_s16 + $0x18] sm:$0xff] }
 0x34e   : > { %2424 = vmatprep.subr.mxu0 %v2403_v1  ;;  %v2563_v1 = vld [vmem:[%s6945_s26 + $0x70] sm:$0xff] }
 0x34f   : > { %2425 = vmatpush1.msra.mxu0 %v2402_v35  ;;  %v2578_v35 = vld [vmem:[%s6945_s26 + $0xe8] sm:$0xff] }
 0x350   : > { %2426 = vmatprep.subr.mxu0 %v2401_v36  ;;  %v2562_v36 = vld [vmem:[%s6945_s26 + $0x68] sm:$0xff] }
 0x351   : > { %v4890_v30 = vpop.f32.mrf.mxu1  ;;  %2427 = vmatpush1.msra.mxu0 %v2400_v2  ;;  %v2577_v2 = vld [vmem:[%s6945_s26 + $0xe0] sm:$0xff] }
 0x352   : > { %v2041_v34 = vadd.f32 %v4890_v30, %v4408_v18  ;;  %2428 = vmatprep.subr.mxu0 %v2399_v32  ;;  %v2561_v32 = vld [vmem:[%s6945_s26 + $0x60] sm:$0xff] }
 0x353   : > { %v2035_v37 = vpop.f32.mrf.mxu1  ;;  %2429 = vmatpush1.msra.mxu0 %v2398_v33  ;;  %v2576_v33 = vld [vmem:[%s6945_s26 + $0xd8] sm:$0xff] }
 0x354   : > { %v2036_v38 = vadd.f32 %v4408_v18, %v2035_v37  ;;  %v2067_v40 = vmax.f32 %v2041_v34, 0.0  ;;  %2430 = vmatprep.subr.mxu0 %v2397_v3  ;;  %v2560_v3 = vld [vmem:[%s6945_s26 + $0x58] sm:$0xff] }
 0x355   : > { %2431 = vmatpush1.msra.mxu0 %v2396_v4  ;;  %v2575_v4 = vld [vmem:[%s6945_s26 + $0xd0] sm:$0xff] }
 0x356   : > { %v2066_v39 = vmax.f32 %v2036_v38, 0.0  ;;  %2432 = vmatprep.subr.mxu0 %v2395_v5  ;;  %v2559_v5 = vld [vmem:[%s6945_s26 + $0x50] sm:$0xff] }
 0x357   : > { %2433 = vmatpush1.msra.mxu0 %v2394_v43  ;;  %v2574_v43 = vld [vmem:[%s6945_s26 + $0xc8] sm:$0xff] }
 0x358   : > { %4916 = vmatprep.mubr.msk.f32.mxu0 %vm1548_vm0, %v2066_v39  ;;  %2434 = vmatprep.subr.mxu0 %v2393_v44  ;;  %v2558_v44 = vld [vmem:[%s6945_s26 + $0x48] sm:$0xff] }
 0x359   : > { %4917 = vmatmul.mubr.msk.f32.gmra.mxu0 %vm1548_vm0, %v2067_v40 }
 0x35a   : > { %2435 = vmatpush1.msra.mxu0 %v2392_v53  ;;  %v2573_v53 = vld [vmem:[%s6945_s26 + $0xc0] sm:$0xff] }
 0x35b   : > { %2436 = vmatprep.subr.mxu0 %v2391_v54  ;;  %v2557_v54 = vld [vmem:[%s6945_s26 + $0x40] sm:$0xff] }
 0x35c   : > { %2437 = vmatpush1.msra.mxu0 %v2390_v6  ;;  %v2572_v6 = vld [vmem:[%s6945_s26 + $0xb8] sm:$0xff] }
 0x35d   : > { %2438 = vmatprep.subr.mxu0 %v2389_v7  ;;  %v2556_v7 = vld [vmem:[%s6945_s26 + $0x38] sm:$0xff] }
 0x35e   : > { %2439 = vmatpush1.msra.mxu0 %v2388_v8  ;;  %v2571_v8 = vld [vmem:[%s6945_s26 + $0xb0] sm:$0xff] }
 0x35f   : > { %2440 = vmatprep.subr.mxu0 %v2387_v10  ;;  %v2555_v10 = vld [vmem:[%s6945_s26 + $0x30] sm:$0xff] }
 0x360   : > { %2441 = vmatpush1.msra.mxu0 %v2386_v11  ;;  %v2570_v11 = vld [vmem:[%s6945_s26 + $0xa8] sm:$0xff] }
 0x361   : > { %2442 = vmatprep.subr.mxu0 %v2385_v12  ;;  %v2554_v12 = vld [vmem:[%s6945_s26 + $0x28] sm:$0xff] }
 0x362   : > { %2443 = vmatpush1.msra.mxu0 %v2384_v13  ;;  %v2569_v13 = vld [vmem:[%s6945_s26 + $0xa0] sm:$0xff] }
 0x363   : > { %2444 = vmatprep.subr.mxu0 %v2383_v14  ;;  %v2553_v14 = vld [vmem:[%s6945_s26 + $0x20] sm:$0xff] }
 0x364   : > { %v4893_v41 = vpop.f32.mrf.mxu1 }
 0x365   : > { %v2051_v42 = vadd.f32 %v4893_v41, %v4408_v18 }
 0x366   : > { %v2045_v45 = vpop.f32.mrf.mxu1 }
 0x367   : > { %v2046_v46 = vadd.f32 %v4408_v18, %v2045_v45  ;;  %v2069_v48 = vmax.f32 %v2051_v42, 0.0 }
 0x369   : > { %v2068_v47 = vmax.f32 %v2046_v46, 0.0 }
 0x36b   : > { %4919 = vmatprep.mubr.msk.f32.mxu0 %vm1548_vm0, %v2068_v47 }
 0x36c   : > { %4920 = vmatmul.mubr.msk.f32.gmra.mxu0 %vm1548_vm0, %v2069_v48 }
 0x377   : > { %v4896_v49 = vpop.f32.mrf.mxu1 }
 0x378   : > { %v2061_v50 = vadd.f32 %v4896_v49, %v4408_v18 }
 0x379   : > { %v2055_v51 = vpop.f32.mrf.mxu1 }
 0x37a   : > { %v2056_v52 = vadd.f32 %v4408_v18, %v2055_v51  ;;  %v2071_v56 = vmax.f32 %v2061_v50, 0.0 }
 0x37c   : > { %v2070_v55 = vmax.f32 %v2056_v52, 0.0  ;;  %v2382_v52 = vld [vmem:[%s6944_s11 + $0x30] sm:$0xff] }
 0x37d   : > { %2445 = vmatpush1.msra.mxu0 %v2382_v52 }
 0x37e   : > { %4922 = vmatprep.mubr.msk.f32.mxu0 %vm1548_vm0, %v2070_v55  ;;  %v2381_v55 = vld [vmem:[%s6944_s11 + $0x28] sm:$0xff] }
 0x37f   : > { %4923 = vmatmul.mubr.msk.f32.gmra.mxu0 %vm1548_vm0, %v2071_v56  ;;  %2446 = vmatprep.subr.mxu0 %v2381_v55  ;;  %v2380_v56 = vld [vmem:[%s6944_s11 + $0x20] sm:$0xff] }
 0x380   : > { %2447 = vmatpush1.msra.mxu0 %v2380_v56  ;;  %2484 = vmatprep.mubr.f32.mxu0 %v5820_v61 }
 0x381   : > { %2448 = vmatprep.subr.mxu0 %v2379_v57 }
 0x382   : > { %2449 = vmatpush1.msra.mxu0 %v2378_v58  ;;  %v1344_v58 = vld [vmem:[%s6946_s16] sm:$0xff] }
 0x383   : > { %2450 = vmatprep.subr.mxu0 %v2377_v59  ;;  %v1345_v59 = vld [vmem:[%s6946_s16 + $0x8] sm:$0xff] }
 0x384   : > { %2451 = vmatpush1.msra.mxu0 %v2376_v60  ;;  %v1346_v60 = vld [vmem:[%s6946_s16 + $0x10] sm:$0xff] }
 0x385   : > { %4953 = vmatprep.subr.msk.mxu0 %vm2714_vm2, %v6214_v21 }
 0x40a   : > { %v4915_v16 = vpop.f32.mrf.mxu0 }
 0x40b   : > { %v2183_v17 = vadd.f32 %v4915_v16, %v4417_v15  ;;  %v4426_v16 = vld [vmem:[#allocation16] ss:$0 sm:$0xff] }
 0x40c   : > { %v2177_v18 = vpop.f32.mrf.mxu0 }
 0x40d   : > { %v2178_v19 = vadd.f32 %v4417_v15, %v2177_v18  ;;  %v2217_v22 = vmax.f32 %v2183_v17, 0.0 }
 0x40f   : > { %v2216_v20 = vmax.f32 %v2178_v19, 0.0 }
 0x411   : > { %4941 = vmatprep.mubr.msk.f32.mxu1 %vm1548_vm0, %v2216_v20 }
 0x412   : > { %4942 = vmatmul.mubr.msk.f32.vlgmr.msra.gmra.mxu1 %vm1548_vm0, %v2217_v22 }
 0x413   : > { %4551 = vmatpush3.msra.mxu1 %v2564_v63  ;;  %v1348_v63 = vld [vmem:[%s6946_s16 + $0x20] sm:$0xff] }
 0x414   : > { %4552 = vmatprep.subr.mxu1 %v2579_v0  ;;  %v2568_v0 = vld [vmem:[%s6945_s26 + $0x98] sm:$0xff] }
 0x415   : > { %4553 = vmatpush3.msra.mxu1 %v2563_v1  ;;  %v2552_v1 = vld [vmem:[%s6945_s26 + $0x18] sm:$0xff] }
 0x416   : > { %4554 = vmatprep.subr.mxu1 %v2578_v35  ;;  %v2567_v35 = vld [vmem:[%s6945_s26 + $0x90] sm:$0xff] }
 0x417   : > { %4555 = vmatpush3.msra.mxu1 %v2562_v36  ;;  %v1349_v36 = vld [vmem:[%s6946_s16 + $0x28] sm:$0xff] }
 0x418   : > { %4556 = vmatprep.subr.mxu1 %v2577_v2  ;;  %v2551_v2 = vld [vmem:[%s6945_s26 + $0x10] sm:$0xff] }
 0x419   : > { %v4918_v27 = vpop.f32.mrf.mxu0  ;;  %4557 = vmatpush3.msra.mxu1 %v2561_v32  ;;  %v1350_v32 = vld [vmem:[%s6946_s16 + $0x30] sm:$0xff] }
 0x41a   : > { %v2193_v28 = vadd.f32 %v4918_v27, %v4417_v15  ;;  %4558 = vmatprep.subr.mxu1 %v2576_v33  ;;  %v5329_v27 = vld [vmem:[%s6185_s3 + $0x28] sm:$0xff] }
 0x41b   : > { %v2187_v29 = vpop.f32.mrf.mxu0  ;;  %4559 = vmatpush3.msra.mxu1 %v2560_v3  ;;  %v2566_v33 = vld [vmem:[%s6945_s26 + $0x88] sm:$0xff] }
 0x41c   : > { %v2188_v30 = vadd.f32 %v4417_v15, %v2187_v29  ;;  %v2219_v37 = vmax.f32 %v2193_v28, 0.0  ;;  %4560 = vmatprep.subr.mxu1 %v2575_v4  ;;  %v2550_v3 = vld [vmem:[%s6945_s26 + $0x8] sm:$0xff]  ;;  %v2565_v4 = vld [vmem:[%s6945_s26 + $0x80] sm:$0xff] }
 0x41d   : > { %4561 = vmatpush3.msra.mxu1 %v2559_v5  ;;  %v1351_v5 = vld [vmem:[%s6946_s16 + $0x38] sm:$0xff] }
 0x41e   : > { %v2218_v34 = vmax.f32 %v2188_v30, 0.0  ;;  %4562 = vmatprep.subr.mxu1 %v2574_v43  ;;  %v2549_v43 = vld [vmem:[%s6945_s26] sm:$0xff] }
 0x41f   : > { %4563 = vmatpush3.msra.mxu1 %v2558_v44  ;;  %v2408_v44 = vld [vmem:[%s6947_s9] sm:$0x3]  ;;  %s6951_s9 = sld [smem:[#allocation47_spill]] }
 0x420   : > { %4944 = vmatprep.mubr.msk.f32.mxu1 %vm1548_vm0, %v2218_v34  ;;  %4564 = vmatprep.subr.mxu1 %v2573_v53  ;;  %v2413_v53 = vrot.slane %v2408_v44, %v6237_v26 }
 0x421   : > { %4945 = vmatmul.mubr.msk.f32.gmra.mxu1 %vm1548_vm0, %v2219_v37 }
 0x422   : > { %4565 = vmatpush3.msra.mxu1 %v2557_v54  ;;  %v2417_v54 = vrot.slane %v2408_v44, %v6240_v31 }
 0x423   : > { %4566 = vmatprep.subr.mxu1 %v2572_v6 }
 0x424   : > { %4567 = vmatpush3.msra.mxu1 %v2556_v7 }
 0x425   : > { %4568 = vmatprep.subr.mxu1 %v2571_v8 }
 0x426   : > { %4569 = vmatpush3.msra.mxu1 %v2555_v10 }
 0x427   : > { %4570 = vmatprep.subr.mxu1 %v2570_v11 }
 0x428   : > { %4571 = vmatpush3.msra.mxu1 %v2554_v12 }
 0x429   : > { %4572 = vmatprep.subr.mxu1 %v2569_v13 }
 0x42a   : > { %4573 = vmatpush3.msra.mxu1 %v2553_v14 }
 0x42b   : > { %4574 = vmatprep.subr.mxu1 %v2568_v0 }
 0x42c   : > { %v4921_v38 = vpop.f32.mrf.mxu0  ;;  %4575 = vmatpush3.msra.mxu1 %v2552_v1 }
 0x42d   : > { %v2203_v39 = vadd.f32 %v4921_v38, %v4417_v15  ;;  %v5331_v38 = vld [vmem:[%s6185_s3 + $0x18] sm:$0xff]  ;;  %4576 = vmatprep.subr.mxu1 %v2567_v35 }
 0x42e   : > { %v2197_v40 = vpop.f32.mrf.mxu0  ;;  %4577 = vmatpush3.msra.mxu1 %v2551_v2 }
 0x42f   : > { %v2198_v41 = vadd.f32 %v4417_v15, %v2197_v40  ;;  %v2221_v45 = vmax.f32 %v2203_v39, 0.0  ;;  %v5332_v39 = vld [vmem:[%s6185_s3 + $0x10] sm:$0xff]  ;;  %v5333_v40 = vld [vmem:[%s6185_s3 + $0x8] sm:$0xff]  ;;  %4578 = vmatprep.subr.mxu1 %v2566_v33 }
 0x430   : > { %4579 = vmatpush3.msra.mxu1 %v2550_v3 }
 0x431   : > { %v2220_v42 = vmax.f32 %v2198_v41, 0.0  ;;  %v5334_v41 = vld [vmem:[%s6185_s3] sm:$0xff]  ;;  %4580 = vmatprep.subr.mxu1 %v2565_v4 }
 0x432   : > { %4581 = vmatpush3.msra.mxu1 %v2549_v43 }
 0x433   : > { %4947 = vmatprep.mubr.msk.f32.mxu1 %vm1548_vm0, %v2220_v42 }
 0x434   : > { %4948 = vmatmul.mubr.msk.f32.gmra.mxu1 %vm1548_vm0, %v2221_v45 }
 0x43f   : > { %v4924_v46 = vpop.f32.mrf.mxu0 }
 0x440   : > { %v2213_v47 = vadd.f32 %v4924_v46, %v4417_v15 }
 0x441   : > { %v2207_v48 = vpop.f32.mrf.mxu0 }
 0x442   : > { %v2208_v49 = vadd.f32 %v4417_v15, %v2207_v48  ;;  %v2223_v51 = vmax.f32 %v2213_v47, 0.0 }
 0x444   : > { %v2222_v50 = vmax.f32 %v2208_v49, 0.0 }
 0x446   : > { %4950 = vmatprep.mubr.msk.f32.mxu1 %vm1548_vm0, %v2222_v50 }
 0x447   : > { %4951 = vmatmul.mubr.msk.f32.gmra.mxu1 %vm1548_vm0, %v2223_v51 }
 0x4d2   : > { %v4943_v15 = vpop.f32.mrf.mxu1 }
 0x4d3   : > { %v2335_v19 = vadd.f32 %v4943_v15, %v4426_v16 }
 0x4d4   : > { %v2329_v17 = vpop.f32.mrf.mxu1 }
 0x4d5   : > { %v2330_v18 = vadd.f32 %v4426_v16, %v2329_v17  ;;  %v2369_v22 = vmax.f32 %v2335_v19, 0.0 }
 0x4d7   : > { %v2368_v20 = vmax.f32 %v2330_v18, 0.0 }
 0x4d9   : > { %2485 = vmatmul.mubr.f32.vlgmr.msra.gmra.mxu0 %v2368_v20 }
 0x4da   : > { %2490 = vmatprep.mubr.f32.mxu0 %v5820_v61  ;;  %4954 = vmatpush3.xpose.msk.msra.mxu0 %vm2714_vm2, %v6214_v21  ;;  %v5330_v21 = vld [vmem:[%s6185_s3 + $0x20] sm:$0xff]  ;;  %s6950_s3 = sld [smem:[#allocation51_spill]] }
 0x4db   : > { %4955 = vmatprep.subr.msk.mxu0 %vm2714_vm2, %v6224_v23 }
 0x4dd   : > { %2491 = vmatmul.mubr.f32.gmra.mxu0 %v2369_v22 }
 0x4de   : > { %2496 = vmatprep.mubr.f32.mxu0 %v5820_v61  ;;  %4956 = vmatpush3.xpose.msk.msra.mxu0 %vm2714_vm2, %v6224_v23 }
 0x4df   : > { %4957 = vmatprep.subr.msk.mxu0 %vm2714_vm2, %v5329_v27 }
 0x4e1   : > { %v4946_v28 = vpop.f32.mrf.mxu1 }
 0x4e2   : > { %4958 = vmatpush3.xpose.msk.msra.mxu0 %vm2714_vm2, %v5329_v27  ;;  %v2345_v34 = vadd.f32 %v4946_v28, %v4426_v16 }
 0x4e3   : > { %v2339_v29 = vpop.f32.mrf.mxu1  ;;  %4959 = vmatprep.subr.msk.mxu0 %vm2714_vm2, %v5330_v21 }
 0x4e4   : > { %v2340_v30 = vadd.f32 %v4426_v16, %v2339_v29  ;;  %v2371_v23 = vmax.f32 %v2345_v34, 0.0 }
 0x4e6   : > { %v2370_v37 = vmax.f32 %v2340_v30, 0.0  ;;  %4960 = vmatpush3.xpose.msk.msra.mxu0 %vm2714_vm2, %v5330_v21 }
 0x4e7   : > { %4961 = vmatprep.subr.msk.mxu0 %vm2714_vm2, %v5331_v38 }
 0x4e8   : > { %2497 = vmatmul.mubr.f32.gmra.mxu0 %v2370_v37 }
 0x4e9   : > { %2502 = vmatprep.mubr.f32.mxu0 %v5820_v61 }
 0x4ea   : > { %4962 = vmatpush3.xpose.msk.msra.mxu0 %vm2714_vm2, %v5331_v38 }
 0x4eb   : > { %4963 = vmatprep.subr.msk.mxu0 %vm2714_vm2, %v5332_v39 }
 0x4ec   : > { %2503 = vmatmul.mubr.f32.gmra.mxu0 %v2371_v23 }
 0x4ed   : > { %2508 = vmatprep.mubr.f32.mxu0 %v5820_v61 }
 0x4ee   : > { %4964 = vmatpush3.xpose.msk.msra.mxu0 %vm2714_vm2, %v5332_v39 }
 0x4ef   : > { %4965 = vmatprep.subr.msk.mxu0 %vm2714_vm2, %v5333_v40 }
 0x4f2   : > { %4966 = vmatpush3.xpose.msk.msra.mxu0 %vm2714_vm2, %v5333_v40 }
 0x4f3   : > { %4967 = vmatprep.subr.msk.mxu0 %vm2714_vm2, %v5334_v41 }
 0x4f4   : > { %v4949_v42 = vpop.f32.mrf.mxu1 }
 0x4f5   : > { %v2355_v47 = vadd.f32 %v4949_v42, %v4426_v16 }
 0x4f6   : > { %v2349_v45 = vpop.f32.mrf.mxu1  ;;  %4968 = vmatpush3.xpose.msk.msra.mxu0 %vm2714_vm2, %v5334_v41 }
 0x4f7   : > { %v2350_v46 = vadd.f32 %v4426_v16, %v2349_v45  ;;  %v2373_v49 = vmax.f32 %v2355_v47, 0.0 }
 0x4f9   : > { %v2372_v48 = vmax.f32 %v2350_v46, 0.0 }
 0x4fb   : > { %2509 = vmatmul.mubr.f32.gmra.mxu0 %v2372_v48 }
 0x4fc   : > { %2514 = vmatprep.mubr.f32.mxu0 %v5820_v61 }
 0x4ff   : > { %2515 = vmatmul.mubr.f32.gmra.mxu0 %v2373_v49 }
 0x500   : > { %2520 = vmatprep.mubr.f32.mxu0 %v5820_v61 }
 0x507   : > { %v4952_v50 = vpop.f32.mrf.mxu1 }
 0x508   : > { %v2365_v55 = vadd.f32 %v4952_v50, %v4426_v16 }
 0x509   : > { %v2359_v51 = vpop.f32.mrf.mxu1 }
 0x50a   : > { %v2360_v52 = vadd.f32 %v4426_v16, %v2359_v51  ;;  %v2375_v57 = vmax.f32 %v2365_v55, 0.0 }
 0x50c   : > { %v2374_v56 = vmax.f32 %v2360_v52, 0.0 }
 0x50e   : > { %2521 = vmatmul.mubr.f32.gmra.mxu0 %v2374_v56 }
 0x50f   : > { %2526 = vmatprep.mubr.f32.mxu0 %v5820_v61 }
 0x512   : > { %2527 = vmatmul.mubr.f32.gmra.mxu0 %v2375_v57 }
 0x513   : > { %4969 = vmatprep.mubr.msk.f32.mxu0 %vm2714_vm2, %v1344_v58 }
 0x516   : > { %4970 = vmatmul.mubr.msk.f32.vlgmr.msra.gmra.mxu0 %vm2714_vm2, %v1345_v59 }
 0x517   : > { %4972 = vmatprep.mubr.msk.f32.mxu0 %vm2714_vm2, %v1346_v60 }
 0x51a   : > { %4973 = vmatmul.mubr.msk.f32.gmra.mxu0 %vm2714_vm2, %v1347_v62 }
 0x51b   : > { %4975 = vmatprep.mubr.msk.f32.mxu0 %vm2714_vm2, %v1348_v63 }
 0x51e   : > { %4976 = vmatmul.mubr.msk.f32.gmra.mxu0 %vm2714_vm2, %v1349_v36 }
 0x51f   : > { %4978 = vmatprep.mubr.msk.f32.mxu0 %vm2714_vm2, %v1350_v32 }
 0x522   : > { %4979 = vmatmul.mubr.msk.f32.gmra.mxu0 %vm2714_vm2, %v1351_v5 }
 0x599   : > { %v2486_v6 = vpop.f32.mrf.mxu0 }
 0x59a   : > { %v6506_v7 = vadd.f32 %v2486_v6, %v2413_v53 }
 0x59b   : > { %v2488_v8 = vpop.f32.mrf.mxu0 }
 0x59c   : > { %v6508_v10 = vadd.f32 %v2488_v8, %v2417_v54  ;;  %v2533_v13 = vmax.f32 %v6506_v7, 0.0 }
 0x59d   : > { %v2492_v11 = vpop.f32.mrf.mxu0 }
 0x59e   : > { %v2534_v12 = vmax.f32 %v6508_v10, 0.0  ;;  %v6512_v14 = vadd.f32 %v2492_v11, %v2413_v53 }
 0x59f   : > { %v2494_v15 = vpop.f32.mrf.mxu0 }
 0x5a0   : > { %v6514_v16 = vadd.f32 %v2494_v15, %v2417_v54  ;;  %2652 = vmatprep.mubr.f32.mxu1 %v2534_v12  ;;  %v2535_v18 = vmax.f32 %v6512_v14, 0.0  ;;  %v3036_v14 = vld [vmem:[%s6948_s7 + $0x78] sm:$0xff]  ;;  %v3051_v15 = vld [vmem:[%s6948_s7 + $0xf0] sm:$0xff] }
 0x5a1   : > { %2653 = vmatmul.mubr.f32.vlgmr.msra.gmra.mxu1 %v2533_v13 }
 0x5a2   : > { %v2536_v17 = vmax.f32 %v6514_v16, 0.0  ;;  %v3035_v16 = vld [vmem:[%s6948_s7 + $0x70] sm:$0xff] }
 0x5a4   : > { %2657 = vmatprep.mubr.f32.mxu1 %v2536_v17 }
 0x5a5   : > { %2658 = vmatmul.mubr.f32.gmra.mxu1 %v2535_v18 }
 0x5a8   : > { %v2498_v19 = vpop.f32.mrf.mxu0 }
 0x5a9   : > { %v2499_v20 = vadd.f32 %v2498_v19, %v2413_v53  ;;  %v3049_v19 = vld [vmem:[%s6948_s7 + $0xe0] sm:$0xff] }
 0x5aa   : > { %v2500_v22 = vpop.f32.mrf.mxu0 }
 0x5ab   : > { %v2501_v27 = vadd.f32 %v2500_v22, %v2417_v54  ;;  %v2537_v21 = vmax.f32 %v2499_v20, 0.0  ;;  %v3033_v20 = vld [vmem:[%s6948_s7 + $0x60] sm:$0xff]  ;;  %v3048_v22 = vld [vmem:[%s6948_s7 + $0xd8] sm:$0xff] }
 0x5ac   : > { %v2504_v28 = vpop.f32.mrf.mxu0 }
 0x5ad   : > { %v2538_v29 = vmax.f32 %v2501_v27, 0.0  ;;  %v2505_v30 = vadd.f32 %v2504_v28, %v2413_v53  ;;  %v3032_v27 = vld [vmem:[%s6948_s7 + $0x58] sm:$0xff]  ;;  %v3047_v28 = vld [vmem:[%s6948_s7 + $0xd0] sm:$0xff] }
 0x5ae   : > { %v2506_v34 = vpop.f32.mrf.mxu0 }
 0x5af   : > { %v2507_v37 = vadd.f32 %v2506_v34, %v2417_v54  ;;  %2662 = vmatprep.mubr.f32.mxu1 %v2538_v29  ;;  %v2539_v23 = vmax.f32 %v2505_v30, 0.0  ;;  %v3030_v30 = vld [vmem:[%s6948_s7 + $0x48] sm:$0xff]  ;;  %v3045_v34 = vld [vmem:[%s6948_s7 + $0xc0] sm:$0xff] }
 0x5b0   : > { %2663 = vmatmul.mubr.f32.gmra.mxu1 %v2537_v21 }
 0x5b1   : > { %v2540_v38 = vmax.f32 %v2507_v37, 0.0  ;;  %v3029_v37 = vld [vmem:[%s6948_s7 + $0x40] sm:$0xff] }
 0x5b3   : > { %2667 = vmatprep.mubr.f32.mxu1 %v2540_v38 }
 0x5b4   : > { %2668 = vmatmul.mubr.f32.gmra.mxu1 %v2539_v23 }
 0x5bb   : > { %v2510_v39 = vpop.f32.mrf.mxu0 }
 0x5bc   : > { %v2511_v40 = vadd.f32 %v2510_v39, %v2413_v53  ;;  %v3043_v39 = vld [vmem:[%s6948_s7 + $0xb0] sm:$0xff] }
 0x5bd   : > { %v2512_v41 = vpop.f32.mrf.mxu0 }
 0x5be   : > { %v2513_v42 = vadd.f32 %v2512_v41, %v2417_v54  ;;  %v2541_v47 = vmax.f32 %v2511_v40, 0.0  ;;  %v3027_v40 = vld [vmem:[%s6948_s7 + $0x30] sm:$0xff]  ;;  %v3042_v41 = vld [vmem:[%s6948_s7 + $0xa8] sm:$0xff] }
 0x5bf   : > { %v2516_v45 = vpop.f32.mrf.mxu0 }
 0x5c0   : > { %v2542_v46 = vmax.f32 %v2513_v42, 0.0  ;;  %v2517_v48 = vadd.f32 %v2516_v45, %v2413_v53  ;;  %v3026_v42 = vld [vmem:[%s6948_s7 + $0x28] sm:$0xff]  ;;  %v3041_v45 = vld [vmem:[%s6948_s7 + $0xa0] sm:$0xff] }
 0x5c1   : > { %v2518_v49 = vpop.f32.mrf.mxu0 }
 0x5c2   : > { %v2519_v50 = vadd.f32 %v2518_v49, %v2417_v54  ;;  %2672 = vmatprep.mubr.f32.mxu1 %v2542_v46  ;;  %v2543_v52 = vmax.f32 %v2517_v48, 0.0  ;;  %v3024_v48 = vld [vmem:[%s6948_s7 + $0x18] sm:$0xff]  ;;  %v3039_v49 = vld [vmem:[%s6948_s7 + $0x90] sm:$0xff] }
 0x5c3   : > { %2673 = vmatmul.mubr.f32.gmra.mxu1 %v2541_v47 }
 0x5c4   : > { %v2544_v51 = vmax.f32 %v2519_v50, 0.0  ;;  %v3023_v50 = vld [vmem:[%s6948_s7 + $0x10] sm:$0xff] }
 0x5c6   : > { %2677 = vmatprep.mubr.f32.mxu1 %v2544_v51 }
 0x5c7   : > { %2678 = vmatmul.mubr.f32.gmra.mxu1 %v2543_v52 }
 0x5ce   : > { %v2522_v55 = vpop.f32.mrf.mxu0 }
 0x5cf   : > { %v2523_v56 = vadd.f32 %v2522_v55, %v2413_v53  ;;  %v3037_v55 = vld [vmem:[%s6948_s7 + $0x80] sm:$0xff] }
 0x5d0   : > { %v2524_v57 = vpop.f32.mrf.mxu0 }
 0x5d1   : > { %v2525_v58 = vadd.f32 %v2524_v57, %v2417_v54  ;;  %v2545_v62 = vmax.f32 %v2523_v56, 0.0  ;;  %v3021_v56 = vld [vmem:[%s6948_s7] sm:$0xff]  ;;  %v3438_v57 = vld [vmem:[%s6949_s2 + $0xf8] sm:$0xff] }
 0x5d2   : > { %v2528_v59 = vpop.f32.mrf.mxu0 }
 0x5d3   : > { %v2546_v60 = vmax.f32 %v2525_v58, 0.0  ;;  %v2529_v63 = vadd.f32 %v2528_v59, %v2413_v53 }
 0x5d4   : > { %v2530_v0 = vpop.f32.mrf.mxu0 }
 0x5d5   : > { %v2531_v1 = vadd.f32 %v2530_v0, %v2417_v54  ;;  %2682 = vmatprep.mubr.f32.mxu1 %v2546_v60  ;;  %v2547_v36 = vmax.f32 %v2529_v63, 0.0 }
 0x5d6   : > { %2683 = vmatmul.mubr.f32.gmra.mxu1 %v2545_v62  ;;  %v4971_v2 = vpop.f32.mrf.mxu0 }
 0x5d7   : > { %v2548_v35 = vmax.f32 %v2531_v1, 0.0  ;;  %v2861_v4 = vmax.f32 %v4971_v2, 0.0 }
 0x5d8   : > { %v2821_v32 = vpop.f32.mrf.mxu0 }
 0x5d9   : > { %2687 = vmatprep.mubr.f32.mxu1 %v2548_v35  ;;  %2908 = vmatprep.subr.mxu1 %v2548_v35  ;;  %v2860_v33 = vmax.f32 %v2821_v32, 0.0 }
 0x5da   : > { %2688 = vmatmul.mubr.f32.gmra.mxu1 %v2547_v36  ;;  %v4974_v3 = vpop.f32.mrf.mxu0 }
 0x5db   : > { %2909 = vmatpush1.msra.mxu1 %v2547_v36  ;;  %2956 = vmatprep.mubr.f32.mxu1 %v5820_v61  ;;  %v2863_v53 = vmax.f32 %v4974_v3, 0.0 }
 0x5dc   : > { %2910 = vmatprep.subr.mxu1 %v2546_v60  ;;  %v2831_v5 = vpop.f32.mrf.mxu0 }
 0x5dd   : > { %2911 = vmatpush1.msra.mxu1 %v2545_v62  ;;  %v2862_v43 = vmax.f32 %v2831_v5, 0.0  ;;  %v4435_v5 = vld [vmem:[#allocation17] ss:$0 sm:$0xff] }
 0x5de   : > { %2912 = vmatprep.subr.mxu1 %v2544_v51  ;;  %v4977_v44 = vpop.f32.mrf.mxu0  ;;  %v3038_v51 = vld [vmem:[%s6948_s7 + $0x88] sm:$0xff] }
 0x5df   : > { %2913 = vmatpush1.msra.mxu1 %v2543_v52  ;;  %v2865_v8 = vmax.f32 %v4977_v44, 0.0  ;;  %v3022_v52 = vld [vmem:[%s6948_s7 + $0x8] sm:$0xff] }
 0x5e0   : > { %2914 = vmatprep.subr.mxu1 %v2542_v46  ;;  %v2841_v54 = vpop.f32.mrf.mxu0  ;;  %v3025_v46 = vld [vmem:[%s6948_s7 + $0x20] sm:$0xff] }
 0x5e1   : > { %2915 = vmatpush1.msra.mxu1 %v2541_v47  ;;  %v2864_v6 = vmax.f32 %v2841_v54, 0.0  ;;  %v3040_v47 = vld [vmem:[%s6948_s7 + $0x98] sm:$0xff] }
 0x5e2   : > { %2916 = vmatprep.subr.mxu1 %v2540_v38  ;;  %v4980_v7 = vpop.f32.mrf.mxu0  ;;  %v3044_v38 = vld [vmem:[%s6948_s7 + $0xb8] sm:$0xff] }
 0x5e3   : > { %2917 = vmatpush1.msra.mxu1 %v2539_v23  ;;  %v3028_v23 = vld [vmem:[%s6948_s7 + $0x38] sm:$0xff] }
 0x5e4   : > { %2918 = vmatprep.subr.mxu1 %v2538_v29  ;;  %v2851_v10 = vpop.f32.mrf.mxu0  ;;  %v3031_v29 = vld [vmem:[%s6948_s7 + $0x50] sm:$0xff] }
 0x5e5   : > { %2919 = vmatpush1.msra.mxu1 %v2537_v21  ;;  %v2866_v11 = vmax.f32 %v2851_v10, 0.0  ;;  %v3046_v21 = vld [vmem:[%s6948_s7 + $0xc8] sm:$0xff] }
 0x5e6   : > { %2920 = vmatprep.subr.mxu1 %v2536_v17  ;;  %v3050_v17 = vld [vmem:[%s6948_s7 + $0xe8] sm:$0xff] }
 0x5e7   : > { %2921 = vmatpush1.msra.mxu1 %v2535_v18  ;;  %v3034_v18 = vld [vmem:[%s6948_s7 + $0x68] sm:$0xff] }
 0x5e8   : > { %2922 = vmatprep.subr.mxu1 %v2534_v12  ;;  %v2867_v12 = vmax.f32 %v4980_v7, 0.0 }
 0x5e9   : > { %2923 = vmatpush1.msra.mxu1 %v2533_v13  ;;  %v3052_v13 = vld [vmem:[%s6948_s7 + $0xf8] sm:$0xff] }
 0x5ea   : > { %4452 = vmatmul.mubr.msk.f32.vlgmr.msra.gmra.mxu1 %vm1548_vm0, %v2860_v33  ;;  %4622 = vmatprep.subr.mxu0 %v3052_v13 }
 0x5eb   : > { %2962 = vmatprep.mubr.f32.mxu1 %v5820_v61  ;;  %4623 = vmatpush3.msra.mxu0 %v3036_v14 }
 0x5ec   : > { %4624 = vmatprep.subr.mxu0 %v3051_v15 }
 0x5ed   : > { %4625 = vmatpush3.msra.mxu0 %v3035_v16 }
 0x5ee   : > { %4453 = vmatmul.mubr.msk.f32.gmra.mxu1 %vm1548_vm0, %v2861_v4  ;;  %4626 = vmatprep.subr.mxu0 %v3050_v17 }
 0x5ef   : > { %2968 = vmatprep.mubr.f32.mxu1 %v5820_v61  ;;  %4627 = vmatpush3.msra.mxu0 %v3034_v18 }
 0x5f0   : > { %4628 = vmatprep.subr.mxu0 %v3049_v19 }
 0x5f1   : > { %4629 = vmatpush3.msra.mxu0 %v3033_v20 }
 0x5f2   : > { %4454 = vmatmul.mubr.msk.f32.gmra.mxu1 %vm1548_vm0, %v2862_v43  ;;  %4630 = vmatprep.subr.mxu0 %v3048_v22 }
 0x5f3   : > { %2974 = vmatprep.mubr.f32.mxu1 %v5820_v61  ;;  %4631 = vmatpush3.msra.mxu0 %v3032_v27 }
 0x5f4   : > { %4632 = vmatprep.subr.mxu0 %v3047_v28 }
 0x5f5   : > { %4633 = vmatpush3.msra.mxu0 %v3031_v29 }
 0x5f6   : > { %4455 = vmatmul.mubr.msk.f32.gmra.mxu1 %vm1548_vm0, %v2863_v53  ;;  %4634 = vmatprep.subr.mxu0 %v3046_v21 }
 0x5f7   : > { %2980 = vmatprep.mubr.f32.mxu1 %v5820_v61  ;;  %4635 = vmatpush3.msra.mxu0 %v3030_v30 }
 0x5f8   : > { %4636 = vmatprep.subr.mxu0 %v3045_v34 }
 0x5f9   : > { %4637 = vmatpush3.msra.mxu0 %v3029_v37 }
 0x5fa   : > { %4456 = vmatmul.mubr.msk.f32.gmra.mxu1 %vm1548_vm0, %v2864_v6  ;;  %4638 = vmatprep.subr.mxu0 %v3044_v38 }
 0x5fb   : > { %2986 = vmatprep.mubr.f32.mxu1 %v5820_v61  ;;  %4639 = vmatpush3.msra.mxu0 %v3028_v23 }
 0x5fc   : > { %4640 = vmatprep.subr.mxu0 %v3043_v39 }
 0x5fd   : > { %4641 = vmatpush3.msra.mxu0 %v3027_v40 }
 0x5fe   : > { %4457 = vmatmul.mubr.msk.f32.gmra.mxu1 %vm1548_vm0, %v2865_v8  ;;  %4642 = vmatprep.subr.mxu0 %v3042_v41 }
 0x5ff   : > { %2992 = vmatprep.mubr.f32.mxu1 %v5820_v61  ;;  %4643 = vmatpush3.msra.mxu0 %v3026_v42 }
 0x600   : > { %4644 = vmatprep.subr.mxu0 %v3041_v45 }
 0x601   : > { %4645 = vmatpush3.msra.mxu0 %v3025_v46 }
 0x602   : > { %4458 = vmatmul.mubr.msk.f32.gmra.mxu1 %vm1548_vm0, %v2866_v11  ;;  %4646 = vmatprep.subr.mxu0 %v3040_v47 }
 0x603   : > { %2998 = vmatprep.mubr.f32.mxu1 %v5820_v61  ;;  %4647 = vmatpush3.msra.mxu0 %v3024_v48 }
 0x604   : > { %4648 = vmatprep.subr.mxu0 %v3039_v49 }
 0x605   : > { %4649 = vmatpush3.msra.mxu0 %v3023_v50 }
 0x606   : > { %4459 = vmatmul.mubr.msk.f32.gmra.mxu1 %vm1548_vm0, %v2867_v12  ;;  %4650 = vmatprep.subr.mxu0 %v3038_v51  ;;  %v3422_v51 = vld [vmem:[%s6949_s2 + $0x78] sm:$0xff] }
 0x607   : > { %4651 = vmatpush3.msra.mxu0 %v3022_v52  ;;  %v3437_v52 = vld [vmem:[%s6949_s2 + $0xf0] sm:$0xff] }
 0x608   : > { %4652 = vmatprep.subr.mxu0 %v3037_v55 }
 0x609   : > { %4653 = vmatpush3.msra.mxu0 %v3021_v56  ;;  %v3421_v56 = vld [vmem:[%s6949_s2 + $0x70] sm:$0xff] }
 0x60a   : > { %4703 = vmatprep.subr.mxu0 %v3438_v57 }
 0x661   : > { %v4582_v58 = vpop.f32.mrf.mxu1 }
 0x663   : > { %v4583_v59 = vpop.f32.mrf.mxu1 }
 0x664   : > { %v4584_v60 = vadd.f32 %v4583_v59, %v4582_v58  ;;  %v3436_v58 = vld [vmem:[%s6949_s2 + $0xe8] sm:$0xff] }
 0x665   : > { %v4585_v62 = vpop.f32.mrf.mxu1 }
 0x666   : > { %v2655_v54 = vadd.f32 %v4584_v60, %v4435_v5 }
 0x667   : > { %v4586_v63 = vpop.f32.mrf.mxu1 }
 0x668   : > { %v4587_v0 = vadd.f32 %v4586_v63, %v4585_v62  ;;  %v2693_v11 = vmax.f32 %v2655_v54, 0.0  ;;  %v3420_v62 = vld [vmem:[%s6949_s2 + $0x68] sm:$0xff]  ;;  %v3435_v63 = vld [vmem:[%s6949_s2 + $0xe0] sm:$0xff] }
 0x66a   : > { %v2660_v6 = vadd.f32 %v4587_v0, %v4435_v5 }
 0x66c   : > { %v2694_v12 = vmax.f32 %v2660_v6, 0.0  ;;  %v3416_v6 = vld [vmem:[%s6949_s2 + $0x48] sm:$0xff] }
 0x670   : > { %v4588_v1 = vpop.f32.mrf.mxu1 }
 0x672   : > { %v4589_v35 = vpop.f32.mrf.mxu1 }
 0x673   : > { %v4590_v36 = vadd.f32 %v4589_v35, %v4588_v1  ;;  %v3419_v1 = vld [vmem:[%s6949_s2 + $0x60] sm:$0xff] }
 0x674   : > { %v4591_v2 = vpop.f32.mrf.mxu1 }
 0x675   : > { %v2665_v29 = vadd.f32 %v4590_v36, %v4435_v5  ;;  %v3434_v36 = vld [vmem:[%s6949_s2 + $0xd8] sm:$0xff] }
 0x676   : > { %v4592_v32 = vpop.f32.mrf.mxu1 }
 0x677   : > { %v4593_v19 = vadd.f32 %v4592_v32, %v4591_v2  ;;  %v2695_v38 = vmax.f32 %v2665_v29, 0.0  ;;  %v3427_v29 = vld [vmem:[%s6949_s2 + $0xa0] sm:$0xff] }
 0x679   : > { %v2670_v21 = vadd.f32 %v4593_v19, %v4435_v5 }
 0x67b   : > { %v2696_v23 = vmax.f32 %v2670_v21, 0.0 }
 0x683   : > { %v4594_v33 = vpop.f32.mrf.mxu1 }
 0x685   : > { %v4595_v3 = vpop.f32.mrf.mxu1 }
 0x686   : > { %v4596_v4 = vadd.f32 %v4595_v3, %v4594_v33  ;;  %v3418_v33 = vld [vmem:[%s6949_s2 + $0x58] sm:$0xff]  ;;  %v3433_v3 = vld [vmem:[%s6949_s2 + $0xd0] sm:$0xff] }
 0x687   : > { %v4597_v43 = vpop.f32.mrf.mxu1 }
 0x688   : > { %v2675_v44 = vadd.f32 %v4596_v4, %v4435_v5 }
 0x689   : > { %v4598_v53 = vpop.f32.mrf.mxu1 }
 0x68a   : > { %v4599_v7 = vadd.f32 %v4598_v53, %v4597_v43  ;;  %v2697_v8 = vmax.f32 %v2675_v44, 0.0  ;;  %v3432_v44 = vld [vmem:[%s6949_s2 + $0xc8] sm:$0xff] }
 0x68c   : > { %v2680_v10 = vadd.f32 %v4599_v7, %v4435_v5  ;;  %v2701_v14 = vmax.f32 %v2693_v11, %v2697_v8  ;;  %v3431_v7 = vld [vmem:[%s6949_s2 + $0xc0] sm:$0xff] }
 0x68e   : > { %v2698_v13 = vmax.f32 %v2680_v10, 0.0  ;;  %v3415_v10 = vld [vmem:[%s6949_s2 + $0x40] sm:$0xff] }
 0x690   : > { %v2702_v15 = vmax.f32 %v2694_v12, %v2698_v13  ;;  %v3430_v12 = vld [vmem:[%s6949_s2 + $0xb8] sm:$0xff] }
 0x692   : > { %v2705_v16 = vmax.f32 %v2701_v14, %v2702_v15  ;;  %v3414_v15 = vld [vmem:[%s6949_s2 + $0x38] sm:$0xff] }
 0x696   : > { %v4600_v17 = vpop.f32.mrf.mxu1 }
 0x698   : > { %v4601_v18 = vpop.f32.mrf.mxu1 }
 0x699   : > { %v4602_v20 = vadd.f32 %v4601_v18, %v4600_v17  ;;  %v3413_v18 = vld [vmem:[%s6949_s2 + $0x30] sm:$0xff] }
 0x69a   : > { %v4603_v22 = vpop.f32.mrf.mxu1 }
 0x69b   : > { %v2685_v27 = vadd.f32 %v4602_v20, %v4435_v5  ;;  %v3428_v20 = vld [vmem:[%s6949_s2 + $0xa8] sm:$0xff] }
 0x69c   : > { %v4604_v28 = vpop.f32.mrf.mxu1 }
 0x69d   : > { %v4605_v30 = vadd.f32 %v4604_v28, %v4603_v22  ;;  %v2699_v34 = vmax.f32 %v2685_v27, 0.0  ;;  %v3412_v28 = vld [vmem:[%s6949_s2 + $0x28] sm:$0xff] }
 0x69f   : > { %v2690_v37 = vadd.f32 %v4605_v30, %v4435_v5  ;;  %v2703_v40 = vmax.f32 %v2695_v38, %v2699_v34  ;;  %v3417_v5 = vld [vmem:[%s6949_s2 + $0x50] sm:$0xff]  ;;  %v3411_v30 = vld [vmem:[%s6949_s2 + $0x20] sm:$0xff] }
 0x6a1   : > { %v2700_v39 = vmax.f32 %v2690_v37, 0.0  ;;  %v3426_v37 = vld [vmem:[%s6949_s2 + $0x98] sm:$0xff] }
 0x6a3   : > { %v2704_v41 = vmax.f32 %v2696_v23, %v2700_v39  ;;  %v3410_v39 = vld [vmem:[%s6949_s2 + $0x18] sm:$0xff] }
 0x6a5   : > { %v2706_v42 = vmax.f32 %v2703_v40, %v2704_v41  ;;  %v3425_v40 = vld [vmem:[%s6949_s2 + $0x90] sm:$0xff] }
 0x6a7   : > { %v6583_v45 = vmax.f32 %v2705_v16, %v2706_v42  ;;  %v3429_v16 = vld [vmem:[%s6949_s2 + $0xb0] sm:$0xff] }
 0x6a8   : > { %v3409_v42 = vld [vmem:[%s6949_s2 + $0x10] sm:$0xff] }
 0x6aa   : > { %v2958_v46 = vpop.f32.mrf.mxu1 }
 0x6ab   : > { %v6587_v49 = vmul.f32 0.015625, %v2958_v46 }
 0x6ac   : > { %v2960_v47 = vpop.f32.mrf.mxu1 }
 0x6ad   : > { %v6585_v48 = vmul.f32 0.015625, %v2960_v47  ;;  %v3424_v47 = vld [vmem:[%s6949_s2 + $0x88] sm:$0xff] }
 0x6ae   : > { %v2964_v50 = vpop.f32.mrf.mxu1 }
 0x6af   : > { %3124 = vmatprep.mubr.f32.mxu0 %v6585_v48  ;;  %v6597_v59 = vmul.f32 0.015625, %v2964_v50 }
 0x6b0   : > { %v2966_v55 = vpop.f32.mrf.mxu1  ;;  %3125 = vmatmul.mubr.f32.vlgmr.msra.gmra.mxu0 %v6587_v49 }
 0x6b1   : > { %v6594_v57 = vmul.f32 0.015625, %v2966_v55  ;;  %4704 = vmatpush3.msra.mxu0 %v3422_v51  ;;  %v3408_v51 = vld [vmem:[%s6949_s2 + $0x8] sm:$0xff]  ;;  %v3407_v55 = vld [vmem:[%s6949_s2] sm:$0xff] }
 0x6b2   : > { %v2970_v60 = vpop.f32.mrf.mxu1  ;;  %4705 = vmatprep.subr.mxu0 %v3437_v52  ;;  %v3423_v52 = vld [vmem:[%s6949_s2 + $0x80] sm:$0xff]  ;;  %s6953_s2 = sld [smem:[#allocation36_spill]] }
 0x6b3   : > { %3129 = vmatprep.mubr.f32.mxu0 %v6594_v57  ;;  %4706 = vmatpush3.msra.mxu0 %v3421_v56  ;;  %v6607_v2 = vmul.f32 0.015625, %v2970_v60  ;;  %v3751_v56 = vld [vmem:[%s6950_s3 + $0xf8] sm:$0xff]  ;;  %v3750_v60 = vld [vmem:[%s6950_s3 + $0xf0] sm:$0xff] }
 0x6b4   : > { %v2972_v0 = vpop.f32.mrf.mxu1  ;;  %3130 = vmatmul.mubr.f32.gmra.mxu0 %v6597_v59  ;;  %4707 = vmatprep.subr.mxu0 %v3436_v58  ;;  %v3735_v58 = vld [vmem:[%s6950_s3 + $0x78] sm:$0xff] }
 0x6b5   : > { %v6604_v35 = vmul.f32 0.015625, %v2972_v0  ;;  %4708 = vmatpush3.msra.mxu0 %v3420_v62  ;;  %v3734_v62 = vld [vmem:[%s6950_s3 + $0x70] sm:$0xff]  ;;  %v3733_v0 = vld [vmem:[%s6950_s3 + $0x68] sm:$0xff] }
 0x6b6   : > { %v2976_v32 = vpop.f32.mrf.mxu1  ;;  %4709 = vmatprep.subr.mxu0 %v3435_v63  ;;  %v3749_v63 = vld [vmem:[%s6950_s3 + $0xe8] sm:$0xff] }
 0x6b7   : > { %3134 = vmatprep.mubr.f32.mxu0 %v6604_v35  ;;  %4710 = vmatpush3.msra.mxu0 %v3419_v1  ;;  %v6617_v53 = vmul.f32 0.015625, %v2976_v32  ;;  %v3732_v1 = vld [vmem:[%s6950_s3 + $0x60] sm:$0xff]  ;;  %v2708_v32 = vrot.slane %v6583_v45, 4 }
 0x6b8   : > { %v2978_v4 = vpop.f32.mrf.mxu1  ;;  %3135 = vmatmul.mubr.f32.gmra.mxu0 %v6607_v2  ;;  %4711 = vmatprep.subr.mxu0 %v3434_v36  ;;  %v3746_v36 = vld [vmem:[%s6950_s3 + $0xd0] sm:$0xff] }
 0x6b9   : > { %v6614_v43 = vmul.f32 0.015625, %v2978_v4  ;;  %4712 = vmatpush3.msra.mxu0 %v3418_v33  ;;  %v1693_v33 = vrot.slane %v6359_v9, 4  ;;  %v3744_v4 = vld [vmem:[%s6950_s3 + $0xc0] sm:$0xff] }
 0x6ba   : > { %v2982_v54 = vpop.f32.mrf.mxu1  ;;  %4713 = vmatprep.subr.mxu0 %v3433_v3  ;;  %v3729_v3 = vld [vmem:[%s6950_s3 + $0x48] sm:$0xff] }
 0x6bb   : > { %3139 = vmatprep.mubr.f32.mxu0 %v6614_v43  ;;  %4714 = vmatpush3.msra.mxu0 %v3417_v5  ;;  %v6627_v13 = vmul.f32 0.015625, %v2982_v54  ;;  %v2709_v5 = vmax.f32 %v6583_v45, %v2708_v32  ;;  %v3727_v54 = vld [vmem:[%s6950_s3 + $0x38] sm:$0xff]  ;;  %v3726_v45 = vld [vmem:[%s6950_s3 + $0x30] sm:$0xff] }
 0x6bc   : > { %v2984_v8 = vpop.f32.mrf.mxu1  ;;  %3140 = vmatmul.mubr.f32.gmra.mxu0 %v6617_v53  ;;  %4715 = vmatprep.subr.mxu0 %v3432_v44  ;;  %v1694_v44 = vmax.f32 %v6359_v9, %v1693_v33  ;;  %v3725_v9 = vld [vmem:[%s6950_s3 + $0x28] sm:$0xff] }
 0x6bd   : > { %v6624_v11 = vmul.f32 0.015625, %v2984_v8  ;;  %4716 = vmatpush3.msra.mxu0 %v3416_v6  ;;  %v3742_v6 = vld [vmem:[%s6950_s3 + $0xb0] sm:$0xff] }
 0x6be   : > { %v2988_v14 = vpop.f32.mrf.mxu1  ;;  %4717 = vmatprep.subr.mxu0 %v3431_v7  ;;  %v2710_v7 = vrot.slane %v2709_v5, 2  ;;  %v1695_v8 = vrot.slane %v1694_v44, 2 }
 0x6bf   : > { %3144 = vmatprep.mubr.f32.mxu0 %v6624_v11  ;;  %4718 = vmatpush3.msra.mxu0 %v3415_v10  ;;  %v6637_v22 = vmul.f32 0.015625, %v2988_v14  ;;  %v3740_v10 = vld [vmem:[%s6950_s3 + $0xa0] sm:$0xff] }
 0x6c0   : > { %v2990_v17 = vpop.f32.mrf.mxu1  ;;  %3145 = vmatmul.mubr.f32.gmra.mxu0 %v6627_v13  ;;  %4719 = vmatprep.subr.mxu0 %v3430_v12  ;;  %v3724_v12 = vld [vmem:[%s6950_s3 + $0x20] sm:$0xff]  ;;  %v1696_v14 = vmax.f32 %v1694_v44, %v1695_v8 }
 0x6c1   : > { %v6634_v19 = vmul.f32 0.015625, %v2990_v17  ;;  %4720 = vmatpush3.msra.mxu0 %v3414_v15  ;;  %v3723_v15 = vld [vmem:[%s6950_s3 + $0x18] sm:$0xff] }
 0x6c2   : > { %v2994_v27 = vpop.f32.mrf.mxu1  ;;  %4721 = vmatprep.subr.mxu0 %v3429_v16  ;;  %v3738_v16 = vld [vmem:[%s6950_s3 + $0x90] sm:$0xff] }
 0x6c3   : > { %3149 = vmatprep.mubr.f32.mxu0 %v6634_v19  ;;  %4722 = vmatpush3.msra.mxu0 %v3413_v18  ;;  %v6647_v38 = vmul.f32 0.015625, %v2994_v27  ;;  %v3722_v18 = vld [vmem:[%s6950_s3 + $0x10] sm:$0xff] }
 0x6c4   : > { %v2996_v21 = vpop.f32.mrf.mxu1  ;;  %3150 = vmatmul.mubr.f32.gmra.mxu0 %v6637_v22  ;;  %4723 = vmatprep.subr.mxu0 %v3428_v20  ;;  %v1697_v20 = vrot.slane %v1696_v14, 1 }
 0x6c5   : > { %v6644_v34 = vmul.f32 0.015625, %v2996_v21  ;;  %4724 = vmatpush3.msra.mxu0 %v3412_v28  ;;  %v3736_v28 = vld [vmem:[%s6950_s3 + $0x80] sm:$0xff]  ;;  %v3180_v21 = vld [vmem:[%s6951_s9 + $0x38] sm:$0xff] }
 0x6c6   : > { %v3000_v23 = vpop.f32.mrf.mxu1  ;;  %4725 = vmatprep.subr.mxu0 %v3427_v29  ;;  %v3720_v29 = vld [vmem:[%s6950_s3] sm:$0xff]  ;;  %4981 = vmatprep.subr.mxu1 %v3180_v21 }
 0x6c7   : > { %3154 = vmatprep.mubr.f32.mxu0 %v6644_v34  ;;  %4726 = vmatpush3.msra.mxu0 %v3411_v30  ;;  %v6657_v50 = vmul.f32 0.015625, %v3000_v23  ;;  %v1698_v30 = vmax.f32 %v1696_v14, %v1697_v20  ;;  %v3176_v23 = vld [vmem:[%s6951_s9 + $0x18] sm:$0xff] }
 0x6c8   : > { %v3002_v41 = vpop.f32.mrf.mxu1  ;;  %3155 = vmatmul.mubr.f32.gmra.mxu0 %v6647_v38  ;;  %4727 = vmatprep.subr.mxu0 %v3426_v37  ;;  %v3178_v37 = vld [vmem:[%s6951_s9 + $0x28] sm:$0xff] }
 0x6c9   : > { %v6654_v46 = vmul.f32 0.015625, %v3002_v41  ;;  %4728 = vmatpush3.msra.mxu0 %v3410_v39  ;;  %4982 = vmatpush3.msra.mxu1 %v3180_v21  ;;  %v3175_v39 = vld [vmem:[%s6951_s9 + $0x10] sm:$0xff]  ;;  %v3173_v41 = vld [vmem:[%s6951_s9] sm:$0xff] }
 0x6ca   : > { %4729 = vmatprep.subr.mxu0 %v3425_v40  ;;  %v3174_v40 = vld [vmem:[%s6951_s9 + $0x8] sm:$0xff] }
 0x6cb   : > { %3159 = vmatprep.mubr.f32.mxu0 %v6654_v46  ;;  %4730 = vmatpush3.msra.mxu0 %v3409_v42 }
 0x6cc   : > { %3160 = vmatmul.mubr.f32.gmra.mxu0 %v6657_v50  ;;  %4731 = vmatprep.subr.mxu0 %v3424_v47 }
 0x6cd   : > { %4732 = vmatpush3.msra.mxu0 %v3408_v51  ;;  %3510 = vmatprep.mubr.f32.mxu0 %v6585_v48  ;;  %v3748_v48 = vld [vmem:[%s6950_s3 + $0xe0] sm:$0xff] }
 0x6ce   : > { %4733 = vmatprep.subr.mxu0 %v3423_v52 }
 0x6cf   : > { %4734 = vmatpush3.msra.mxu0 %v3407_v55 }
 0x6d0   : > { %3511 = vmatmul.mubr.f32.vlgmr.msra.gmra.mxu0 %v6587_v49  ;;  %4777 = vmatprep.subr.mxu0 %v3751_v56  ;;  %v3747_v49 = vld [vmem:[%s6950_s3 + $0xd8] sm:$0xff] }
 0x6d1   : > { %3515 = vmatprep.mubr.f32.mxu0 %v6594_v57  ;;  %4778 = vmatpush3.msra.mxu0 %v3735_v58  ;;  %v3731_v57 = vld [vmem:[%s6950_s3 + $0x58] sm:$0xff] }
 0x6d2   : > { %4779 = vmatprep.subr.mxu0 %v3750_v60 }
 0x6d3   : > { %4780 = vmatpush3.msra.mxu0 %v3734_v62 }
 0x6d4   : > { %3516 = vmatmul.mubr.f32.gmra.mxu0 %v6597_v59  ;;  %4781 = vmatprep.subr.mxu0 %v3749_v63  ;;  %v3730_v59 = vld [vmem:[%s6950_s3 + $0x50] sm:$0xff] }
 0x6d5   : > { %3520 = vmatprep.mubr.f32.mxu0 %v6604_v35  ;;  %4782 = vmatpush3.msra.mxu0 %v3733_v0  ;;  %v3745_v35 = vld [vmem:[%s6950_s3 + $0xc8] sm:$0xff] }
 0x6d6   : > { %4783 = vmatprep.subr.mxu0 %v3748_v48 }
 0x6d7   : > { %4784 = vmatpush3.msra.mxu0 %v3732_v1 }
 0x6d8   : > { %3521 = vmatmul.mubr.f32.gmra.mxu0 %v6607_v2  ;;  %4785 = vmatprep.subr.mxu0 %v3747_v49  ;;  %v3728_v2 = vld [vmem:[%s6950_s3 + $0x40] sm:$0xff] }
 0x6d9   : > { %3525 = vmatprep.mubr.f32.mxu0 %v6614_v43  ;;  %4786 = vmatpush3.msra.mxu0 %v3731_v57  ;;  %v3743_v43 = vld [vmem:[%s6950_s3 + $0xb8] sm:$0xff] }
 0x6da   : > { %4787 = vmatprep.subr.mxu0 %v3746_v36 }
 0x6db   : > { %4788 = vmatpush3.msra.mxu0 %v3730_v59 }
 0x6dc   : > { %3526 = vmatmul.mubr.f32.gmra.mxu0 %v6617_v53  ;;  %4789 = vmatprep.subr.mxu0 %v3745_v35  ;;  %v3741_v53 = vld [vmem:[%s6950_s3 + $0xa8] sm:$0xff] }
 0x6dd   : > { %3530 = vmatprep.mubr.f32.mxu0 %v6624_v11  ;;  %4790 = vmatpush3.msra.mxu0 %v3729_v3  ;;  %v2711_v11 = vmax.f32 %v2709_v5, %v2710_v7 }
 0x6de   : > { %4791 = vmatprep.subr.mxu0 %v3744_v4 }
 0x6df   : > { %4792 = vmatpush3.msra.mxu0 %v3728_v2  ;;  %v2712_v17 = vrot.slane %v2711_v11, 1 }
 0x6e0   : > { %3531 = vmatmul.mubr.f32.gmra.mxu0 %v6627_v13  ;;  %4793 = vmatprep.subr.mxu0 %v3743_v43  ;;  %v3739_v13 = vld [vmem:[%s6950_s3 + $0x98] sm:$0xff] }
 0x6e1   : > { %3535 = vmatprep.mubr.f32.mxu0 %v6634_v19  ;;  %4794 = vmatpush3.msra.mxu0 %v3727_v54  ;;  %v3737_v19 = vld [vmem:[%s6950_s3 + $0x88] sm:$0xff]  ;;  %v2713_v27 = vmax.f32 %v2711_v11, %v2712_v17 }
 0x6e2   : > { %4795 = vmatprep.subr.mxu0 %v3742_v6 }
 0x6e3   : > { %4796 = vmatpush3.msra.mxu0 %v3726_v45 }
 0x6e4   : > { %3536 = vmatmul.mubr.f32.gmra.mxu0 %v6637_v22  ;;  %4797 = vmatprep.subr.mxu0 %v3741_v53  ;;  %v3721_v22 = vld [vmem:[%s6950_s3 + $0x8] sm:$0xff] }
 0x6e5   : > { %3540 = vmatprep.mubr.f32.mxu0 %v6644_v34  ;;  %4798 = vmatpush3.msra.mxu0 %v3725_v9  ;;  %v3179_v34 = vld [vmem:[%s6951_s9 + $0x30] sm:$0xff] }
 0x6e6   : > { %4799 = vmatprep.subr.mxu0 %v3740_v10  ;;  %4983 = vmatprep.subr.mxu1 %v3179_v34 }
 0x6e7   : > { %4800 = vmatpush3.msra.mxu0 %v3724_v12  ;;  %4984 = vmatpush3.msra.mxu1 %v3179_v34 }
 0x6e8   : > { %3541 = vmatmul.mubr.f32.gmra.mxu0 %v6647_v38  ;;  %4801 = vmatprep.subr.mxu0 %v3739_v13  ;;  %v3177_v38 = vld [vmem:[%s6951_s9 + $0x20] sm:$0xff] }
 0x6e9   : > { %3545 = vmatprep.mubr.f32.mxu0 %v6654_v46  ;;  %4802 = vmatpush3.msra.mxu0 %v3723_v15  ;;  %v4460_v46 = vld [vmem:[#allocation19] ss:$0 sm:$0xff] }
 0x6ea   : > { %4803 = vmatprep.subr.mxu0 %v3738_v16  ;;  %4985 = vmatprep.subr.mxu1 %v3178_v37 }
 0x6eb   : > { %4804 = vmatpush3.msra.mxu0 %v3722_v18  ;;  %4986 = vmatpush3.msra.mxu1 %v3178_v37 }
 0x6ec   : > { %3546 = vmatmul.mubr.f32.gmra.mxu0 %v6657_v50  ;;  %4805 = vmatprep.subr.mxu0 %v3737_v19 }
 0x6ed   : > { %4806 = vmatpush3.msra.mxu0 %v3721_v22  ;;  %3817 = vmatprep.mubr.f32.mxu0 %v2713_v27 }
 0x6ee   : > { %4807 = vmatprep.subr.mxu0 %v3736_v28  ;;  %4987 = vmatprep.subr.mxu1 %v3177_v38 }
 0x6ef   : > { %4808 = vmatpush3.msra.mxu0 %v3720_v29  ;;  %4988 = vmatpush3.msra.mxu1 %v3177_v38 }
 0x6f0   : > { %3818 = vmatmul.mubr.f32.vlgmr.msra.gmra.mxu0 %v1698_v30  ;;  %4989 = vmatprep.subr.mxu1 %v3176_v23 }
 0x6f1   : > { %4019 = vmatprep.mubr.f32.mxu0 %v5820_v61  ;;  %4990 = vmatpush3.msra.mxu1 %v3176_v23 }
 0x6f2   : > { %4991 = vmatprep.subr.mxu1 %v3175_v39 }
 0x6f3   : > { %4992 = vmatpush3.msra.mxu1 %v3175_v39 }
 0x6f4   : > { %4993 = vmatprep.subr.mxu1 %v3174_v40 }
 0x6f5   : > { %4994 = vmatpush3.msra.mxu1 %v3174_v40 }
 0x6f6   : > { %4995 = vmatprep.subr.mxu1 %v3173_v41 }
 0x6f7   : > { %4996 = vmatpush3.msra.mxu1 %v3173_v41 }
 0x6f8   : > { %5009 = vmatprep.subr.mxu1 %v5820_v61 }
 0x770   : > { %v4654_v42 = vpop.f32.mrf.mxu0 }
 0x772   : > { %v4655_v47 = vpop.f32.mrf.mxu0 }
 0x773   : > { %v4656_v50 = vadd.f32 %v4655_v47, %v4654_v42  ;;  %v4461_v47 = vld [vmem:[#allocation20] ss:$0 sm:$0xff] }
 0x774   : > { %v4657_v51 = vpop.f32.mrf.mxu0 }
 0x775   : > { %v3127_v52 = vadd.f32 %v4656_v50, %v4460_v46 }
 0x776   : > { %v4658_v55 = vpop.f32.mrf.mxu0 }
 0x777   : > { %v3165_v56 = vmax.f32 %v3127_v52, 0.0  ;;  %v4659_v58 = vadd.f32 %v4658_v55, %v4657_v51 }
 0x778   : > { %v4660_v60 = vpop.f32.mrf.mxu0 }
 0x779   : > { %v3132_v62 = vadd.f32 %v4659_v58, %v4460_v46  ;;  %4997 = vmatprep.mubr.msk.f32.mxu1 %vm1548_vm0, %v3165_v56 }
 0x77a   : > { %v4661_v63 = vpop.f32.mrf.mxu0 }
 0x77b   : > { %v3166_v0 = vmax.f32 %v3132_v62, 0.0  ;;  %v4662_v48 = vadd.f32 %v4661_v63, %v4660_v60 }
 0x77c   : > { %v4663_v1 = vpop.f32.mrf.mxu0 }
 0x77d   : > { %v3137_v49 = vadd.f32 %v4662_v48, %v4460_v46  ;;  %4998 = vmatmul.mubr.msk.f32.vlgmr.msra.gmra.mxu1 %vm1548_vm0, %v3166_v0 }
 0x77e   : > { %v4664_v57 = vpop.f32.mrf.mxu0 }
 0x77f   : > { %v3167_v36 = vmax.f32 %v3137_v49, 0.0  ;;  %v4665_v32 = vadd.f32 %v4664_v57, %v4663_v1  ;;  %v4471_v49 = vld [vmem:[%s6952_s0] ss:$0 sm:$0xff]  ;;  %s6954_s0 = sld [smem:[#allocation50_spill]] }
 0x780   : > { %v4666_v59 = vpop.f32.mrf.mxu0 }
 0x781   : > { %v3142_v35 = vadd.f32 %v4665_v32, %v4460_v46  ;;  %5000 = vmatprep.mubr.msk.f32.mxu1 %vm1548_vm0, %v3167_v36 }
 0x782   : > { %v4667_v33 = vpop.f32.mrf.mxu0 }
 0x783   : > { %v3168_v3 = vmax.f32 %v3142_v35, 0.0  ;;  %v4668_v4 = vadd.f32 %v4667_v33, %v4666_v59 }
 0x784   : > { %v4669_v5 = vpop.f32.mrf.mxu0 }
 0x785   : > { %v3147_v2 = vadd.f32 %v4668_v4, %v4460_v46  ;;  %5001 = vmatmul.mubr.msk.f32.gmra.mxu1 %vm1548_vm0, %v3168_v3  ;;  %v1352_v3 = vld [vmem:[%s6953_s2] sm:$0x7]  ;;  %s6955_s2 = sld [smem:[#allocation52_spill]] }
 0x786   : > { %v4670_v43 = vpop.f32.mrf.mxu0 }
 0x787   : > { %v3169_v44 = vmax.f32 %v3147_v2, 0.0  ;;  %v4671_v54 = vadd.f32 %v4670_v43, %v4669_v5 }
 0x788   : > { %v4672_v6 = vpop.f32.mrf.mxu0 }
 0x789   : > { %v3152_v7 = vadd.f32 %v4671_v54, %v4460_v46  ;;  %5003 = vmatprep.mubr.msk.f32.mxu1 %vm1548_vm0, %v3169_v44 }
 0x78a   : > { %v4673_v45 = vpop.f32.mrf.mxu0 }
 0x78b   : > { %v3170_v53 = vmax.f32 %v3152_v7, 0.0  ;;  %v4674_v8 = vadd.f32 %v4673_v45, %v4672_v6 }
 0x78c   : > { %v4675_v9 = vpop.f32.mrf.mxu0 }
 0x78d   : > { %v3157_v10 = vadd.f32 %v4674_v8, %v4460_v46  ;;  %5004 = vmatmul.mubr.msk.f32.gmra.mxu1 %vm1548_vm0, %v3170_v53 }
 0x78e   : > { %v4676_v11 = vpop.f32.mrf.mxu0 }
 0x78f   : > { %v3171_v12 = vmax.f32 %v3157_v10, 0.0  ;;  %v4677_v13 = vadd.f32 %v4676_v11, %v4675_v9 }
 0x790   : > { %v6736_v16 = vpop.f32.mrf.mxu0 }
 0x791   : > { %v3162_v14 = vadd.f32 %v4677_v13, %v4460_v46  ;;  %5006 = vmatprep.mubr.msk.f32.mxu1 %vm1548_vm0, %v3171_v12 }
 0x792   : > { %v6738_v17 = vpop.f32.mrf.mxu0 }
 0x793   : > { %v3172_v15 = vmax.f32 %v3162_v14, 0.0  ;;  %v4737_v53 = vadd.f32 %v6738_v17, %v6736_v16  ;;  %v3637_v16 = vld [vmem:[%s6954_s0 + $0x38] sm:$0xff]  ;;  %v3636_v17 = vld [vmem:[%s6954_s0 + $0x30] sm:$0xff] }
 0x794   : > { %v6740_v18 = vpop.f32.mrf.mxu0 }
 0x795   : > { %5007 = vmatmul.mubr.msk.f32.gmra.mxu1 %vm1548_vm0, %v3172_v15  ;;  %v3513_v12 = vadd.f32 %v4737_v53, %v4471_v49 }
 0x796   : > { %5025 = vmatprep.mubr.msk.f32.mxu1 %vm5821_vm3, %v5820_v61  ;;  %v6742_v19 = vpop.f32.mrf.mxu0 }
 0x797   : > { %v4740_v6 = vadd.f32 %v6742_v19, %v6740_v18  ;;  %v3551_v15 = vmax.f32 %v3513_v12, 0.0  ;;  %v3635_v18 = vld [vmem:[%s6954_s0 + $0x28] sm:$0xff]  ;;  %v3634_v19 = vld [vmem:[%s6954_s0 + $0x20] sm:$0xff] }
 0x798   : > { %v4741_v20 = vpop.f32.mrf.mxu0 }
 0x799   : > { %v3518_v10 = vadd.f32 %v4740_v6, %v4471_v49 }
 0x79a   : > { %v4742_v22 = vpop.f32.mrf.mxu0 }
 0x79b   : > { %v4743_v43 = vadd.f32 %v4742_v22, %v4741_v20  ;;  %v3552_v14 = vmax.f32 %v3518_v10, 0.0  ;;  %v3633_v20 = vld [vmem:[%s6954_s0 + $0x18] sm:$0xff]  ;;  %v3632_v22 = vld [vmem:[%s6954_s0 + $0x10] sm:$0xff] }
 0x79c   : > { %v4744_v27 = vpop.f32.mrf.mxu0 }
 0x79d   : > { %v3523_v8 = vadd.f32 %v4743_v43, %v4471_v49 }
 0x79e   : > { %v4745_v28 = vpop.f32.mrf.mxu0 }
 0x79f   : > { %v4746_v4 = vadd.f32 %v4745_v28, %v4744_v27  ;;  %v3553_v13 = vmax.f32 %v3523_v8, 0.0  ;;  %v3631_v27 = vld [vmem:[%s6954_s0 + $0x8] sm:$0xff]  ;;  %v3630_v28 = vld [vmem:[%s6954_s0] sm:$0xff]  ;;  %s6956_s0 = sld [smem:[#allocation53_spill]] }
 0x7a0   : > { %v4747_v29 = vpop.f32.mrf.mxu0 }
 0x7a1   : > { %v3528_v7 = vadd.f32 %v4746_v4, %v4471_v49 }
 0x7a2   : > { %v4748_v21 = vpop.f32.mrf.mxu0 }
 0x7a3   : > { %v4749_v59 = vadd.f32 %v4748_v21, %v4747_v29  ;;  %v3554_v11 = vmax.f32 %v3528_v7, 0.0 }
 0x7a4   : > { %v4750_v34 = vpop.f32.mrf.mxu0 }
 0x7a5   : > { %v3533_v44 = vadd.f32 %v4749_v59, %v4471_v49  ;;  %v3939_v4 = vld [vmem:[%s6956_s0 + $0xe0] sm:$0xff]  ;;  %v3936_v43 = vld [vmem:[%s6956_s0 + $0xc8] sm:$0xff]  ;;  %v3929_v53 = vld [vmem:[%s6956_s0 + $0x90] sm:$0xff] }
 0x7a6   : > { %v4751_v23 = vpop.f32.mrf.mxu0  ;;  %v3932_v6 = vld [vmem:[%s6956_s0 + $0xa8] sm:$0xff]  ;;  %v3931_v7 = vld [vmem:[%s6956_s0 + $0xa0] sm:$0xff]  ;;  %v3926_v10 = vld [vmem:[%s6956_s0 + $0x78] sm:$0xff] }
 0x7a7   : > { %v4752_v57 = vadd.f32 %v4751_v23, %v4750_v34  ;;  %v3555_v9 = vmax.f32 %v3533_v44, 0.0  ;;  %v3934_v44 = vld [vmem:[%s6956_s0 + $0xb8] sm:$0xff]  ;;  %v3928_v8 = vld [vmem:[%s6956_s0 + $0x88] sm:$0xff] }
 0x7a8   : > { %v4753_v40 = vpop.f32.mrf.mxu0  ;;  %v3924_v12 = vld [vmem:[%s6956_s0 + $0x68] sm:$0xff] }
 0x7a9   : > { %v3538_v5 = vadd.f32 %v4752_v57, %v4471_v49 }
 0x7aa   : > { %v4754_v42 = vpop.f32.mrf.mxu0 }
 0x7ab   : > { %v4755_v48 = vadd.f32 %v4754_v42, %v4753_v40  ;;  %v3556_v45 = vmax.f32 %v3538_v5, 0.0  ;;  %v3837_v42 = vld [vmem:[%s6955_s2 + $0x68] sm:$0xff]  ;;  %v3938_v5 = vld [vmem:[%s6956_s0 + $0xd8] sm:$0xff] }
 0x7ac   : > { %v4756_v52 = vpop.f32.mrf.mxu0 }
 0x7ad   : > { %v3543_v35 = vadd.f32 %v4755_v48, %v4471_v49  ;;  %v3827_v48 = vld [vmem:[%s6955_s2 + $0x18] sm:$0xff] }
 0x7ae   : > { %v4757_v60 = vpop.f32.mrf.mxu0 }
 0x7af   : > { %v4758_v63 = vadd.f32 %v4757_v60, %v4756_v52  ;;  %v3557_v54 = vmax.f32 %v3543_v35, 0.0  ;;  %v3832_v52 = vld [vmem:[%s6955_s2 + $0x40] sm:$0xff]  ;;  %v3829_v60 = vld [vmem:[%s6955_s2 + $0x28] sm:$0xff]  ;;  %v3942_v35 = vld [vmem:[%s6956_s0 + $0xf8] sm:$0xff] }
 0x7b0   : > { %3955 = vmatprep.subr.mxu0 %v3942_v35 }
 0x7b1   : > { %v3548_v36 = vadd.f32 %v4758_v63, %v4471_v49  ;;  %v3828_v63 = vld [vmem:[%s6955_s2 + $0x20] sm:$0xff]  ;;  %v3826_v49 = vld [vmem:[%s6955_s2 + $0x10] sm:$0xff] }
 0x7b3   : > { %v3558_v2 = vmax.f32 %v3548_v36, 0.0  ;;  %v3825_v36 = vld [vmem:[%s6955_s2 + $0x8] sm:$0xff] }
 0x83d   : > { %v4999_v30 = vpop.f32.mrf.mxu1 }
 0x83e   : > { %v3284_v32 = vadd.f32 %v4999_v30, %v4461_v47 }
 0x83f   : > { %v3278_v37 = vpop.f32.mrf.mxu1 }
 0x840   : > { %v3279_v33 = vadd.f32 %v4461_v47, %v3278_v37 }
 0x845   : > { %v5002_v38 = vpop.f32.mrf.mxu1 }
 0x846   : > { %v3294_v0 = vadd.f32 %v5002_v38, %v4461_v47 }
 0x847   : > { %v3288_v39 = vpop.f32.mrf.mxu1 }
 0x848   : > { %v3289_v1 = vadd.f32 %v4461_v47, %v3288_v39  ;;  %v3839_v39 = vld [vmem:[%s6955_s2 + $0x78] sm:$0xff] }
 0x84d   : > { %v5005_v41 = vpop.f32.mrf.mxu1 }
 0x84e   : > { %v3304_v58 = vadd.f32 %v5005_v41, %v4461_v47  ;;  %v3838_v41 = vld [vmem:[%s6955_s2 + $0x70] sm:$0xff] }
 0x84f   : > { %v3298_v46 = vpop.f32.mrf.mxu1 }
 0x850   : > { %v3299_v62 = vadd.f32 %v4461_v47, %v3298_v46  ;;  %v3836_v46 = vld [vmem:[%s6955_s2 + $0x60] sm:$0xff] }
 0x855   : > { %v5008_v50 = vpop.f32.mrf.mxu1 }
 0x856   : > { %v3314_v51 = vadd.f32 %v5008_v50, %v4461_v47  ;;  %v3834_v50 = vld [vmem:[%s6955_s2 + $0x50] sm:$0xff] }
 0x857   : > { %v3308_v55 = vpop.f32.mrf.mxu1 }
 0x858   : > { %v3309_v56 = vadd.f32 %v4461_v47, %v3308_v55  ;;  %5010 = vmatpush3.msra.mxu1 %v3314_v51  ;;  %v3835_v47 = vld [vmem:[%s6955_s2 + $0x58] sm:$0xff]  ;;  %v3833_v51 = vld [vmem:[%s6955_s2 + $0x48] sm:$0xff] }
 0x859   : > { %5011 = vmatprep.subr.mxu1 %v5820_v61  ;;  %v3831_v55 = vld [vmem:[%s6955_s2 + $0x38] sm:$0xff] }
 0x85a   : > { %5012 = vmatpush3.msra.mxu1 %v3309_v56  ;;  %v4809_v56 = vpop.f32.mrf.mxu0 }
 0x85b   : > { %5013 = vmatprep.subr.mxu1 %v5820_v61 }
 0x85c   : > { %5014 = vmatpush3.msra.mxu1 %v3304_v58  ;;  %v3830_v58 = vld [vmem:[%s6955_s2 + $0x30] sm:$0xff] }
 0x85d   : > { %5015 = vmatprep.subr.mxu1 %v5820_v61 }
 0x85e   : > { %5016 = vmatpush3.msra.mxu1 %v3299_v62  ;;  %v4810_v62 = vpop.f32.mrf.mxu0 }
 0x85f   : > { %5017 = vmatprep.subr.mxu1 %v5820_v61 }
 0x860   : > { %5018 = vmatpush3.msra.mxu1 %v3294_v0  ;;  %v4811_v0 = vadd.f32 %v4810_v62, %v4809_v56  ;;  %v3943_v62 = vld [vmem:[#allocation25] sm:$0x3] }
 0x861   : > { %5019 = vmatprep.subr.mxu1 %v5820_v61 }
 0x862   : > { %5020 = vmatpush3.msra.mxu1 %v3289_v1  ;;  %v3752_v1 = vld [vmem:[#allocation22] sm:$0x1] }
 0x863   : > { %5021 = vmatprep.subr.mxu1 %v5820_v61  ;;  %v3820_v57 = vadd.f32 %v4811_v0, %v3752_v1 }
 0x864   : > { %5022 = vmatpush3.msra.mxu1 %v3284_v32  ;;  %v3824_v32 = vld [vmem:[%s6955_s2] sm:$0xff]  ;;  %s4385_s2 = sshll.u32 %s6958_s4, 2 }
 0x865   : > { %5023 = vmatprep.subr.mxu1 %v5820_v61  ;;  %v3823_v59 = vmax.f32 %v3820_v57, 0.0  ;;  %s1327_s3 = scalar_lea.vmem %s6004_s22, %s4385_s2  ;;  %v5822_v57 = vmov 1966171168  }
 0x866   : > { %5024 = vmatpush3.msra.mxu1 %v3279_v33  ;;  %v3941_v33 = vld [vmem:[%s6956_s0 + $0xf0] sm:$0xff] }
 0x867   : > { %5026 = vmatmul.mubr.msk.f32.vlgmr.msra.gmra.mxu1 %vm1548_vm0, %v1352_v3  ;;  %5028 = vmatprep.subr.mxu1 %v5820_v61 }
 0x868   : > { %5029 = vmatpush3.msra.mxu1 %v3558_v2  ;;  %5044 = vmatprep.mubr.msk.f32.mxu1 %vm5821_vm3, %v5820_v61  ;;  %v3937_v2 = vld [vmem:[%s6956_s0 + $0xd0] sm:$0xff] }
 0x869   : > { %5030 = vmatprep.subr.mxu1 %v5820_v61  ;;  %3956 = vmatpush1.msra.mxu0 %v3941_v33 }
 0x86a   : > { %5031 = vmatpush3.msra.mxu1 %v3557_v54  ;;  %v3933_v54 = vld [vmem:[%s6956_s0 + $0xb0] sm:$0xff] }
 0x86b   : > { %5032 = vmatprep.subr.mxu1 %v5820_v61 }
 0x86c   : > { %5033 = vmatpush3.msra.mxu1 %v3556_v45  ;;  %v3930_v45 = vld [vmem:[%s6956_s0 + $0x98] sm:$0xff] }
 0x86d   : > { %5034 = vmatprep.subr.mxu1 %v5820_v61 }
 0x86e   : > { %5035 = vmatpush3.msra.mxu1 %v3555_v9  ;;  %v3927_v9 = vld [vmem:[%s6956_s0 + $0x80] sm:$0xff] }
 0x86f   : > { %5036 = vmatprep.subr.mxu1 %v5820_v61 }
 0x870   : > { %5037 = vmatpush3.msra.mxu1 %v3554_v11  ;;  %v3925_v11 = vld [vmem:[%s6956_s0 + $0x70] sm:$0xff] }
 0x871   : > { %5038 = vmatprep.subr.mxu1 %v5820_v61 }
 0x872   : > { %5039 = vmatpush3.msra.mxu1 %v3553_v13  ;;  %v3923_v13 = vld [vmem:[%s6956_s0 + $0x60] sm:$0xff] }
 0x873   : > { %5040 = vmatprep.subr.mxu1 %v5820_v61 }
 0x874   : > { %5041 = vmatpush3.msra.mxu1 %v3552_v14  ;;  %v3922_v14 = vld [vmem:[%s6956_s0 + $0x58] sm:$0xff] }
 0x875   : > { %5042 = vmatprep.subr.mxu1 %v5820_v61 }
 0x876   : > { %5043 = vmatpush3.msra.mxu1 %v3551_v15  ;;  %v3921_v15 = vld [vmem:[%s6956_s0 + $0x50] sm:$0xff] }
 0x877   : > { %5045 = vmatmul.mubr.msk.f32.vlgmr.msra.gmra.mxu1 %vm1548_vm0, %v1352_v3  ;;  %5047 = vmatprep.subr.mxu1 %v5820_v61  ;;  %v3940_v3 = vld [vmem:[%s6956_s0 + $0xe8] sm:$0xff] }
 0x878   : > { %5063 = vmatprep.mubr.msk.f32.mxu1 %vm5821_vm3, %v5820_v61  ;;  %5048 = vmatpush3.msra.mxu1 %v3637_v16  ;;  %v3920_v16 = vld [vmem:[%s6956_s0 + $0x48] sm:$0xff] }
 0x879   : > { %5049 = vmatprep.subr.mxu1 %v5820_v61  ;;  %3957 = vmatprep.subr.mxu0 %v3940_v3 }
 0x87a   : > { %5050 = vmatpush3.msra.mxu1 %v3636_v17  ;;  %3958 = vmatpush1.msra.mxu0 %v3939_v4  ;;  %v3919_v17 = vld [vmem:[%s6956_s0 + $0x40] sm:$0xff] }
 0x87b   : > { %5051 = vmatprep.subr.mxu1 %v5820_v61  ;;  %3959 = vmatprep.subr.mxu0 %v3938_v5 }
 0x87c   : > { %5052 = vmatpush3.msra.mxu1 %v3635_v18  ;;  %3960 = vmatpush1.msra.mxu0 %v3937_v2  ;;  %v3918_v18 = vld [vmem:[%s6956_s0 + $0x38] sm:$0xff] }
 0x87d   : > { %5053 = vmatprep.subr.mxu1 %v5820_v61  ;;  %3961 = vmatprep.subr.mxu0 %v3936_v43 }
 0x87e   : > { %5054 = vmatpush3.msra.mxu1 %v3634_v19  ;;  %v3917_v19 = vld [vmem:[%s6956_s0 + $0x30] sm:$0xff] }
 0x87f   : > { %5055 = vmatprep.subr.mxu1 %v5820_v61 }
 0x880   : > { %5056 = vmatpush3.msra.mxu1 %v3633_v20  ;;  %v3916_v20 = vld [vmem:[%s6956_s0 + $0x28] sm:$0xff] }
 0x881   : > { %5057 = vmatprep.subr.mxu1 %v5820_v61 }
 0x882   : > { %5058 = vmatpush3.msra.mxu1 %v3632_v22  ;;  %v3915_v22 = vld [vmem:[%s6956_s0 + $0x20] sm:$0xff] }
 0x883   : > { %5059 = vmatprep.subr.mxu1 %v5820_v61 }
 0x884   : > { %5060 = vmatpush3.msra.mxu1 %v3631_v27  ;;  %v3914_v27 = vld [vmem:[%s6956_s0 + $0x18] sm:$0xff] }
 0x885   : > { %5061 = vmatprep.subr.mxu1 %v5820_v61 }
 0x886   : > { %5062 = vmatpush3.msra.mxu1 %v3630_v28  ;;  %v3913_v28 = vld [vmem:[%s6956_s0 + $0x10] sm:$0xff] }
 0x887   : > { %5066 = vmatprep.subr.mxu1 %v5820_v61 }
 0x927   : > { %v3386_v29 = vpop.f32.mrf.mxu1 }
 0x928   : > { %v6788_v21 = vmul.f32 0.015625, %v3386_v29  ;;  %v3912_v29 = vld [vmem:[%s6956_s0 + $0x8] sm:$0xff] }
 0x929   : > { %v5027_v30 = vpop.f32.mrf.mxu1 }
 0x92a   : > { %v3391_v34 = vmul.f32 %v6788_v21, %v6788_v21  ;;  %v3911_v30 = vld [vmem:[%s6956_s0] sm:$0xff] }
 0x92c   : > { %v3393_v37 = vsel %vm3392_vm4, %v3391_v34, 0.0 }
 0x92d   : > { %3394 = vadd.xlane.f32.xlu1 %v3393_v37 }
 0x937   : > { %v3625_v38 = vpop.f32.mrf.mxu1 }
 0x938   : > { %v3629_v23 = vmul.f32 0.015625, %v3625_v38 }
 0x939   : > { %v5046_v40 = vpop.f32.mrf.mxu1 }
 0x93a   : > { %5064 = vmatmul.mubr.msk.f32.vlgmr.msra.gmra.mxu1 %vm1548_vm0, %v3629_v23 }
 0x93b   : > { %5067 = vmatpush3.msra.mxu1 %v3839_v39  ;;  %5098 = vmatprep.mubr.msk.f32.mxu1 %vm5821_vm3, %v5820_v61 }
 0x93c   : > { %5068 = vmatprep.subr.mxu1 %v5820_v61 }
 0x93d   : > { %5069 = vmatpush3.msra.mxu1 %v3838_v41 }
 0x93e   : > { %5070 = vmatprep.subr.mxu1 %v5820_v61 }
 0x93f   : > { %5071 = vmatpush3.msra.mxu1 %v3837_v42 }
 0x940   : > { %5072 = vmatprep.subr.mxu1 %v5820_v61 }
 0x941   : > { %5073 = vmatpush3.msra.mxu1 %v3836_v46 }
 0x942   : > { %5074 = vmatprep.subr.mxu1 %v5820_v61 }
 0x943   : > { %5075 = vmatpush3.msra.mxu1 %v3835_v47  ;;  %v4473_v47 = vld [vmem:[#allocation2] ss:$0 sm:$0xff] }
 0x944   : > { %5076 = vmatprep.subr.mxu1 %v5820_v61 }
 0x945   : > { %5077 = vmatpush3.msra.mxu1 %v3834_v50 }
 0x946   : > { %5078 = vmatprep.subr.mxu1 %v5820_v61 }
 0x947   : > { %5079 = vmatpush3.msra.mxu1 %v3833_v51 }
 0x948   : > { %5080 = vmatprep.subr.mxu1 %v5820_v61 }
 0x949   : > { %5081 = vmatpush3.msra.mxu1 %v3832_v52 }
 0x94a   : > { %5082 = vmatprep.subr.mxu1 %v5820_v61 }
 0x94b   : > { %5083 = vmatpush3.msra.mxu1 %v3831_v55  ;;  %v3840_v55 = vld [vmem:[#allocation23] sm:$0x1] }
 0x94c   : > { %5084 = vmatprep.subr.mxu1 %v5820_v61 }
 0x94d   : > { %5085 = vmatpush3.msra.mxu1 %v3830_v58 }
 0x94e   : > { %5086 = vmatprep.subr.mxu1 %v5820_v61 }
 0x94f   : > { %5087 = vmatpush3.msra.mxu1 %v3829_v60 }
 0x950   : > { %5088 = vmatprep.subr.mxu1 %v5820_v61 }
 0x951   : > { %5089 = vmatpush3.msra.mxu1 %v3828_v63  ;;  %v3948_v63 = vrot.slane %v3943_v62, %v6237_v26 }
 0x952   : > { %5090 = vmatprep.subr.mxu1 %v5820_v61 }
 0x953   : > { %5091 = vmatpush3.msra.mxu1 %v3827_v48 }
 0x954   : > { %5092 = vmatprep.subr.mxu1 %v5820_v61 }
 0x955   : > { %5093 = vmatpush3.msra.mxu1 %v3826_v49 }
 0x956   : > { %5094 = vmatprep.subr.mxu1 %v5820_v61 }
 0x957   : > { %5095 = vmatpush3.msra.mxu1 %v3825_v36  ;;  %v4032_v36 = vunpack.c.l.s4 %v5822_v57 }
 0x958   : > { %5096 = vmatprep.subr.mxu1 %v5820_v61  ;;  %v3935_v61 = vld [vmem:[%s6956_s0 + $0xc0] sm:$0xff]  ;;  %s1331_s0 = scalar_lea.vmem %s6009_s1, %s4385_s2 }
 0x959   : > { %5097 = vmatpush3.msra.mxu1 %v3824_v32  ;;  %3962 = vmatpush1.msra.mxu0 %v3935_v61  ;;  %v4033_v32 = vunpack.c.0.s8 %v4032_v36 }
 0x95a   : > { %5099 = vmatmul.mubr.f32.vlgmr.msra.gmra.mxu1 %v3823_v59  ;;  %3963 = vmatprep.subr.mxu0 %v3934_v44 }
 0x95b   : > { %3964 = vmatpush1.msra.mxu0 %v3933_v54  ;;  %v4036_v35 = vsub.s32 %v4033_v32, %v6234_v25 }
 0x95c   : > { %3965 = vmatprep.subr.mxu0 %v3932_v6 }
 0x95d   : > { %3966 = vmatpush1.msra.mxu0 %v3931_v7 }
 0x95e   : > { %3967 = vmatprep.subr.mxu0 %v3930_v45 }
 0x95f   : > { %3968 = vmatpush1.msra.mxu0 %v3929_v53 }
 0x960   : > { %3969 = vmatprep.subr.mxu0 %v3928_v8 }
 0x961   : > { %3970 = vmatpush1.msra.mxu0 %v3927_v9 }
 0x962   : > { %3971 = vmatprep.subr.mxu0 %v3926_v10 }
 0x963   : > { %3972 = vmatpush1.msra.mxu0 %v3925_v11 }
 0x964   : > { %3973 = vmatprep.subr.mxu0 %v3924_v12 }
 0x965   : > { %3974 = vmatpush1.msra.mxu0 %v3923_v13 }
 0x966   : > { %3975 = vmatprep.subr.mxu0 %v3922_v14 }
 0x967   : > { %3976 = vmatpush1.msra.mxu0 %v3921_v15 }
 0x968   : > { %3977 = vmatprep.subr.mxu0 %v3920_v16 }
 0x969   : > { %3978 = vmatpush1.msra.mxu0 %v3919_v17 }
 0x96a   : > { %3979 = vmatprep.subr.mxu0 %v3918_v18 }
 0x96b   : > { %3980 = vmatpush1.msra.mxu0 %v3917_v19 }
 0x96c   : > { %3981 = vmatprep.subr.mxu0 %v3916_v20 }
 0x96d   : > { %3982 = vmatpush1.msra.mxu0 %v3915_v22 }
 0x96e   : > { %3983 = vmatprep.subr.mxu0 %v3914_v27 }
 0x96f   : > { %3984 = vmatpush1.msra.mxu0 %v3913_v28 }
 0x970   : > { %3985 = vmatprep.subr.mxu0 %v3912_v29 }
 0x971   : > { %3986 = vmatpush1.msra.mxu0 %v3911_v30 }
 0x9b6   : > { %v3395_v34 = vpop.xlane.xlu1 %3394 }
 0x9b7   : > { %5321 = vrsqrt.f32 %v3395_v34  ;;  %vm3398_vm5 = vcmp.eq.f32.partialorder %v3395_v34, inf  ;;  %v3401_v23 = vand.u32 2147483648, %v3395_v34  ;;  %vm3400_vm6 = vcmp.eq.f32.partialorder %v3395_v34, 0.0 }
 0x9c4   : > { %v5322_v37 = vpop.eup %5321 }
 0x9c5   : > { %v3397_v38 = vmul.f32 %v5322_v37, %v3395_v34 }
 0x9c7   : > { %v3399_v39 = vsel %vm3398_vm5, %v3395_v34, %v3397_v38 }
 0x9c8   : > { %v3402_v40 = vsel %vm3400_vm6, %v3401_v23, %v3399_v39 }
 0x9c9   : > { %v3403_v41 = vmax.f32 %v3402_v40, 1e-06 }
 0x9cb   : > { %5323 = vrcp.f32 %v3403_v41 }
 0x9d8   : > { %v5324_v42 = vpop.eup %5323 }
 0x9d9   : > { %v3405_v46 = vmul.f32 %v5324_v42, %v6788_v21  ;;  %v3952_v21 = vrot.slane %v3943_v62, %v6240_v31 }
 0x9db   : > { %3406 = vst.msk [vmem:[%s1327_s3] sm:$0x7] %vm3392_vm4, %v3405_v46  ;;  %s4387_s3 = sshll.u32 %s6958_s4, 1 }
 0x9fa   : > { %v3714_v50 = vpop.f32.mrf.mxu1 }
 0x9fb   : > { %v3715_v51 = vadd.f32 %v4473_v47, %v3714_v50 }
 0x9fc   : > { %v5065_v52 = vpop.f32.mrf.mxu1 }
 0x9fd   : > { %3719 = vst.msk [vmem:[%s1331_s0] sm:$0x7] %vm3718_vm7, %v3715_v51  ;;  %s1335_s0 = scalar_lea.vmem %s6014_s10, %s4387_s3 }
 0xa1a   : > { %v3907_v56 = vpop.f32.mrf.mxu1 }
 0xa1b   : > { %v3908_v58 = vadd.f32 %v3907_v56, %v3840_v55 }
 0xa1c   : > { %v5100_v60 = vpop.f32.mrf.mxu1 }
 0xa1d   : > { %4020 = vmatmul.mubr.f32.vlgmr.msra.gmra.mxu0 %v3908_v58 }
 0xadd   : > { %v4021_v0 = vpop.f32.mrf.mxu0 }
 0xade   : > { %v4022_v48 = vadd.f32 %v4021_v0, %v3948_v63 }
 0xadf   : > { %v4023_v1 = vpop.f32.mrf.mxu0 }
 0xae0   : > { %v4024_v49 = vadd.f32 %v4023_v1, %v3952_v21  ;;  %5325 = vtanh.f32 %v4022_v48 }
 0xae2   : > { %5327 = vtanh.f32 %v4024_v49 }
 0xaed   : > { %v5326_v59 = vpop.eup %5325 }
 0xaef   : > { %v5328_v33 = vpop.eup %5327 }
 0xaf0   : > { %v4030_v3 = vcombine.low %v5326_v59, %v5328_v33 }
 0xaf2   : > { %v4037_v4 = vrot.slane %v4030_v3, %v4036_v35 }
 0xaf4   : > { %v4044_v26 = vrot.slane %v4037_v4, %v4036_v35 }
 0xaf6   : > { %4050 = vst.msk [vmem:[%s1335_s0] sm:$0x3] %vm4048_vm8, %v4044_v26 }
 0xaf7 PF: > { %s96_s14 = sadd.s32 1, %s5763_s14  }
 0xaf8   : > { %p93_p3 = scmp.ge.s32.totalorder %s96_s14, 4  }
 0xafa   :  { %95 = sbr.rel (!%p93_p3) target bundleno = 71 (0x47), region = 312 }
 0xaff   :  { %4098 = vsyncpa [#allocation4], 1 }
 0xb00   :  { %4100 = vsyncpa [#allocation4 + $0x1], 1 }
 0xb01   :  { %4101 = vsyncpa [#allocation6], 1 }
 0xb02   :  { %4102 = vsyncpa [#allocation9], 1 }
 0xb03   :  { %4103 = vsyncpa [#allocation12], 1 }
 0xb04   :  { %4104 = vsyncpa [#allocation15], 1 }
 0xb05   :  { %4105 = vsyncpa [#allocation18], 1 }
 0xb06   :  { %4106 = vsyncpa [#allocation21], 1 }
 0xb07   :  { %4107 = vsyncpa [#allocation24], 1 }

</bundles_post_ra>
